<compile_context>
chip_gen: v6e
topology: v6e:2x2x1
jax: 0.10.0
libtpu: 0.0.40
codegen_flags: <defaults>
</compile_context>

<pallas_src>
import itertools
import math

import numpy as np
import jax
import jax.numpy as jnp
from jax import lax
from jax.experimental import pallas as pl
from jax.experimental.pallas import tpu as pltpu  # noqa: F401  (no TPU-specific params needed at these sizes)

# ---- static config (small shapes) ----
B = 2                      # batch
Q = 8                      # number of queries
NUM_CLASSES = 1            # real classes; lane class id = 0
C1 = NUM_CLASSES + 1       # logit channels (last = no-object)
NPTS = 10                  # sample points per lane
TMAX = 4                   # padded max targets per image
TN = TMAX * NPTS           # lane-packed points per image
TGT_D = 3 + 2 * NPTS       # [class, lower, upper, xs..., ys...]
BQ = B * Q
EPS = 1e-5                 # guard for dy = y - f''  (avoids inf/NaN in the curve model)
OUT_W = 128                # lane-dense output row

# AELoss has no learnable parameters; its "weights" are these loss coefficients.
WEIGHT_DICT = {'loss_ce': 3.0, 'loss_curves': 5.0, 'loss_lowers': 2.0, 'loss_uppers': 2.0}
EOS_COEF = 1.0             # => plain (unweighted) cross-entropy mean

# All ordered selections of TMAX distinct queries: exact-assignment search space, P(8,4)=1680.
PERMS_NP = np.asarray(list(itertools.permutations(range(Q), TMAX)), np.int32)   # (P, TMAX)
P = PERMS_NP.shape[0]

# PMASK[t, q, p] = 1  iff  permutation p assigns query q to target slot t
PMASK_NP = np.zeros((TMAX, Q, P), np.float32)
for _t in range(TMAX):
    PMASK_NP[_t, PERMS_NP[:, _t], np.arange(P)] = 1.0
# SEG[t*NPTS + n, t] = 1  (segment-sum matrix: per-target reduction of lane-packed points)
SEG_NP = np.zeros((TN, TMAX), np.float32)
for _t in range(TMAX):
    SEG_NP[_t * NPTS:(_t + 1) * NPTS, _t] = 1.0

PMASK_J = jnp.asarray(PMASK_NP)   # (TMAX, Q, P)
SEG_J = jnp.asarray(SEG_NP)       # (TN, TMAX)

# output-row lanes
L_CE, L_CARD, L_LOW, L_UPP, L_CRV, L_TOTAL = 0, 1, 2, 3, 4, 5
L_IDX0 = 8                 # lanes 8 .. 8+B*TMAX-1 = matched query index per (image, target slot)


def _sum_all(x):
    # full reduction to a (1, 1) tile via two single-axis reduces (lane reduce, then sublane)
    return jnp.sum(jnp.sum(x, axis=-1, keepdims=True), axis=0, keepdims=True)


# ----------------------------------------------------------------------------
# Fused criterion kernel: matcher costs + exact assignment + SetCriterion losses.
# ----------------------------------------------------------------------------
def _criterion_kernel(plog_ref, pcur_ref, tgt_ref, pmask_ref, seg_ref, out_ref):
    # plog_ref  : (B, Q, C1)        prediction logits
    # pcur_ref  : (B, Q, 8)         prediction curve parameters
    # tgt_ref   : (B, 4, TN)        rows: [xs | ys | w40 | scalars(labels,lowers,uppers,valid)]
    # pmask_ref : (TMAX, Q, P)      permutation one-hot table
    # seg_ref   : (TN, TMAX)        per-target segment-sum matrix
    # out_ref   : (1, OUT_W)        lane-dense result row
    lane = lax.broadcasted_iota(jnp.int32, (1, OUT_W), 1)
    zero11 = jnp.zeros((1, 1), jnp.float32)

    ce_sum = zero11
    low_sum = zero11
    upp_sum = zero11
    crv_sum = zero11
    card_sum = zero11
    ncur_sum = zero11
    out_row = jnp.zeros((1, OUT_W), jnp.float32)

    seg = seg_ref[...]                                               # (TN, TMAX)
    q_iota = lax.broadcasted_iota(jnp.int32, (Q, 1), 0).astype(jnp.float32)
    laneT = lax.broadcasted_iota(jnp.int32, (Q, TMAX), 1)
    lane40 = lax.broadcasted_iota(jnp.int32, (Q, TN), 1)
    piota = lax.broadcasted_iota(jnp.int32, (1, P), 1).astype(jnp.float32)

    for b in range(B):                                               # B = 2: static unroll
        logits = plog_ref[b].astype(jnp.float32)                     # (Q, C1)
        curves = pcur_ref[b].astype(jnp.float32)                     # (Q, 8)
        tb = tgt_ref[b].astype(jnp.float32)                          # (4, TN)
        xs = tb[0:1, :]                                              # (1, TN)
        ys = tb[1:2, :]
        w40 = tb[2:3, :]                                             # per-point matcher/loss weight
        sc = tb[3:4, :]                                              # (1, TN) scalar row
        labels = sc[:, 0:TMAX]                                       # (1, TMAX)
        lowers = sc[:, TMAX:2 * TMAX]
        uppers = sc[:, 2 * TMAX:3 * TMAX]
        valid = sc[:, 3 * TMAX:4 * TMAX]

        # --- class probabilities / log-probs (C1 == 2: keep everything as lane slices) ---
        mx = jnp.max(logits, axis=-1, keepdims=True)
        e = jnp.exp(logits - mx)
        se = jnp.sum(e, axis=-1, keepdims=True)
        probs = e / se
        logp = (logits - mx) - jnp.log(se)
        prob0 = probs[:, 0:1]
        prob1 = probs[:, 1:2]
        logp0 = logp[:, 0:1]
        logp1 = logp[:, 1:2]

        # --- matcher costs (Q, TMAX): query on sublanes, target slot on lanes ---
        cost_class = -jnp.where(labels == 0.0, prob0, prob1)
        cost_lower = jnp.abs(curves[:, 0:1] - lowers)
        cost_upper = jnp.abs(curves[:, 1:2] - uppers)

        # --- lane curve model at all target points, lane-packed (Q, TN) ---
        k = curves[:, 2:3]
        f = curves[:, 3:4]
        mm = curves[:, 4:5]
        nn = curves[:, 5:6]
        bb = curves[:, 6:7]
        b3 = curves[:, 7:8]
        dy = ys - f
        dy = jnp.where(jnp.abs(dy) < EPS, jnp.where(dy >= 0.0, EPS, -EPS), dy)
        inv0 = pl.reciprocal(dy, approx=True)                        # EUP slot
        inv = inv0 * (2.0 - dy * inv0)                               # one Newton step (VPU)
        pred_x = (k * inv + mm) * inv + nn + bb * ys - b3            # (Q, TN)
        pdiff = jnp.where(xs >= 0.0, jnp.abs(pred_x - xs), 0.0)
        pdiff_w = pdiff * w40                                        # shared by matcher + loss

        # per-target polynomial cost via one small matmul on the MXU
        cost_poly = jnp.dot(pdiff_w, seg, preferred_element_type=jnp.float32)   # (Q, TMAX)

        cost = (WEIGHT_DICT['loss_ce'] * cost_class
                + WEIGHT_DICT['loss_curves'] * cost_poly
                + WEIGHT_DICT['loss_lowers'] * cost_lower
                + WEIGHT_DICT['loss_uppers'] * cost_upper) * valid   # padded columns -> 0

        # --- exact assignment: cost of every ordered query selection, (1, P) on lanes ---
        pcost = jnp.zeros((1, P), jnp.float32)
        for t in range(TMAX):
            pcost = pcost + jnp.sum(pmask_ref[t] * cost[:, t:t + 1], axis=0, keepdims=True)
        pmin = jnp.min(pcost, axis=-1, keepdims=True)
        pidx = jnp.min(jnp.where(pcost <= pmin, piota, float(P)), axis=-1, keepdims=True)
        sel = (piota == pidx).astype(jnp.float32)                    # one-hot best permutation

        # --- scatter the winning permutation back onto the queries (no gathers) ---
        assignv = jnp.zeros((Q, TMAX), jnp.float32)
        assignv40 = jnp.zeros((Q, TN), jnp.float32)
        for t in range(TMAX):
            a_col = jnp.sum(pmask_ref[t] * sel, axis=-1, keepdims=True)   # (Q, 1) one-hot query
            v_t = valid[:, t:t + 1]                                       # (1, 1)
            a_colv = a_col * v_t
            assignv = assignv + a_colv * (laneT == t).astype(jnp.float32)
            win = ((lane40 >= t * NPTS) & (lane40 < (t + 1) * NPTS)).astype(jnp.float32)
            assignv40 = assignv40 + a_colv * win
            qid = _sum_all(a_col * q_iota)                                # matched query index
            out_row = out_row + jnp.where(lane == (L_IDX0 + b * TMAX + t), qid, 0.0)

        # --- losses ---
        mask_q = jnp.sum(assignv, axis=-1, keepdims=True)                 # (Q, 1) matched flag
        tclass = (jnp.sum(assignv * labels, axis=-1, keepdims=True)
                  + (1.0 - mask_q) * float(NUM_CLASSES))
        nll = -jnp.where(tclass == 0.0, logp0, logp1)                     # (Q, 1)
        ce_sum = ce_sum + _sum_all(nll)

        low_sum = low_sum + _sum_all(assignv * cost_lower)
        upp_sum = upp_sum + _sum_all(assignv * cost_upper)
        crv_sum = crv_sum + _sum_all(assignv40 * pdiff_w)

        # cardinality: argmax class is not the no-object (last) class
        is_obj = (logits[:, 0:1] >= logits[:, 1:2]).astype(jnp.float32)
        card_pred = _sum_all(is_obj)
        n_tgt = _sum_all(valid)
        card_sum = card_sum + jnp.abs(card_pred - n_tgt)
        ncur_sum = ncur_sum + n_tgt

    # --- finalize ---
    ce = ce_sum * (1.0 / float(BQ))                      # eos_coef == 1.0 -> plain mean
    card_err = card_sum * (1.0 / float(B))
    ncur = jnp.maximum(ncur_sum, 1.0)
    loss_low = low_sum / ncur
    loss_upp = upp_sum / ncur
    loss_crv = crv_sum / ncur
    total = (WEIGHT_DICT['loss_ce'] * ce
             + WEIGHT_DICT['loss_curves'] * loss_crv
             + WEIGHT_DICT['loss_lowers'] * loss_low
             + WEIGHT_DICT['loss_uppers'] * loss_upp)

    out_row = (out_row
               + jnp.where(lane == L_CE, ce, 0.0)
               + jnp.where(lane == L_CARD, card_err, 0.0)
               + jnp.where(lane == L_LOW, loss_low, 0.0)
               + jnp.where(lane == L_UPP, loss_upp, 0.0)
               + jnp.where(lane == L_CRV, loss_crv, 0.0)
               + jnp.where(lane == L_TOTAL, total, 0.0))
    out_ref[...] = out_row


# ----------------------------------------------------------------------------
# Device wrapper: one pallas_call + trivial fused slicing, all inside one jit.
# ----------------------------------------------------------------------------
@jax.jit
def _criterion_device(pred_logits, pred_curves, tgt_all):
    row = pl.pallas_call(
        _criterion_kernel,
        out_shape=jax.ShapeDtypeStruct((1, OUT_W), jnp.float32),
    )(pred_logits.astype(jnp.float32), pred_curves.astype(jnp.float32),
      tgt_all, PMASK_J, SEG_J)
    r = row[0]
    loss_dict = {
        'loss_ce': r[L_CE],
        'cardinality_error': r[L_CARD],
        'loss_lowers': r[L_LOW],
        'loss_uppers': r[L_UPP],
        'loss_curves': r[L_CRV],
    }
    scaled = {k: loss_dict[k] * WEIGHT_DICT[k] for k in WEIGHT_DICT}
    losses = r[L_TOTAL]
    best_perm = r[L_IDX0:L_IDX0 + B * TMAX].reshape(B, TMAX).astype(jnp.int32)
    return loss_dict, scaled, losses, best_perm


def set_criterion(outputs, gt_cluxy):
    # pad the ragged per-image targets into ONE pre-staged slab (single H2D upload);
    # the matcher/loss point weights are target-only data, so compute them here in numpy.
    xs = np.full((B, TMAX, NPTS), -2.0, np.float32)     # invalid xs marker
    ys = np.ones((B, TMAX, NPTS), np.float32)           # safe ys for padded lanes
    labels = np.zeros((B, TMAX), np.float32)
    lowers = np.zeros((B, TMAX), np.float32)
    uppers = np.zeros((B, TMAX), np.float32)
    valid = np.zeros((B, TMAX), np.float32)
    for b, g in enumerate(gt_cluxy):
        g = np.asarray(g, np.float32)
        n = int(g.shape[0])
        if n:
            labels[b, :n] = g[:, 0]
            lowers[b, :n] = g[:, 1]
            uppers[b, :n] = g[:, 2]
            xs[b, :n] = g[:, 3:3 + NPTS]
            ys[b, :n] = g[:, 3 + NPTS:3 + 2 * NPTS]
            valid[b, :n] = 1.0

    vpts = ((xs >= 0.0) & (valid[:, :, None] > 0.0)).astype(np.float32)
    total = float(vpts.sum())
    per = vpts.sum(-1)
    w = np.where(per > 0.0, np.sqrt(total / np.maximum(per, 1.0)), 0.0).astype(np.float32)
    wmax = float(w.max()) if w.size else 0.0
    if wmax > 0.0:
        w = (w / max(wmax, 1e-12)).astype(np.float32)
    w = w * valid
    w40 = np.repeat(w, NPTS, axis=-1)                                  # (B, TN)

    tgt_all = np.zeros((B, 4, TN), np.float32)
    tgt_all[:, 0, :] = xs.reshape(B, TN)
    tgt_all[:, 1, :] = ys.reshape(B, TN)
    tgt_all[:, 2, :] = w40
    tgt_all[:, 3, 0:TMAX] = labels
    tgt_all[:, 3, TMAX:2 * TMAX] = lowers
    tgt_all[:, 3, 2 * TMAX:3 * TMAX] = uppers
    tgt_all[:, 3, 3 * TMAX:4 * TMAX] = valid

    loss_dict, scaled, losses, best_perm = _criterion_device(
        outputs['pred_logits'], outputs['pred_curves'], jnp.asarray(tgt_all))

    sizes = [int(np.asarray(g).shape[0]) for g in gt_cluxy]
    indices = (best_perm, sizes)        # matcher indices stay on device (no host sync)
    return loss_dict, scaled, losses, indices


def ae_loss_forward(iteration, save, viz_split, outputs, targets):
    gt_cluxy = [np.asarray(t[0], np.float32) for t in targets[1:]]
    loss_dict, loss_dict_scaled, losses, indices = set_criterion(outputs, gt_cluxy)

    loss_dict_reduced = dict(loss_dict)                 # reduce_dict: identity at world_size == 1
    loss_dict_reduced_unscaled = {f'{k}_unscaled': v for k, v in loss_dict_reduced.items()}
    loss_dict_reduced_scaled = dict(loss_dict_scaled)
    losses_reduced_scaled = losses                      # == sum of the scaled dict (computed in-kernel)
    loss_value = float(losses_reduced_scaled)           # the single required host sync (.item() in reference)
    if not math.isfinite(loss_value):
        raise SystemExit('Loss is {}, stopping training'.format(loss_value))
    # TODO(synk): `save` branch (save_debug_images_boxes visualization / file I/O) omitted.
    return losses, loss_dict_reduced, loss_dict_reduced_unscaled, loss_dict_reduced_scaled, loss_value


# ----------------------------------------------------------------------------
if __name__ == "__main__":
    key = jax.random.PRNGKey(0)
    k1, k2, k3 = jax.random.split(key, 3)

    pred_logits = jax.random.normal(k1, (B, Q, C1), dtype=jnp.float32)
    pred_curves = jax.random.normal(k2, (B, Q, 8), dtype=jnp.float32) * 0.1
    # keep the vertical-shift parameter f'' away from the sampled y range (like trained LSTR)
    pred_curves = pred_curves.at[:, :, 3].add(-1.0)

    # synthetic ground-truth lanes: [class, lower, upper, xs(NPTS), ys(NPTS)]
    sizes = [2, 3]
    ys_grid = np.linspace(0.2, 0.9, NPTS).astype(np.float32)
    rand_xs = np.asarray(jax.random.uniform(k3, (sum(sizes), NPTS),
                                            minval=0.2, maxval=0.8), np.float32)
    gt_list, off = [], 0
    for b, n in enumerate(sizes):
        lanes = np.zeros((n, TGT_D), np.float32)
        for t in range(n):
            xs_t = rand_xs[off + t].copy()
            n_valid = NPTS - t                         # vary #valid points per lane
            xs_t[n_valid:] = -2.0                      # invalid/padded points marked negative
            lanes[t, 0] = 0.0                          # lane class id
            lanes[t, 1] = float(ys_grid[0])            # lower
            lanes[t, 2] = float(ys_grid[n_valid - 1])  # upper
            lanes[t, 3:3 + NPTS] = xs_t
            lanes[t, 3 + NPTS:] = ys_grid
        gt_list.append(lanes)
        off += n

    # targets[0] would be the viz images (unused here); targets[1:] hold per-image lane tensors
    targets = [None] + [jnp.asarray(g)[None] for g in gt_list]
    outputs = {'pred_logits': pred_logits, 'pred_curves': pred_curves}

    losses, ld, ld_unscaled, ld_scaled, loss_value = ae_loss_forward(
        0, False, 'train', outputs, targets)
    jax.block_until_ready(losses)
    assert math.isfinite(loss_value)
    print("KERNEL_OK")
</pallas_src>

<mosaic_0001>
module attributes {stable_mosaic.version = 11 : i64} {
  func.func @_criterion_kernel(%arg0: memref<2x8x2xf32, #tpu.memory_space<vmem>>, %arg1: memref<2x8x8xf32, #tpu.memory_space<vmem>>, %arg2: memref<2x4x40xf32, #tpu.memory_space<vmem>>, %arg3: memref<4x8x1680xf32, #tpu.memory_space<vmem>>, %arg4: memref<40x4xf32, #tpu.memory_space<vmem>>, %arg5: memref<1x128xf32, #tpu.memory_space<vmem>>) attributes {dimension_semantics = [], scalar_prefetch = 0 : i64, scratch_operands = 0 : i64, tpu.core_type = #tpu.core_type<tc>} {
    %0 = tpu.iota {dimensions = array<i32: 1>} : vector<1x128xi32>
    %cst = arith.constant 0.000000e+00 : f32
    %1 = vector.broadcast %cst : f32 to vector<1x1xf32>
    %cst_0 = arith.constant 0.000000e+00 : f32
    %2 = vector.broadcast %cst_0 : f32 to vector<1x128xf32>
    %c0 = arith.constant 0 : index
    %c0_1 = arith.constant 0 : index
    %3 = vector.load %arg4[%c0, %c0_1] : memref<40x4xf32, #tpu.memory_space<vmem>>, vector<40x4xf32>
    %4 = tpu.iota {dimensions = array<i32: 0>} : vector<8x1xi32>
    %5 = arith.sitofp %4 : vector<8x1xi32> to vector<8x1xf32>
    %6 = tpu.iota {dimensions = array<i32: 1>} : vector<8x4xi32>
    %7 = tpu.iota {dimensions = array<i32: 1>} : vector<8x40xi32>
    %8 = tpu.iota {dimensions = array<i32: 1>} : vector<1x1680xi32>
    %9 = arith.sitofp %8 : vector<1x1680xi32> to vector<1x1680xf32>
    %c0_2 = arith.constant 0 : index
    %c0_3 = arith.constant 0 : index
    %c0_4 = arith.constant 0 : index
    %10 = vector.load %arg0[%c0_2, %c0_3, %c0_4] : memref<2x8x2xf32, #tpu.memory_space<vmem>>, vector<1x8x2xf32>
    %11 = vector.shape_cast %10 : vector<1x8x2xf32> to vector<8x2xf32>
    %c0_5 = arith.constant 0 : index
    %c0_6 = arith.constant 0 : index
    %c0_7 = arith.constant 0 : index
    %12 = vector.load %arg1[%c0_5, %c0_6, %c0_7] : memref<2x8x8xf32, #tpu.memory_space<vmem>>, vector<1x8x8xf32>
    %13 = vector.shape_cast %12 : vector<1x8x8xf32> to vector<8x8xf32>
    %c0_8 = arith.constant 0 : index
    %c0_9 = arith.constant 0 : index
    %c0_10 = arith.constant 0 : index
    %14 = vector.load %arg2[%c0_8, %c0_9, %c0_10] : memref<2x4x40xf32, #tpu.memory_space<vmem>>, vector<1x4x40xf32>
    %15 = vector.shape_cast %14 : vector<1x4x40xf32> to vector<4x40xf32>
    %16 = vector.extract_strided_slice %15 {offsets = [0, 0], sizes = [1, 40], strides = [1, 1]} : vector<4x40xf32> to vector<1x40xf32>
    %17 = vector.extract_strided_slice %15 {offsets = [1, 0], sizes = [1, 40], strides = [1, 1]} : vector<4x40xf32> to vector<1x40xf32>
    %18 = vector.extract_strided_slice %15 {offsets = [2, 0], sizes = [1, 40], strides = [1, 1]} : vector<4x40xf32> to vector<1x40xf32>
    %19 = vector.extract_strided_slice %15 {offsets = [3, 0], sizes = [1, 40], strides = [1, 1]} : vector<4x40xf32> to vector<1x40xf32>
    %20 = vector.extract_strided_slice %19 {offsets = [0, 0], sizes = [1, 4], strides = [1, 1]} : vector<1x40xf32> to vector<1x4xf32>
    %21 = vector.extract_strided_slice %19 {offsets = [0, 4], sizes = [1, 4], strides = [1, 1]} : vector<1x40xf32> to vector<1x4xf32>
    %22 = vector.extract_strided_slice %19 {offsets = [0, 8], sizes = [1, 4], strides = [1, 1]} : vector<1x40xf32> to vector<1x4xf32>
    %23 = vector.extract_strided_slice %19 {offsets = [0, 12], sizes = [1, 4], strides = [1, 1]} : vector<1x40xf32> to vector<1x4xf32>
    %cst_11 = arith.constant dense<0xFF800000> : vector<8xf32>
    %24 = vector.multi_reduction <maximumf>, %11, %cst_11 [1] : vector<8x2xf32> to vector<8xf32>
    %25 = vector.shape_cast %24 : vector<8xf32> to vector<8x1xf32>
    %26 = vector.broadcast %25 : vector<8x1xf32> to vector<8x2xf32>
    %27 = arith.subf %11, %26 : vector<8x2xf32>
    %28 = math.exp %27 : vector<8x2xf32>
    %cst_12 = arith.constant dense<0.000000e+00> : vector<8xf32>
    %29 = vector.multi_reduction <add>, %28, %cst_12 [1] : vector<8x2xf32> to vector<8xf32>
    %30 = vector.shape_cast %29 : vector<8xf32> to vector<8x1xf32>
    %31 = vector.broadcast %30 : vector<8x1xf32> to vector<8x2xf32>
    %32 = arith.divf %28, %31 : vector<8x2xf32>
    %33 = vector.broadcast %25 : vector<8x1xf32> to vector<8x2xf32>
    %34 = arith.subf %11, %33 : vector<8x2xf32>
    %35 = math.log %30 : vector<8x1xf32>
    %36 = vector.broadcast %35 : vector<8x1xf32> to vector<8x2xf32>
    %37 = arith.subf %34, %36 : vector<8x2xf32>
    %38 = vector.extract_strided_slice %32 {offsets = [0, 0], sizes = [8, 1], strides = [1, 1]} : vector<8x2xf32> to vector<8x1xf32>
    %39 = vector.extract_strided_slice %32 {offsets = [0, 1], sizes = [8, 1], strides = [1, 1]} : vector<8x2xf32> to vector<8x1xf32>
    %40 = vector.extract_strided_slice %37 {offsets = [0, 0], sizes = [8, 1], strides = [1, 1]} : vector<8x2xf32> to vector<8x1xf32>
    %41 = vector.extract_strided_slice %37 {offsets = [0, 1], sizes = [8, 1], strides = [1, 1]} : vector<8x2xf32> to vector<8x1xf32>
    %cst_13 = arith.constant 0.000000e+00 : f32
    %42 = vector.broadcast %cst_13 : f32 to vector<1x4xf32>
    %43 = arith.cmpf oeq, %20, %42 : vector<1x4xf32>
    %44 = vector.shape_cast %43 : vector<1x4xi1> to vector<1x4xi1>
    %45 = vector.broadcast %44 : vector<1x4xi1> to vector<8x4xi1>
    %46 = vector.shape_cast %38 : vector<8x1xf32> to vector<8x1xf32>
    %47 = vector.broadcast %46 : vector<8x1xf32> to vector<8x4xf32>
    %48 = vector.shape_cast %39 : vector<8x1xf32> to vector<8x1xf32>
    %49 = vector.broadcast %48 : vector<8x1xf32> to vector<8x4xf32>
    %50 = arith.select %45, %47, %49 : vector<8x4xi1>, vector<8x4xf32>
    %cst_14 = arith.constant 0.000000e+00 : f32
    %51 = vector.broadcast %cst_14 : f32 to vector<8x4xf32>
    %52 = arith.subf %51, %50 : vector<8x4xf32>
    %53 = vector.extract_strided_slice %13 {offsets = [0, 0], sizes = [8, 1], strides = [1, 1]} : vector<8x8xf32> to vector<8x1xf32>
    %54 = vector.broadcast %53 : vector<8x1xf32> to vector<8x4xf32>
    %55 = vector.broadcast %21 : vector<1x4xf32> to vector<8x4xf32>
    %56 = arith.subf %54, %55 : vector<8x4xf32>
    %57 = math.absf %56 : vector<8x4xf32>
    %58 = vector.extract_strided_slice %13 {offsets = [0, 1], sizes = [8, 1], strides = [1, 1]} : vector<8x8xf32> to vector<8x1xf32>
    %59 = vector.broadcast %58 : vector<8x1xf32> to vector<8x4xf32>
    %60 = vector.broadcast %22 : vector<1x4xf32> to vector<8x4xf32>
    %61 = arith.subf %59, %60 : vector<8x4xf32>
    %62 = math.absf %61 : vector<8x4xf32>
    %63 = vector.extract_strided_slice %13 {offsets = [0, 2], sizes = [8, 1], strides = [1, 1]} : vector<8x8xf32> to vector<8x1xf32>
    %64 = vector.extract_strided_slice %13 {offsets = [0, 3], sizes = [8, 1], strides = [1, 1]} : vector<8x8xf32> to vector<8x1xf32>
    %65 = vector.extract_strided_slice %13 {offsets = [0, 4], sizes = [8, 1], strides = [1, 1]} : vector<8x8xf32> to vector<8x1xf32>
    %66 = vector.extract_strided_slice %13 {offsets = [0, 5], sizes = [8, 1], strides = [1, 1]} : vector<8x8xf32> to vector<8x1xf32>
    %67 = vector.extract_strided_slice %13 {offsets = [0, 6], sizes = [8, 1], strides = [1, 1]} : vector<8x8xf32> to vector<8x1xf32>
    %68 = vector.extract_strided_slice %13 {offsets = [0, 7], sizes = [8, 1], strides = [1, 1]} : vector<8x8xf32> to vector<8x1xf32>
    %69 = vector.broadcast %17 : vector<1x40xf32> to vector<8x40xf32>
    %70 = vector.broadcast %64 : vector<8x1xf32> to vector<8x40xf32>
    %71 = arith.subf %69, %70 : vector<8x40xf32>
    %72 = math.absf %71 : vector<8x40xf32>
    %cst_15 = arith.constant 9.99999974E-6 : f32
    %73 = vector.broadcast %cst_15 : f32 to vector<8x40xf32>
    %74 = arith.cmpf olt, %72, %73 : vector<8x40xf32>
    %cst_16 = arith.constant 0.000000e+00 : f32
    %75 = vector.broadcast %cst_16 : f32 to vector<8x40xf32>
    %76 = arith.cmpf oge, %71, %75 : vector<8x40xf32>
    %cst_17 = arith.constant 9.99999974E-6 : f32
    %cst_18 = arith.constant -9.99999974E-6 : f32
    %77 = vector.broadcast %cst_17 : f32 to vector<8x40xf32>
    %78 = vector.broadcast %cst_18 : f32 to vector<8x40xf32>
    %79 = arith.select %76, %77, %78 : vector<8x40xi1>, vector<8x40xf32>
    %80 = arith.select %74, %79, %71 : vector<8x40xi1>, vector<8x40xf32>
    %81 = tpu.reciprocal %80 {approx = true} : vector<8x40xf32> -> vector<8x40xf32>
    %82 = arith.mulf %80, %81 : vector<8x40xf32>
    %cst_19 = arith.constant 2.000000e+00 : f32
    %83 = vector.broadcast %cst_19 : f32 to vector<8x40xf32>
    %84 = arith.subf %83, %82 : vector<8x40xf32>
    %85 = arith.mulf %81, %84 : vector<8x40xf32>
    %86 = vector.broadcast %63 : vector<8x1xf32> to vector<8x40xf32>
    %87 = arith.mulf %86, %85 : vector<8x40xf32>
    %88 = vector.broadcast %65 : vector<8x1xf32> to vector<8x40xf32>
    %89 = arith.addf %87, %88 : vector<8x40xf32>
    %90 = arith.mulf %89, %85 : vector<8x40xf32>
    %91 = vector.broadcast %66 : vector<8x1xf32> to vector<8x40xf32>
    %92 = arith.addf %90, %91 : vector<8x40xf32>
    %93 = vector.broadcast %67 : vector<8x1xf32> to vector<8x40xf32>
    %94 = vector.broadcast %17 : vector<1x40xf32> to vector<8x40xf32>
    %95 = arith.mulf %93, %94 : vector<8x40xf32>
    %96 = arith.addf %92, %95 : vector<8x40xf32>
    %97 = vector.broadcast %68 : vector<8x1xf32> to vector<8x40xf32>
    %98 = arith.subf %96, %97 : vector<8x40xf32>
    %cst_20 = arith.constant 0.000000e+00 : f32
    %99 = vector.broadcast %cst_20 : f32 to vector<1x40xf32>
    %100 = arith.cmpf oge, %16, %99 : vector<1x40xf32>
    %101 = vector.broadcast %16 : vector<1x40xf32> to vector<8x40xf32>
    %102 = arith.subf %98, %101 : vector<8x40xf32>
    %103 = math.absf %102 : vector<8x40xf32>
    %cst_21 = arith.constant 0.000000e+00 : f32
    %104 = vector.shape_cast %100 : vector<1x40xi1> to vector<1x40xi1>
    %105 = vector.broadcast %104 : vector<1x40xi1> to vector<8x40xi1>
    %106 = vector.broadcast %cst_21 : f32 to vector<8x40xf32>
    %107 = arith.select %105, %103, %106 : vector<8x40xi1>, vector<8x40xf32>
    %108 = vector.broadcast %18 : vector<1x40xf32> to vector<8x40xf32>
    %109 = arith.mulf %107, %108 : vector<8x40xf32>
    %cst_22 = arith.constant dense<0.000000e+00> : vector<8x4xf32>
    %110 = tpu.matmul %109, %3, %cst_22 {dimension_numbers = #tpu.dot_dimension_numbers<[1], [0], [0], [1], [0, 0, 1, 1], [], []>} : vector<8x40xf32>, vector<40x4xf32>, vector<8x4xf32> -> vector<8x4xf32>
    %cst_23 = arith.constant 3.000000e+00 : f32
    %111 = vector.broadcast %cst_23 : f32 to vector<8x4xf32>
    %112 = arith.mulf %111, %52 : vector<8x4xf32>
    %cst_24 = arith.constant 5.000000e+00 : f32
    %113 = vector.broadcast %cst_24 : f32 to vector<8x4xf32>
    %114 = arith.mulf %113, %110 : vector<8x4xf32>
    %115 = arith.addf %112, %114 : vector<8x4xf32>
    %cst_25 = arith.constant 2.000000e+00 : f32
    %116 = vector.broadcast %cst_25 : f32 to vector<8x4xf32>
    %117 = arith.mulf %116, %57 : vector<8x4xf32>
    %118 = arith.addf %115, %117 : vector<8x4xf32>
    %cst_26 = arith.constant 2.000000e+00 : f32
    %119 = vector.broadcast %cst_26 : f32 to vector<8x4xf32>
    %120 = arith.mulf %119, %62 : vector<8x4xf32>
    %121 = arith.addf %118, %120 : vector<8x4xf32>
    %122 = vector.broadcast %23 : vector<1x4xf32> to vector<8x4xf32>
    %123 = arith.mulf %121, %122 : vector<8x4xf32>
    %cst_27 = arith.constant 0.000000e+00 : f32
    %124 = vector.broadcast %cst_27 : f32 to vector<1x1680xf32>
    %c0_28 = arith.constant 0 : index
    %c0_29 = arith.constant 0 : index
    %c0_30 = arith.constant 0 : index
    %125 = vector.load %arg3[%c0_28, %c0_29, %c0_30] : memref<4x8x1680xf32, #tpu.memory_space<vmem>>, vector<1x8x1680xf32>
    %126 = vector.shape_cast %125 : vector<1x8x1680xf32> to vector<8x1680xf32>
    %127 = vector.extract_strided_slice %123 {offsets = [0, 0], sizes = [8, 1], strides = [1, 1]} : vector<8x4xf32> to vector<8x1xf32>
    %128 = vector.broadcast %127 : vector<8x1xf32> to vector<8x1680xf32>
    %129 = arith.mulf %126, %128 : vector<8x1680xf32>
    %cst_31 = arith.constant dense<0.000000e+00> : vector<1680xf32>
    %130 = vector.multi_reduction <add>, %129, %cst_31 [0] : vector<8x1680xf32> to vector<1680xf32>
    %131 = vector.shape_cast %130 : vector<1680xf32> to vector<1x1680xf32>
    %132 = arith.addf %124, %131 : vector<1x1680xf32>
    %c1 = arith.constant 1 : index
    %c0_32 = arith.constant 0 : index
    %c0_33 = arith.constant 0 : index
    %133 = vector.load %arg3[%c1, %c0_32, %c0_33] : memref<4x8x1680xf32, #tpu.memory_space<vmem>>, vector<1x8x1680xf32>
    %134 = vector.shape_cast %133 : vector<1x8x1680xf32> to vector<8x1680xf32>
    %135 = vector.extract_strided_slice %123 {offsets = [0, 1], sizes = [8, 1], strides = [1, 1]} : vector<8x4xf32> to vector<8x1xf32>
    %136 = vector.broadcast %135 : vector<8x1xf32> to vector<8x1680xf32>
    %137 = arith.mulf %134, %136 : vector<8x1680xf32>
    %cst_34 = arith.constant dense<0.000000e+00> : vector<1680xf32>
    %138 = vector.multi_reduction <add>, %137, %cst_34 [0] : vector<8x1680xf32> to vector<1680xf32>
    %139 = vector.shape_cast %138 : vector<1680xf32> to vector<1x1680xf32>
    %140 = arith.addf %132, %139 : vector<1x1680xf32>
    %c2 = arith.constant 2 : index
    %c0_35 = arith.constant 0 : index
    %c0_36 = arith.constant 0 : index
    %141 = vector.load %arg3[%c2, %c0_35, %c0_36] : memref<4x8x1680xf32, #tpu.memory_space<vmem>>, vector<1x8x1680xf32>
    %142 = vector.shape_cast %141 : vector<1x8x1680xf32> to vector<8x1680xf32>
    %143 = vector.extract_strided_slice %123 {offsets = [0, 2], sizes = [8, 1], strides = [1, 1]} : vector<8x4xf32> to vector<8x1xf32>
    %144 = vector.broadcast %143 : vector<8x1xf32> to vector<8x1680xf32>
    %145 = arith.mulf %142, %144 : vector<8x1680xf32>
    %cst_37 = arith.constant dense<0.000000e+00> : vector<1680xf32>
    %146 = vector.multi_reduction <add>, %145, %cst_37 [0] : vector<8x1680xf32> to vector<1680xf32>
    %147 = vector.shape_cast %146 : vector<1680xf32> to vector<1x1680xf32>
    %148 = arith.addf %140, %147 : vector<1x1680xf32>
    %c3 = arith.constant 3 : index
    %c0_38 = arith.constant 0 : index
    %c0_39 = arith.constant 0 : index
    %149 = vector.load %arg3[%c3, %c0_38, %c0_39] : memref<4x8x1680xf32, #tpu.memory_space<vmem>>, vector<1x8x1680xf32>
    %150 = vector.shape_cast %149 : vector<1x8x1680xf32> to vector<8x1680xf32>
    %151 = vector.extract_strided_slice %123 {offsets = [0, 3], sizes = [8, 1], strides = [1, 1]} : vector<8x4xf32> to vector<8x1xf32>
    %152 = vector.broadcast %151 : vector<8x1xf32> to vector<8x1680xf32>
    %153 = arith.mulf %150, %152 : vector<8x1680xf32>
    %cst_40 = arith.constant dense<0.000000e+00> : vector<1680xf32>
    %154 = vector.multi_reduction <add>, %153, %cst_40 [0] : vector<8x1680xf32> to vector<1680xf32>
    %155 = vector.shape_cast %154 : vector<1680xf32> to vector<1x1680xf32>
    %156 = arith.addf %148, %155 : vector<1x1680xf32>
    %cst_41 = arith.constant dense<0x7F800000> : vector<1xf32>
    %157 = vector.multi_reduction <minimumf>, %156, %cst_41 [1] : vector<1x1680xf32> to vector<1xf32>
    %158 = vector.shape_cast %157 : vector<1xf32> to vector<1x1xf32>
    %159 = vector.broadcast %158 : vector<1x1xf32> to vector<1x1680xf32>
    %160 = arith.cmpf ole, %156, %159 : vector<1x1680xf32>
    %cst_42 = arith.constant 1.680000e+03 : f32
    %161 = vector.broadcast %cst_42 : f32 to vector<1x1680xf32>
    %162 = arith.select %160, %9, %161 : vector<1x1680xi1>, vector<1x1680xf32>
    %cst_43 = arith.constant dense<0x7F800000> : vector<1xf32>
    %163 = vector.multi_reduction <minimumf>, %162, %cst_43 [1] : vector<1x1680xf32> to vector<1xf32>
    %164 = vector.shape_cast %163 : vector<1xf32> to vector<1x1xf32>
    %165 = vector.broadcast %164 : vector<1x1xf32> to vector<1x1680xf32>
    %166 = arith.cmpf oeq, %9, %165 : vector<1x1680xf32>
    %167 = arith.extui %166 : vector<1x1680xi1> to vector<1x1680xi32>
    %168 = arith.sitofp %167 : vector<1x1680xi32> to vector<1x1680xf32>
    %cst_44 = arith.constant 0.000000e+00 : f32
    %169 = vector.broadcast %cst_44 : f32 to vector<8x4xf32>
    %cst_45 = arith.constant 0.000000e+00 : f32
    %170 = vector.broadcast %cst_45 : f32 to vector<8x40xf32>
    %c0_46 = arith.constant 0 : index
    %c0_47 = arith.constant 0 : index
    %c0_48 = arith.constant 0 : index
    %171 = vector.load %arg3[%c0_46, %c0_47, %c0_48] : memref<4x8x1680xf32, #tpu.memory_space<vmem>>, vector<1x8x1680xf32>
    %172 = vector.shape_cast %171 : vector<1x8x1680xf32> to vector<8x1680xf32>
    %173 = vector.broadcast %168 : vector<1x1680xf32> to vector<8x1680xf32>
    %174 = arith.mulf %172, %173 : vector<8x1680xf32>
    %cst_49 = arith.constant dense<0.000000e+00> : vector<8xf32>
    %175 = vector.multi_reduction <add>, %174, %cst_49 [1] : vector<8x1680xf32> to vector<8xf32>
    %176 = vector.shape_cast %175 : vector<8xf32> to vector<8x1xf32>
    %177 = vector.extract_strided_slice %23 {offsets = [0, 0], sizes = [1, 1], strides = [1, 1]} : vector<1x4xf32> to vector<1x1xf32>
    %178 = vector.broadcast %177 : vector<1x1xf32> to vector<8x1xf32>
    %179 = arith.mulf %176, %178 : vector<8x1xf32>
    %c0_i32 = arith.constant 0 : i32
    %180 = vector.broadcast %c0_i32 : i32 to vector<8x4xi32>
    %181 = arith.cmpi eq, %6, %180 : vector<8x4xi32>
    %182 = arith.extui %181 : vector<8x4xi1> to vector<8x4xi32>
    %183 = arith.sitofp %182 : vector<8x4xi32> to vector<8x4xf32>
    %184 = vector.broadcast %179 : vector<8x1xf32> to vector<8x4xf32>
    %185 = arith.mulf %184, %183 : vector<8x4xf32>
    %186 = arith.addf %169, %185 : vector<8x4xf32>
    %c0_i32_50 = arith.constant 0 : i32
    %187 = vector.broadcast %c0_i32_50 : i32 to vector<8x40xi32>
    %188 = arith.cmpi sge, %7, %187 : vector<8x40xi32>
    %c10_i32 = arith.constant 10 : i32
    %189 = vector.broadcast %c10_i32 : i32 to vector<8x40xi32>
    %190 = arith.cmpi slt, %7, %189 : vector<8x40xi32>
    %191 = arith.andi %188, %190 : vector<8x40xi1>
    %192 = arith.extui %191 : vector<8x40xi1> to vector<8x40xi32>
    %193 = arith.sitofp %192 : vector<8x40xi32> to vector<8x40xf32>
    %194 = vector.broadcast %179 : vector<8x1xf32> to vector<8x40xf32>
    %195 = arith.mulf %194, %193 : vector<8x40xf32>
    %196 = arith.addf %170, %195 : vector<8x40xf32>
    %197 = arith.mulf %176, %5 : vector<8x1xf32>
    %cst_51 = arith.constant dense<0.000000e+00> : vector<8xf32>
    %198 = vector.multi_reduction <add>, %197, %cst_51 [1] : vector<8x1xf32> to vector<8xf32>
    %199 = vector.shape_cast %198 : vector<8xf32> to vector<8x1xf32>
    %cst_52 = arith.constant dense<0.000000e+00> : vector<1xf32>
    %200 = vector.multi_reduction <add>, %199, %cst_52 [0] : vector<8x1xf32> to vector<1xf32>
    %201 = vector.shape_cast %200 : vector<1xf32> to vector<1x1xf32>
    %c8_i32 = arith.constant 8 : i32
    %202 = vector.broadcast %c8_i32 : i32 to vector<1x128xi32>
    %203 = arith.cmpi eq, %0, %202 : vector<1x128xi32>
    %cst_53 = arith.constant 0.000000e+00 : f32
    %204 = vector.shape_cast %201 : vector<1x1xf32> to vector<1x1xf32>
    %205 = vector.broadcast %204 : vector<1x1xf32> to vector<1x128xf32>
    %206 = vector.broadcast %cst_53 : f32 to vector<1x128xf32>
    %207 = arith.select %203, %205, %206 : vector<1x128xi1>, vector<1x128xf32>
    %208 = arith.addf %2, %207 : vector<1x128xf32>
    %c1_54 = arith.constant 1 : index
    %c0_55 = arith.constant 0 : index
    %c0_56 = arith.constant 0 : index
    %209 = vector.load %arg3[%c1_54, %c0_55, %c0_56] : memref<4x8x1680xf32, #tpu.memory_space<vmem>>, vector<1x8x1680xf32>
    %210 = vector.shape_cast %209 : vector<1x8x1680xf32> to vector<8x1680xf32>
    %211 = vector.broadcast %168 : vector<1x1680xf32> to vector<8x1680xf32>
    %212 = arith.mulf %210, %211 : vector<8x1680xf32>
    %cst_57 = arith.constant dense<0.000000e+00> : vector<8xf32>
    %213 = vector.multi_reduction <add>, %212, %cst_57 [1] : vector<8x1680xf32> to vector<8xf32>
    %214 = vector.shape_cast %213 : vector<8xf32> to vector<8x1xf32>
    %215 = vector.extract_strided_slice %23 {offsets = [0, 1], sizes = [1, 1], strides = [1, 1]} : vector<1x4xf32> to vector<1x1xf32>
    %216 = vector.broadcast %215 : vector<1x1xf32> to vector<8x1xf32>
    %217 = arith.mulf %214, %216 : vector<8x1xf32>
    %c1_i32 = arith.constant 1 : i32
    %218 = vector.broadcast %c1_i32 : i32 to vector<8x4xi32>
    %219 = arith.cmpi eq, %6, %218 : vector<8x4xi32>
    %220 = arith.extui %219 : vector<8x4xi1> to vector<8x4xi32>
    %221 = arith.sitofp %220 : vector<8x4xi32> to vector<8x4xf32>
    %222 = vector.broadcast %217 : vector<8x1xf32> to vector<8x4xf32>
    %223 = arith.mulf %222, %221 : vector<8x4xf32>
    %224 = arith.addf %186, %223 : vector<8x4xf32>
    %c10_i32_58 = arith.constant 10 : i32
    %225 = vector.broadcast %c10_i32_58 : i32 to vector<8x40xi32>
    %226 = arith.cmpi sge, %7, %225 : vector<8x40xi32>
    %c20_i32 = arith.constant 20 : i32
    %227 = vector.broadcast %c20_i32 : i32 to vector<8x40xi32>
    %228 = arith.cmpi slt, %7, %227 : vector<8x40xi32>
    %229 = arith.andi %226, %228 : vector<8x40xi1>
    %230 = arith.extui %229 : vector<8x40xi1> to vector<8x40xi32>
    %231 = arith.sitofp %230 : vector<8x40xi32> to vector<8x40xf32>
    %232 = vector.broadcast %217 : vector<8x1xf32> to vector<8x40xf32>
    %233 = arith.mulf %232, %231 : vector<8x40xf32>
    %234 = arith.addf %196, %233 : vector<8x40xf32>
    %235 = arith.mulf %214, %5 : vector<8x1xf32>
    %cst_59 = arith.constant dense<0.000000e+00> : vector<8xf32>
    %236 = vector.multi_reduction <add>, %235, %cst_59 [1] : vector<8x1xf32> to vector<8xf32>
    %237 = vector.shape_cast %236 : vector<8xf32> to vector<8x1xf32>
    %cst_60 = arith.constant dense<0.000000e+00> : vector<1xf32>
    %238 = vector.multi_reduction <add>, %237, %cst_60 [0] : vector<8x1xf32> to vector<1xf32>
    %239 = vector.shape_cast %238 : vector<1xf32> to vector<1x1xf32>
    %c9_i32 = arith.constant 9 : i32
    %240 = vector.broadcast %c9_i32 : i32 to vector<1x128xi32>
    %241 = arith.cmpi eq, %0, %240 : vector<1x128xi32>
    %cst_61 = arith.constant 0.000000e+00 : f32
    %242 = vector.shape_cast %239 : vector<1x1xf32> to vector<1x1xf32>
    %243 = vector.broadcast %242 : vector<1x1xf32> to vector<1x128xf32>
    %244 = vector.broadcast %cst_61 : f32 to vector<1x128xf32>
    %245 = arith.select %241, %243, %244 : vector<1x128xi1>, vector<1x128xf32>
    %246 = arith.addf %208, %245 : vector<1x128xf32>
    %c2_62 = arith.constant 2 : index
    %c0_63 = arith.constant 0 : index
    %c0_64 = arith.constant 0 : index
    %247 = vector.load %arg3[%c2_62, %c0_63, %c0_64] : memref<4x8x1680xf32, #tpu.memory_space<vmem>>, vector<1x8x1680xf32>
    %248 = vector.shape_cast %247 : vector<1x8x1680xf32> to vector<8x1680xf32>
    %249 = vector.broadcast %168 : vector<1x1680xf32> to vector<8x1680xf32>
    %250 = arith.mulf %248, %249 : vector<8x1680xf32>
    %cst_65 = arith.constant dense<0.000000e+00> : vector<8xf32>
    %251 = vector.multi_reduction <add>, %250, %cst_65 [1] : vector<8x1680xf32> to vector<8xf32>
    %252 = vector.shape_cast %251 : vector<8xf32> to vector<8x1xf32>
    %253 = vector.extract_strided_slice %23 {offsets = [0, 2], sizes = [1, 1], strides = [1, 1]} : vector<1x4xf32> to vector<1x1xf32>
    %254 = vector.broadcast %253 : vector<1x1xf32> to vector<8x1xf32>
    %255 = arith.mulf %252, %254 : vector<8x1xf32>
    %c2_i32 = arith.constant 2 : i32
    %256 = vector.broadcast %c2_i32 : i32 to vector<8x4xi32>
    %257 = arith.cmpi eq, %6, %256 : vector<8x4xi32>
    %258 = arith.extui %257 : vector<8x4xi1> to vector<8x4xi32>
    %259 = arith.sitofp %258 : vector<8x4xi32> to vector<8x4xf32>
    %260 = vector.broadcast %255 : vector<8x1xf32> to vector<8x4xf32>
    %261 = arith.mulf %260, %259 : vector<8x4xf32>
    %262 = arith.addf %224, %261 : vector<8x4xf32>
    %c20_i32_66 = arith.constant 20 : i32
    %263 = vector.broadcast %c20_i32_66 : i32 to vector<8x40xi32>
    %264 = arith.cmpi sge, %7, %263 : vector<8x40xi32>
    %c30_i32 = arith.constant 30 : i32
    %265 = vector.broadcast %c30_i32 : i32 to vector<8x40xi32>
    %266 = arith.cmpi slt, %7, %265 : vector<8x40xi32>
    %267 = arith.andi %264, %266 : vector<8x40xi1>
    %268 = arith.extui %267 : vector<8x40xi1> to vector<8x40xi32>
    %269 = arith.sitofp %268 : vector<8x40xi32> to vector<8x40xf32>
    %270 = vector.broadcast %255 : vector<8x1xf32> to vector<8x40xf32>
    %271 = arith.mulf %270, %269 : vector<8x40xf32>
    %272 = arith.addf %234, %271 : vector<8x40xf32>
    %273 = arith.mulf %252, %5 : vector<8x1xf32>
    %cst_67 = arith.constant dense<0.000000e+00> : vector<8xf32>
    %274 = vector.multi_reduction <add>, %273, %cst_67 [1] : vector<8x1xf32> to vector<8xf32>
    %275 = vector.shape_cast %274 : vector<8xf32> to vector<8x1xf32>
    %cst_68 = arith.constant dense<0.000000e+00> : vector<1xf32>
    %276 = vector.multi_reduction <add>, %275, %cst_68 [0] : vector<8x1xf32> to vector<1xf32>
    %277 = vector.shape_cast %276 : vector<1xf32> to vector<1x1xf32>
    %c10_i32_69 = arith.constant 10 : i32
    %278 = vector.broadcast %c10_i32_69 : i32 to vector<1x128xi32>
    %279 = arith.cmpi eq, %0, %278 : vector<1x128xi32>
    %cst_70 = arith.constant 0.000000e+00 : f32
    %280 = vector.shape_cast %277 : vector<1x1xf32> to vector<1x1xf32>
    %281 = vector.broadcast %280 : vector<1x1xf32> to vector<1x128xf32>
    %282 = vector.broadcast %cst_70 : f32 to vector<1x128xf32>
    %283 = arith.select %279, %281, %282 : vector<1x128xi1>, vector<1x128xf32>
    %284 = arith.addf %246, %283 : vector<1x128xf32>
    %c3_71 = arith.constant 3 : index
    %c0_72 = arith.constant 0 : index
    %c0_73 = arith.constant 0 : index
    %285 = vector.load %arg3[%c3_71, %c0_72, %c0_73] : memref<4x8x1680xf32, #tpu.memory_space<vmem>>, vector<1x8x1680xf32>
    %286 = vector.shape_cast %285 : vector<1x8x1680xf32> to vector<8x1680xf32>
    %287 = vector.broadcast %168 : vector<1x1680xf32> to vector<8x1680xf32>
    %288 = arith.mulf %286, %287 : vector<8x1680xf32>
    %cst_74 = arith.constant dense<0.000000e+00> : vector<8xf32>
    %289 = vector.multi_reduction <add>, %288, %cst_74 [1] : vector<8x1680xf32> to vector<8xf32>
    %290 = vector.shape_cast %289 : vector<8xf32> to vector<8x1xf32>
    %291 = vector.extract_strided_slice %23 {offsets = [0, 3], sizes = [1, 1], strides = [1, 1]} : vector<1x4xf32> to vector<1x1xf32>
    %292 = vector.broadcast %291 : vector<1x1xf32> to vector<8x1xf32>
    %293 = arith.mulf %290, %292 : vector<8x1xf32>
    %c3_i32 = arith.constant 3 : i32
    %294 = vector.broadcast %c3_i32 : i32 to vector<8x4xi32>
    %295 = arith.cmpi eq, %6, %294 : vector<8x4xi32>
    %296 = arith.extui %295 : vector<8x4xi1> to vector<8x4xi32>
    %297 = arith.sitofp %296 : vector<8x4xi32> to vector<8x4xf32>
    %298 = vector.broadcast %293 : vector<8x1xf32> to vector<8x4xf32>
    %299 = arith.mulf %298, %297 : vector<8x4xf32>
    %300 = arith.addf %262, %299 : vector<8x4xf32>
    %c30_i32_75 = arith.constant 30 : i32
    %301 = vector.broadcast %c30_i32_75 : i32 to vector<8x40xi32>
    %302 = arith.cmpi sge, %7, %301 : vector<8x40xi32>
    %c40_i32 = arith.constant 40 : i32
    %303 = vector.broadcast %c40_i32 : i32 to vector<8x40xi32>
    %304 = arith.cmpi slt, %7, %303 : vector<8x40xi32>
    %305 = arith.andi %302, %304 : vector<8x40xi1>
    %306 = arith.extui %305 : vector<8x40xi1> to vector<8x40xi32>
    %307 = arith.sitofp %306 : vector<8x40xi32> to vector<8x40xf32>
    %308 = vector.broadcast %293 : vector<8x1xf32> to vector<8x40xf32>
    %309 = arith.mulf %308, %307 : vector<8x40xf32>
    %310 = arith.addf %272, %309 : vector<8x40xf32>
    %311 = arith.mulf %290, %5 : vector<8x1xf32>
    %cst_76 = arith.constant dense<0.000000e+00> : vector<8xf32>
    %312 = vector.multi_reduction <add>, %311, %cst_76 [1] : vector<8x1xf32> to vector<8xf32>
    %313 = vector.shape_cast %312 : vector<8xf32> to vector<8x1xf32>
    %cst_77 = arith.constant dense<0.000000e+00> : vector<1xf32>
    %314 = vector.multi_reduction <add>, %313, %cst_77 [0] : vector<8x1xf32> to vector<1xf32>
    %315 = vector.shape_cast %314 : vector<1xf32> to vector<1x1xf32>
    %c11_i32 = arith.constant 11 : i32
    %316 = vector.broadcast %c11_i32 : i32 to vector<1x128xi32>
    %317 = arith.cmpi eq, %0, %316 : vector<1x128xi32>
    %cst_78 = arith.constant 0.000000e+00 : f32
    %318 = vector.shape_cast %315 : vector<1x1xf32> to vector<1x1xf32>
    %319 = vector.broadcast %318 : vector<1x1xf32> to vector<1x128xf32>
    %320 = vector.broadcast %cst_78 : f32 to vector<1x128xf32>
    %321 = arith.select %317, %319, %320 : vector<1x128xi1>, vector<1x128xf32>
    %322 = arith.addf %284, %321 : vector<1x128xf32>
    %cst_79 = arith.constant dense<0.000000e+00> : vector<8xf32>
    %323 = vector.multi_reduction <add>, %300, %cst_79 [1] : vector<8x4xf32> to vector<8xf32>
    %324 = vector.shape_cast %323 : vector<8xf32> to vector<8x1xf32>
    %325 = vector.broadcast %20 : vector<1x4xf32> to vector<8x4xf32>
    %326 = arith.mulf %300, %325 : vector<8x4xf32>
    %cst_80 = arith.constant dense<0.000000e+00> : vector<8xf32>
    %327 = vector.multi_reduction <add>, %326, %cst_80 [1] : vector<8x4xf32> to vector<8xf32>
    %328 = vector.shape_cast %327 : vector<8xf32> to vector<8x1xf32>
    %cst_81 = arith.constant 1.000000e+00 : f32
    %329 = vector.broadcast %cst_81 : f32 to vector<8x1xf32>
    %330 = arith.subf %329, %324 : vector<8x1xf32>
    %cst_82 = arith.constant 1.000000e+00 : f32
    %331 = vector.broadcast %cst_82 : f32 to vector<8x1xf32>
    %332 = arith.mulf %330, %331 : vector<8x1xf32>
    %333 = arith.addf %328, %332 : vector<8x1xf32>
    %cst_83 = arith.constant 0.000000e+00 : f32
    %334 = vector.broadcast %cst_83 : f32 to vector<8x1xf32>
    %335 = arith.cmpf oeq, %333, %334 : vector<8x1xf32>
    %336 = arith.select %335, %40, %41 : vector<8x1xi1>, vector<8x1xf32>
    %cst_84 = arith.constant 0.000000e+00 : f32
    %337 = vector.broadcast %cst_84 : f32 to vector<8x1xf32>
    %338 = arith.subf %337, %336 : vector<8x1xf32>
    %cst_85 = arith.constant dense<0.000000e+00> : vector<8xf32>
    %339 = vector.multi_reduction <add>, %338, %cst_85 [1] : vector<8x1xf32> to vector<8xf32>
    %340 = vector.shape_cast %339 : vector<8xf32> to vector<8x1xf32>
    %cst_86 = arith.constant dense<0.000000e+00> : vector<1xf32>
    %341 = vector.multi_reduction <add>, %340, %cst_86 [0] : vector<8x1xf32> to vector<1xf32>
    %342 = vector.shape_cast %341 : vector<1xf32> to vector<1x1xf32>
    %343 = arith.addf %1, %342 : vector<1x1xf32>
    %344 = arith.mulf %300, %57 : vector<8x4xf32>
    %cst_87 = arith.constant dense<0.000000e+00> : vector<8xf32>
    %345 = vector.multi_reduction <add>, %344, %cst_87 [1] : vector<8x4xf32> to vector<8xf32>
    %346 = vector.shape_cast %345 : vector<8xf32> to vector<8x1xf32>
    %cst_88 = arith.constant dense<0.000000e+00> : vector<1xf32>
    %347 = vector.multi_reduction <add>, %346, %cst_88 [0] : vector<8x1xf32> to vector<1xf32>
    %348 = vector.shape_cast %347 : vector<1xf32> to vector<1x1xf32>
    %349 = arith.addf %1, %348 : vector<1x1xf32>
    %350 = arith.mulf %300, %62 : vector<8x4xf32>
    %cst_89 = arith.constant dense<0.000000e+00> : vector<8xf32>
    %351 = vector.multi_reduction <add>, %350, %cst_89 [1] : vector<8x4xf32> to vector<8xf32>
    %352 = vector.shape_cast %351 : vector<8xf32> to vector<8x1xf32>
    %cst_90 = arith.constant dense<0.000000e+00> : vector<1xf32>
    %353 = vector.multi_reduction <add>, %352, %cst_90 [0] : vector<8x1xf32> to vector<1xf32>
    %354 = vector.shape_cast %353 : vector<1xf32> to vector<1x1xf32>
    %355 = arith.addf %1, %354 : vector<1x1xf32>
    %356 = arith.mulf %310, %109 : vector<8x40xf32>
    %cst_91 = arith.constant dense<0.000000e+00> : vector<8xf32>
    %357 = vector.multi_reduction <add>, %356, %cst_91 [1] : vector<8x40xf32> to vector<8xf32>
    %358 = vector.shape_cast %357 : vector<8xf32> to vector<8x1xf32>
    %cst_92 = arith.constant dense<0.000000e+00> : vector<1xf32>
    %359 = vector.multi_reduction <add>, %358, %cst_92 [0] : vector<8x1xf32> to vector<1xf32>
    %360 = vector.shape_cast %359 : vector<1xf32> to vector<1x1xf32>
    %361 = arith.addf %1, %360 : vector<1x1xf32>
    %362 = vector.extract_strided_slice %11 {offsets = [0, 0], sizes = [8, 1], strides = [1, 1]} : vector<8x2xf32> to vector<8x1xf32>
    %363 = vector.extract_strided_slice %11 {offsets = [0, 1], sizes = [8, 1], strides = [1, 1]} : vector<8x2xf32> to vector<8x1xf32>
    %364 = arith.cmpf oge, %362, %363 : vector<8x1xf32>
    %365 = arith.extui %364 : vector<8x1xi1> to vector<8x1xi32>
    %366 = arith.sitofp %365 : vector<8x1xi32> to vector<8x1xf32>
    %cst_93 = arith.constant dense<0.000000e+00> : vector<8xf32>
    %367 = vector.multi_reduction <add>, %366, %cst_93 [1] : vector<8x1xf32> to vector<8xf32>
    %368 = vector.shape_cast %367 : vector<8xf32> to vector<8x1xf32>
    %cst_94 = arith.constant dense<0.000000e+00> : vector<1xf32>
    %369 = vector.multi_reduction <add>, %368, %cst_94 [0] : vector<8x1xf32> to vector<1xf32>
    %370 = vector.shape_cast %369 : vector<1xf32> to vector<1x1xf32>
    %cst_95 = arith.constant dense<0.000000e+00> : vector<1xf32>
    %371 = vector.multi_reduction <add>, %23, %cst_95 [1] : vector<1x4xf32> to vector<1xf32>
    %372 = vector.shape_cast %371 : vector<1xf32> to vector<1x1xf32>
    %cst_96 = arith.constant dense<0.000000e+00> : vector<1xf32>
    %373 = vector.multi_reduction <add>, %372, %cst_96 [0] : vector<1x1xf32> to vector<1xf32>
    %374 = vector.shape_cast %373 : vector<1xf32> to vector<1x1xf32>
    %375 = arith.subf %370, %374 : vector<1x1xf32>
    %376 = math.absf %375 : vector<1x1xf32>
    %377 = arith.addf %1, %376 : vector<1x1xf32>
    %378 = arith.addf %1, %374 : vector<1x1xf32>
    %c1_97 = arith.constant 1 : index
    %c0_98 = arith.constant 0 : index
    %c0_99 = arith.constant 0 : index
    %379 = vector.load %arg0[%c1_97, %c0_98, %c0_99] : memref<2x8x2xf32, #tpu.memory_space<vmem>>, vector<1x8x2xf32>
    %380 = vector.shape_cast %379 : vector<1x8x2xf32> to vector<8x2xf32>
    %c1_100 = arith.constant 1 : index
    %c0_101 = arith.constant 0 : index
    %c0_102 = arith.constant 0 : index
    %381 = vector.load %arg1[%c1_100, %c0_101, %c0_102] : memref<2x8x8xf32, #tpu.memory_space<vmem>>, vector<1x8x8xf32>
    %382 = vector.shape_cast %381 : vector<1x8x8xf32> to vector<8x8xf32>
    %c1_103 = arith.constant 1 : index
    %c0_104 = arith.constant 0 : index
    %c0_105 = arith.constant 0 : index
    %383 = vector.load %arg2[%c1_103, %c0_104, %c0_105] : memref<2x4x40xf32, #tpu.memory_space<vmem>>, vector<1x4x40xf32>
    %384 = vector.shape_cast %383 : vector<1x4x40xf32> to vector<4x40xf32>
    %385 = vector.extract_strided_slice %384 {offsets = [0, 0], sizes = [1, 40], strides = [1, 1]} : vector<4x40xf32> to vector<1x40xf32>
    %386 = vector.extract_strided_slice %384 {offsets = [1, 0], sizes = [1, 40], strides = [1, 1]} : vector<4x40xf32> to vector<1x40xf32>
    %387 = vector.extract_strided_slice %384 {offsets = [2, 0], sizes = [1, 40], strides = [1, 1]} : vector<4x40xf32> to vector<1x40xf32>
    %388 = vector.extract_strided_slice %384 {offsets = [3, 0], sizes = [1, 40], strides = [1, 1]} : vector<4x40xf32> to vector<1x40xf32>
    %389 = vector.extract_strided_slice %388 {offsets = [0, 0], sizes = [1, 4], strides = [1, 1]} : vector<1x40xf32> to vector<1x4xf32>
    %390 = vector.extract_strided_slice %388 {offsets = [0, 4], sizes = [1, 4], strides = [1, 1]} : vector<1x40xf32> to vector<1x4xf32>
    %391 = vector.extract_strided_slice %388 {offsets = [0, 8], sizes = [1, 4], strides = [1, 1]} : vector<1x40xf32> to vector<1x4xf32>
    %392 = vector.extract_strided_slice %388 {offsets = [0, 12], sizes = [1, 4], strides = [1, 1]} : vector<1x40xf32> to vector<1x4xf32>
    %cst_106 = arith.constant dense<0xFF800000> : vector<8xf32>
    %393 = vector.multi_reduction <maximumf>, %380, %cst_106 [1] : vector<8x2xf32> to vector<8xf32>
    %394 = vector.shape_cast %393 : vector<8xf32> to vector<8x1xf32>
    %395 = vector.broadcast %394 : vector<8x1xf32> to vector<8x2xf32>
    %396 = arith.subf %380, %395 : vector<8x2xf32>
    %397 = math.exp %396 : vector<8x2xf32>
    %cst_107 = arith.constant dense<0.000000e+00> : vector<8xf32>
    %398 = vector.multi_reduction <add>, %397, %cst_107 [1] : vector<8x2xf32> to vector<8xf32>
    %399 = vector.shape_cast %398 : vector<8xf32> to vector<8x1xf32>
    %400 = vector.broadcast %399 : vector<8x1xf32> to vector<8x2xf32>
    %401 = arith.divf %397, %400 : vector<8x2xf32>
    %402 = vector.broadcast %394 : vector<8x1xf32> to vector<8x2xf32>
    %403 = arith.subf %380, %402 : vector<8x2xf32>
    %404 = math.log %399 : vector<8x1xf32>
    %405 = vector.broadcast %404 : vector<8x1xf32> to vector<8x2xf32>
    %406 = arith.subf %403, %405 : vector<8x2xf32>
    %407 = vector.extract_strided_slice %401 {offsets = [0, 0], sizes = [8, 1], strides = [1, 1]} : vector<8x2xf32> to vector<8x1xf32>
    %408 = vector.extract_strided_slice %401 {offsets = [0, 1], sizes = [8, 1], strides = [1, 1]} : vector<8x2xf32> to vector<8x1xf32>
    %409 = vector.extract_strided_slice %406 {offsets = [0, 0], sizes = [8, 1], strides = [1, 1]} : vector<8x2xf32> to vector<8x1xf32>
    %410 = vector.extract_strided_slice %406 {offsets = [0, 1], sizes = [8, 1], strides = [1, 1]} : vector<8x2xf32> to vector<8x1xf32>
    %cst_108 = arith.constant 0.000000e+00 : f32
    %411 = vector.broadcast %cst_108 : f32 to vector<1x4xf32>
    %412 = arith.cmpf oeq, %389, %411 : vector<1x4xf32>
    %413 = vector.shape_cast %412 : vector<1x4xi1> to vector<1x4xi1>
    %414 = vector.broadcast %413 : vector<1x4xi1> to vector<8x4xi1>
    %415 = vector.shape_cast %407 : vector<8x1xf32> to vector<8x1xf32>
    %416 = vector.broadcast %415 : vector<8x1xf32> to vector<8x4xf32>
    %417 = vector.shape_cast %408 : vector<8x1xf32> to vector<8x1xf32>
    %418 = vector.broadcast %417 : vector<8x1xf32> to vector<8x4xf32>
    %419 = arith.select %414, %416, %418 : vector<8x4xi1>, vector<8x4xf32>
    %cst_109 = arith.constant 0.000000e+00 : f32
    %420 = vector.broadcast %cst_109 : f32 to vector<8x4xf32>
    %421 = arith.subf %420, %419 : vector<8x4xf32>
    %422 = vector.extract_strided_slice %382 {offsets = [0, 0], sizes = [8, 1], strides = [1, 1]} : vector<8x8xf32> to vector<8x1xf32>
    %423 = vector.broadcast %422 : vector<8x1xf32> to vector<8x4xf32>
    %424 = vector.broadcast %390 : vector<1x4xf32> to vector<8x4xf32>
    %425 = arith.subf %423, %424 : vector<8x4xf32>
    %426 = math.absf %425 : vector<8x4xf32>
    %427 = vector.extract_strided_slice %382 {offsets = [0, 1], sizes = [8, 1], strides = [1, 1]} : vector<8x8xf32> to vector<8x1xf32>
    %428 = vector.broadcast %427 : vector<8x1xf32> to vector<8x4xf32>
    %429 = vector.broadcast %391 : vector<1x4xf32> to vector<8x4xf32>
    %430 = arith.subf %428, %429 : vector<8x4xf32>
    %431 = math.absf %430 : vector<8x4xf32>
    %432 = vector.extract_strided_slice %382 {offsets = [0, 2], sizes = [8, 1], strides = [1, 1]} : vector<8x8xf32> to vector<8x1xf32>
    %433 = vector.extract_strided_slice %382 {offsets = [0, 3], sizes = [8, 1], strides = [1, 1]} : vector<8x8xf32> to vector<8x1xf32>
    %434 = vector.extract_strided_slice %382 {offsets = [0, 4], sizes = [8, 1], strides = [1, 1]} : vector<8x8xf32> to vector<8x1xf32>
    %435 = vector.extract_strided_slice %382 {offsets = [0, 5], sizes = [8, 1], strides = [1, 1]} : vector<8x8xf32> to vector<8x1xf32>
    %436 = vector.extract_strided_slice %382 {offsets = [0, 6], sizes = [8, 1], strides = [1, 1]} : vector<8x8xf32> to vector<8x1xf32>
    %437 = vector.extract_strided_slice %382 {offsets = [0, 7], sizes = [8, 1], strides = [1, 1]} : vector<8x8xf32> to vector<8x1xf32>
    %438 = vector.broadcast %386 : vector<1x40xf32> to vector<8x40xf32>
    %439 = vector.broadcast %433 : vector<8x1xf32> to vector<8x40xf32>
    %440 = arith.subf %438, %439 : vector<8x40xf32>
    %441 = math.absf %440 : vector<8x40xf32>
    %cst_110 = arith.constant 9.99999974E-6 : f32
    %442 = vector.broadcast %cst_110 : f32 to vector<8x40xf32>
    %443 = arith.cmpf olt, %441, %442 : vector<8x40xf32>
    %cst_111 = arith.constant 0.000000e+00 : f32
    %444 = vector.broadcast %cst_111 : f32 to vector<8x40xf32>
    %445 = arith.cmpf oge, %440, %444 : vector<8x40xf32>
    %cst_112 = arith.constant 9.99999974E-6 : f32
    %cst_113 = arith.constant -9.99999974E-6 : f32
    %446 = vector.broadcast %cst_112 : f32 to vector<8x40xf32>
    %447 = vector.broadcast %cst_113 : f32 to vector<8x40xf32>
    %448 = arith.select %445, %446, %447 : vector<8x40xi1>, vector<8x40xf32>
    %449 = arith.select %443, %448, %440 : vector<8x40xi1>, vector<8x40xf32>
    %450 = tpu.reciprocal %449 {approx = true} : vector<8x40xf32> -> vector<8x40xf32>
    %451 = arith.mulf %449, %450 : vector<8x40xf32>
    %cst_114 = arith.constant 2.000000e+00 : f32
    %452 = vector.broadcast %cst_114 : f32 to vector<8x40xf32>
    %453 = arith.subf %452, %451 : vector<8x40xf32>
    %454 = arith.mulf %450, %453 : vector<8x40xf32>
    %455 = vector.broadcast %432 : vector<8x1xf32> to vector<8x40xf32>
    %456 = arith.mulf %455, %454 : vector<8x40xf32>
    %457 = vector.broadcast %434 : vector<8x1xf32> to vector<8x40xf32>
    %458 = arith.addf %456, %457 : vector<8x40xf32>
    %459 = arith.mulf %458, %454 : vector<8x40xf32>
    %460 = vector.broadcast %435 : vector<8x1xf32> to vector<8x40xf32>
    %461 = arith.addf %459, %460 : vector<8x40xf32>
    %462 = vector.broadcast %436 : vector<8x1xf32> to vector<8x40xf32>
    %463 = vector.broadcast %386 : vector<1x40xf32> to vector<8x40xf32>
    %464 = arith.mulf %462, %463 : vector<8x40xf32>
    %465 = arith.addf %461, %464 : vector<8x40xf32>
    %466 = vector.broadcast %437 : vector<8x1xf32> to vector<8x40xf32>
    %467 = arith.subf %465, %466 : vector<8x40xf32>
    %cst_115 = arith.constant 0.000000e+00 : f32
    %468 = vector.broadcast %cst_115 : f32 to vector<1x40xf32>
    %469 = arith.cmpf oge, %385, %468 : vector<1x40xf32>
    %470 = vector.broadcast %385 : vector<1x40xf32> to vector<8x40xf32>
    %471 = arith.subf %467, %470 : vector<8x40xf32>
    %472 = math.absf %471 : vector<8x40xf32>
    %cst_116 = arith.constant 0.000000e+00 : f32
    %473 = vector.shape_cast %469 : vector<1x40xi1> to vector<1x40xi1>
    %474 = vector.broadcast %473 : vector<1x40xi1> to vector<8x40xi1>
    %475 = vector.broadcast %cst_116 : f32 to vector<8x40xf32>
    %476 = arith.select %474, %472, %475 : vector<8x40xi1>, vector<8x40xf32>
    %477 = vector.broadcast %387 : vector<1x40xf32> to vector<8x40xf32>
    %478 = arith.mulf %476, %477 : vector<8x40xf32>
    %cst_117 = arith.constant dense<0.000000e+00> : vector<8x4xf32>
    %479 = tpu.matmul %478, %3, %cst_117 {dimension_numbers = #tpu.dot_dimension_numbers<[1], [0], [0], [1], [0, 0, 1, 1], [], []>} : vector<8x40xf32>, vector<40x4xf32>, vector<8x4xf32> -> vector<8x4xf32>
    %cst_118 = arith.constant 3.000000e+00 : f32
    %480 = vector.broadcast %cst_118 : f32 to vector<8x4xf32>
    %481 = arith.mulf %480, %421 : vector<8x4xf32>
    %cst_119 = arith.constant 5.000000e+00 : f32
    %482 = vector.broadcast %cst_119 : f32 to vector<8x4xf32>
    %483 = arith.mulf %482, %479 : vector<8x4xf32>
    %484 = arith.addf %481, %483 : vector<8x4xf32>
    %cst_120 = arith.constant 2.000000e+00 : f32
    %485 = vector.broadcast %cst_120 : f32 to vector<8x4xf32>
    %486 = arith.mulf %485, %426 : vector<8x4xf32>
    %487 = arith.addf %484, %486 : vector<8x4xf32>
    %cst_121 = arith.constant 2.000000e+00 : f32
    %488 = vector.broadcast %cst_121 : f32 to vector<8x4xf32>
    %489 = arith.mulf %488, %431 : vector<8x4xf32>
    %490 = arith.addf %487, %489 : vector<8x4xf32>
    %491 = vector.broadcast %392 : vector<1x4xf32> to vector<8x4xf32>
    %492 = arith.mulf %490, %491 : vector<8x4xf32>
    %cst_122 = arith.constant 0.000000e+00 : f32
    %493 = vector.broadcast %cst_122 : f32 to vector<1x1680xf32>
    %c0_123 = arith.constant 0 : index
    %c0_124 = arith.constant 0 : index
    %c0_125 = arith.constant 0 : index
    %494 = vector.load %arg3[%c0_123, %c0_124, %c0_125] : memref<4x8x1680xf32, #tpu.memory_space<vmem>>, vector<1x8x1680xf32>
    %495 = vector.shape_cast %494 : vector<1x8x1680xf32> to vector<8x1680xf32>
    %496 = vector.extract_strided_slice %492 {offsets = [0, 0], sizes = [8, 1], strides = [1, 1]} : vector<8x4xf32> to vector<8x1xf32>
    %497 = vector.broadcast %496 : vector<8x1xf32> to vector<8x1680xf32>
    %498 = arith.mulf %495, %497 : vector<8x1680xf32>
    %cst_126 = arith.constant dense<0.000000e+00> : vector<1680xf32>
    %499 = vector.multi_reduction <add>, %498, %cst_126 [0] : vector<8x1680xf32> to vector<1680xf32>
    %500 = vector.shape_cast %499 : vector<1680xf32> to vector<1x1680xf32>
    %501 = arith.addf %493, %500 : vector<1x1680xf32>
    %c1_127 = arith.constant 1 : index
    %c0_128 = arith.constant 0 : index
    %c0_129 = arith.constant 0 : index
    %502 = vector.load %arg3[%c1_127, %c0_128, %c0_129] : memref<4x8x1680xf32, #tpu.memory_space<vmem>>, vector<1x8x1680xf32>
    %503 = vector.shape_cast %502 : vector<1x8x1680xf32> to vector<8x1680xf32>
    %504 = vector.extract_strided_slice %492 {offsets = [0, 1], sizes = [8, 1], strides = [1, 1]} : vector<8x4xf32> to vector<8x1xf32>
    %505 = vector.broadcast %504 : vector<8x1xf32> to vector<8x1680xf32>
    %506 = arith.mulf %503, %505 : vector<8x1680xf32>
    %cst_130 = arith.constant dense<0.000000e+00> : vector<1680xf32>
    %507 = vector.multi_reduction <add>, %506, %cst_130 [0] : vector<8x1680xf32> to vector<1680xf32>
    %508 = vector.shape_cast %507 : vector<1680xf32> to vector<1x1680xf32>
    %509 = arith.addf %501, %508 : vector<1x1680xf32>
    %c2_131 = arith.constant 2 : index
    %c0_132 = arith.constant 0 : index
    %c0_133 = arith.constant 0 : index
    %510 = vector.load %arg3[%c2_131, %c0_132, %c0_133] : memref<4x8x1680xf32, #tpu.memory_space<vmem>>, vector<1x8x1680xf32>
    %511 = vector.shape_cast %510 : vector<1x8x1680xf32> to vector<8x1680xf32>
    %512 = vector.extract_strided_slice %492 {offsets = [0, 2], sizes = [8, 1], strides = [1, 1]} : vector<8x4xf32> to vector<8x1xf32>
    %513 = vector.broadcast %512 : vector<8x1xf32> to vector<8x1680xf32>
    %514 = arith.mulf %511, %513 : vector<8x1680xf32>
    %cst_134 = arith.constant dense<0.000000e+00> : vector<1680xf32>
    %515 = vector.multi_reduction <add>, %514, %cst_134 [0] : vector<8x1680xf32> to vector<1680xf32>
    %516 = vector.shape_cast %515 : vector<1680xf32> to vector<1x1680xf32>
    %517 = arith.addf %509, %516 : vector<1x1680xf32>
    %c3_135 = arith.constant 3 : index
    %c0_136 = arith.constant 0 : index
    %c0_137 = arith.constant 0 : index
    %518 = vector.load %arg3[%c3_135, %c0_136, %c0_137] : memref<4x8x1680xf32, #tpu.memory_space<vmem>>, vector<1x8x1680xf32>
    %519 = vector.shape_cast %518 : vector<1x8x1680xf32> to vector<8x1680xf32>
    %520 = vector.extract_strided_slice %492 {offsets = [0, 3], sizes = [8, 1], strides = [1, 1]} : vector<8x4xf32> to vector<8x1xf32>
    %521 = vector.broadcast %520 : vector<8x1xf32> to vector<8x1680xf32>
    %522 = arith.mulf %519, %521 : vector<8x1680xf32>
    %cst_138 = arith.constant dense<0.000000e+00> : vector<1680xf32>
    %523 = vector.multi_reduction <add>, %522, %cst_138 [0] : vector<8x1680xf32> to vector<1680xf32>
    %524 = vector.shape_cast %523 : vector<1680xf32> to vector<1x1680xf32>
    %525 = arith.addf %517, %524 : vector<1x1680xf32>
    %cst_139 = arith.constant dense<0x7F800000> : vector<1xf32>
    %526 = vector.multi_reduction <minimumf>, %525, %cst_139 [1] : vector<1x1680xf32> to vector<1xf32>
    %527 = vector.shape_cast %526 : vector<1xf32> to vector<1x1xf32>
    %528 = vector.broadcast %527 : vector<1x1xf32> to vector<1x1680xf32>
    %529 = arith.cmpf ole, %525, %528 : vector<1x1680xf32>
    %cst_140 = arith.constant 1.680000e+03 : f32
    %530 = vector.broadcast %cst_140 : f32 to vector<1x1680xf32>
    %531 = arith.select %529, %9, %530 : vector<1x1680xi1>, vector<1x1680xf32>
    %cst_141 = arith.constant dense<0x7F800000> : vector<1xf32>
    %532 = vector.multi_reduction <minimumf>, %531, %cst_141 [1] : vector<1x1680xf32> to vector<1xf32>
    %533 = vector.shape_cast %532 : vector<1xf32> to vector<1x1xf32>
    %534 = vector.broadcast %533 : vector<1x1xf32> to vector<1x1680xf32>
    %535 = arith.cmpf oeq, %9, %534 : vector<1x1680xf32>
    %536 = arith.extui %535 : vector<1x1680xi1> to vector<1x1680xi32>
    %537 = arith.sitofp %536 : vector<1x1680xi32> to vector<1x1680xf32>
    %cst_142 = arith.constant 0.000000e+00 : f32
    %538 = vector.broadcast %cst_142 : f32 to vector<8x4xf32>
    %cst_143 = arith.constant 0.000000e+00 : f32
    %539 = vector.broadcast %cst_143 : f32 to vector<8x40xf32>
    %c0_144 = arith.constant 0 : index
    %c0_145 = arith.constant 0 : index
    %c0_146 = arith.constant 0 : index
    %540 = vector.load %arg3[%c0_144, %c0_145, %c0_146] : memref<4x8x1680xf32, #tpu.memory_space<vmem>>, vector<1x8x1680xf32>
    %541 = vector.shape_cast %540 : vector<1x8x1680xf32> to vector<8x1680xf32>
    %542 = vector.broadcast %537 : vector<1x1680xf32> to vector<8x1680xf32>
    %543 = arith.mulf %541, %542 : vector<8x1680xf32>
    %cst_147 = arith.constant dense<0.000000e+00> : vector<8xf32>
    %544 = vector.multi_reduction <add>, %543, %cst_147 [1] : vector<8x1680xf32> to vector<8xf32>
    %545 = vector.shape_cast %544 : vector<8xf32> to vector<8x1xf32>
    %546 = vector.extract_strided_slice %392 {offsets = [0, 0], sizes = [1, 1], strides = [1, 1]} : vector<1x4xf32> to vector<1x1xf32>
    %547 = vector.broadcast %546 : vector<1x1xf32> to vector<8x1xf32>
    %548 = arith.mulf %545, %547 : vector<8x1xf32>
    %c0_i32_148 = arith.constant 0 : i32
    %549 = vector.broadcast %c0_i32_148 : i32 to vector<8x4xi32>
    %550 = arith.cmpi eq, %6, %549 : vector<8x4xi32>
    %551 = arith.extui %550 : vector<8x4xi1> to vector<8x4xi32>
    %552 = arith.sitofp %551 : vector<8x4xi32> to vector<8x4xf32>
    %553 = vector.broadcast %548 : vector<8x1xf32> to vector<8x4xf32>
    %554 = arith.mulf %553, %552 : vector<8x4xf32>
    %555 = arith.addf %538, %554 : vector<8x4xf32>
    %c0_i32_149 = arith.constant 0 : i32
    %556 = vector.broadcast %c0_i32_149 : i32 to vector<8x40xi32>
    %557 = arith.cmpi sge, %7, %556 : vector<8x40xi32>
    %c10_i32_150 = arith.constant 10 : i32
    %558 = vector.broadcast %c10_i32_150 : i32 to vector<8x40xi32>
    %559 = arith.cmpi slt, %7, %558 : vector<8x40xi32>
    %560 = arith.andi %557, %559 : vector<8x40xi1>
    %561 = arith.extui %560 : vector<8x40xi1> to vector<8x40xi32>
    %562 = arith.sitofp %561 : vector<8x40xi32> to vector<8x40xf32>
    %563 = vector.broadcast %548 : vector<8x1xf32> to vector<8x40xf32>
    %564 = arith.mulf %563, %562 : vector<8x40xf32>
    %565 = arith.addf %539, %564 : vector<8x40xf32>
    %566 = arith.mulf %545, %5 : vector<8x1xf32>
    %cst_151 = arith.constant dense<0.000000e+00> : vector<8xf32>
    %567 = vector.multi_reduction <add>, %566, %cst_151 [1] : vector<8x1xf32> to vector<8xf32>
    %568 = vector.shape_cast %567 : vector<8xf32> to vector<8x1xf32>
    %cst_152 = arith.constant dense<0.000000e+00> : vector<1xf32>
    %569 = vector.multi_reduction <add>, %568, %cst_152 [0] : vector<8x1xf32> to vector<1xf32>
    %570 = vector.shape_cast %569 : vector<1xf32> to vector<1x1xf32>
    %c12_i32 = arith.constant 12 : i32
    %571 = vector.broadcast %c12_i32 : i32 to vector<1x128xi32>
    %572 = arith.cmpi eq, %0, %571 : vector<1x128xi32>
    %cst_153 = arith.constant 0.000000e+00 : f32
    %573 = vector.shape_cast %570 : vector<1x1xf32> to vector<1x1xf32>
    %574 = vector.broadcast %573 : vector<1x1xf32> to vector<1x128xf32>
    %575 = vector.broadcast %cst_153 : f32 to vector<1x128xf32>
    %576 = arith.select %572, %574, %575 : vector<1x128xi1>, vector<1x128xf32>
    %577 = arith.addf %322, %576 : vector<1x128xf32>
    %c1_154 = arith.constant 1 : index
    %c0_155 = arith.constant 0 : index
    %c0_156 = arith.constant 0 : index
    %578 = vector.load %arg3[%c1_154, %c0_155, %c0_156] : memref<4x8x1680xf32, #tpu.memory_space<vmem>>, vector<1x8x1680xf32>
    %579 = vector.shape_cast %578 : vector<1x8x1680xf32> to vector<8x1680xf32>
    %580 = vector.broadcast %537 : vector<1x1680xf32> to vector<8x1680xf32>
    %581 = arith.mulf %579, %580 : vector<8x1680xf32>
    %cst_157 = arith.constant dense<0.000000e+00> : vector<8xf32>
    %582 = vector.multi_reduction <add>, %581, %cst_157 [1] : vector<8x1680xf32> to vector<8xf32>
    %583 = vector.shape_cast %582 : vector<8xf32> to vector<8x1xf32>
    %584 = vector.extract_strided_slice %392 {offsets = [0, 1], sizes = [1, 1], strides = [1, 1]} : vector<1x4xf32> to vector<1x1xf32>
    %585 = vector.broadcast %584 : vector<1x1xf32> to vector<8x1xf32>
    %586 = arith.mulf %583, %585 : vector<8x1xf32>
    %c1_i32_158 = arith.constant 1 : i32
    %587 = vector.broadcast %c1_i32_158 : i32 to vector<8x4xi32>
    %588 = arith.cmpi eq, %6, %587 : vector<8x4xi32>
    %589 = arith.extui %588 : vector<8x4xi1> to vector<8x4xi32>
    %590 = arith.sitofp %589 : vector<8x4xi32> to vector<8x4xf32>
    %591 = vector.broadcast %586 : vector<8x1xf32> to vector<8x4xf32>
    %592 = arith.mulf %591, %590 : vector<8x4xf32>
    %593 = arith.addf %555, %592 : vector<8x4xf32>
    %c10_i32_159 = arith.constant 10 : i32
    %594 = vector.broadcast %c10_i32_159 : i32 to vector<8x40xi32>
    %595 = arith.cmpi sge, %7, %594 : vector<8x40xi32>
    %c20_i32_160 = arith.constant 20 : i32
    %596 = vector.broadcast %c20_i32_160 : i32 to vector<8x40xi32>
    %597 = arith.cmpi slt, %7, %596 : vector<8x40xi32>
    %598 = arith.andi %595, %597 : vector<8x40xi1>
    %599 = arith.extui %598 : vector<8x40xi1> to vector<8x40xi32>
    %600 = arith.sitofp %599 : vector<8x40xi32> to vector<8x40xf32>
    %601 = vector.broadcast %586 : vector<8x1xf32> to vector<8x40xf32>
    %602 = arith.mulf %601, %600 : vector<8x40xf32>
    %603 = arith.addf %565, %602 : vector<8x40xf32>
    %604 = arith.mulf %583, %5 : vector<8x1xf32>
    %cst_161 = arith.constant dense<0.000000e+00> : vector<8xf32>
    %605 = vector.multi_reduction <add>, %604, %cst_161 [1] : vector<8x1xf32> to vector<8xf32>
    %606 = vector.shape_cast %605 : vector<8xf32> to vector<8x1xf32>
    %cst_162 = arith.constant dense<0.000000e+00> : vector<1xf32>
    %607 = vector.multi_reduction <add>, %606, %cst_162 [0] : vector<8x1xf32> to vector<1xf32>
    %608 = vector.shape_cast %607 : vector<1xf32> to vector<1x1xf32>
    %c13_i32 = arith.constant 13 : i32
    %609 = vector.broadcast %c13_i32 : i32 to vector<1x128xi32>
    %610 = arith.cmpi eq, %0, %609 : vector<1x128xi32>
    %cst_163 = arith.constant 0.000000e+00 : f32
    %611 = vector.shape_cast %608 : vector<1x1xf32> to vector<1x1xf32>
    %612 = vector.broadcast %611 : vector<1x1xf32> to vector<1x128xf32>
    %613 = vector.broadcast %cst_163 : f32 to vector<1x128xf32>
    %614 = arith.select %610, %612, %613 : vector<1x128xi1>, vector<1x128xf32>
    %615 = arith.addf %577, %614 : vector<1x128xf32>
    %c2_164 = arith.constant 2 : index
    %c0_165 = arith.constant 0 : index
    %c0_166 = arith.constant 0 : index
    %616 = vector.load %arg3[%c2_164, %c0_165, %c0_166] : memref<4x8x1680xf32, #tpu.memory_space<vmem>>, vector<1x8x1680xf32>
    %617 = vector.shape_cast %616 : vector<1x8x1680xf32> to vector<8x1680xf32>
    %618 = vector.broadcast %537 : vector<1x1680xf32> to vector<8x1680xf32>
    %619 = arith.mulf %617, %618 : vector<8x1680xf32>
    %cst_167 = arith.constant dense<0.000000e+00> : vector<8xf32>
    %620 = vector.multi_reduction <add>, %619, %cst_167 [1] : vector<8x1680xf32> to vector<8xf32>
    %621 = vector.shape_cast %620 : vector<8xf32> to vector<8x1xf32>
    %622 = vector.extract_strided_slice %392 {offsets = [0, 2], sizes = [1, 1], strides = [1, 1]} : vector<1x4xf32> to vector<1x1xf32>
    %623 = vector.broadcast %622 : vector<1x1xf32> to vector<8x1xf32>
    %624 = arith.mulf %621, %623 : vector<8x1xf32>
    %c2_i32_168 = arith.constant 2 : i32
    %625 = vector.broadcast %c2_i32_168 : i32 to vector<8x4xi32>
    %626 = arith.cmpi eq, %6, %625 : vector<8x4xi32>
    %627 = arith.extui %626 : vector<8x4xi1> to vector<8x4xi32>
    %628 = arith.sitofp %627 : vector<8x4xi32> to vector<8x4xf32>
    %629 = vector.broadcast %624 : vector<8x1xf32> to vector<8x4xf32>
    %630 = arith.mulf %629, %628 : vector<8x4xf32>
    %631 = arith.addf %593, %630 : vector<8x4xf32>
    %c20_i32_169 = arith.constant 20 : i32
    %632 = vector.broadcast %c20_i32_169 : i32 to vector<8x40xi32>
    %633 = arith.cmpi sge, %7, %632 : vector<8x40xi32>
    %c30_i32_170 = arith.constant 30 : i32
    %634 = vector.broadcast %c30_i32_170 : i32 to vector<8x40xi32>
    %635 = arith.cmpi slt, %7, %634 : vector<8x40xi32>
    %636 = arith.andi %633, %635 : vector<8x40xi1>
    %637 = arith.extui %636 : vector<8x40xi1> to vector<8x40xi32>
    %638 = arith.sitofp %637 : vector<8x40xi32> to vector<8x40xf32>
    %639 = vector.broadcast %624 : vector<8x1xf32> to vector<8x40xf32>
    %640 = arith.mulf %639, %638 : vector<8x40xf32>
    %641 = arith.addf %603, %640 : vector<8x40xf32>
    %642 = arith.mulf %621, %5 : vector<8x1xf32>
    %cst_171 = arith.constant dense<0.000000e+00> : vector<8xf32>
    %643 = vector.multi_reduction <add>, %642, %cst_171 [1] : vector<8x1xf32> to vector<8xf32>
    %644 = vector.shape_cast %643 : vector<8xf32> to vector<8x1xf32>
    %cst_172 = arith.constant dense<0.000000e+00> : vector<1xf32>
    %645 = vector.multi_reduction <add>, %644, %cst_172 [0] : vector<8x1xf32> to vector<1xf32>
    %646 = vector.shape_cast %645 : vector<1xf32> to vector<1x1xf32>
    %c14_i32 = arith.constant 14 : i32
    %647 = vector.broadcast %c14_i32 : i32 to vector<1x128xi32>
    %648 = arith.cmpi eq, %0, %647 : vector<1x128xi32>
    %cst_173 = arith.constant 0.000000e+00 : f32
    %649 = vector.shape_cast %646 : vector<1x1xf32> to vector<1x1xf32>
    %650 = vector.broadcast %649 : vector<1x1xf32> to vector<1x128xf32>
    %651 = vector.broadcast %cst_173 : f32 to vector<1x128xf32>
    %652 = arith.select %648, %650, %651 : vector<1x128xi1>, vector<1x128xf32>
    %653 = arith.addf %615, %652 : vector<1x128xf32>
    %c3_174 = arith.constant 3 : index
    %c0_175 = arith.constant 0 : index
    %c0_176 = arith.constant 0 : index
    %654 = vector.load %arg3[%c3_174, %c0_175, %c0_176] : memref<4x8x1680xf32, #tpu.memory_space<vmem>>, vector<1x8x1680xf32>
    %655 = vector.shape_cast %654 : vector<1x8x1680xf32> to vector<8x1680xf32>
    %656 = vector.broadcast %537 : vector<1x1680xf32> to vector<8x1680xf32>
    %657 = arith.mulf %655, %656 : vector<8x1680xf32>
    %cst_177 = arith.constant dense<0.000000e+00> : vector<8xf32>
    %658 = vector.multi_reduction <add>, %657, %cst_177 [1] : vector<8x1680xf32> to vector<8xf32>
    %659 = vector.shape_cast %658 : vector<8xf32> to vector<8x1xf32>
    %660 = vector.extract_strided_slice %392 {offsets = [0, 3], sizes = [1, 1], strides = [1, 1]} : vector<1x4xf32> to vector<1x1xf32>
    %661 = vector.broadcast %660 : vector<1x1xf32> to vector<8x1xf32>
    %662 = arith.mulf %659, %661 : vector<8x1xf32>
    %c3_i32_178 = arith.constant 3 : i32
    %663 = vector.broadcast %c3_i32_178 : i32 to vector<8x4xi32>
    %664 = arith.cmpi eq, %6, %663 : vector<8x4xi32>
    %665 = arith.extui %664 : vector<8x4xi1> to vector<8x4xi32>
    %666 = arith.sitofp %665 : vector<8x4xi32> to vector<8x4xf32>
    %667 = vector.broadcast %662 : vector<8x1xf32> to vector<8x4xf32>
    %668 = arith.mulf %667, %666 : vector<8x4xf32>
    %669 = arith.addf %631, %668 : vector<8x4xf32>
    %c30_i32_179 = arith.constant 30 : i32
    %670 = vector.broadcast %c30_i32_179 : i32 to vector<8x40xi32>
    %671 = arith.cmpi sge, %7, %670 : vector<8x40xi32>
    %c40_i32_180 = arith.constant 40 : i32
    %672 = vector.broadcast %c40_i32_180 : i32 to vector<8x40xi32>
    %673 = arith.cmpi slt, %7, %672 : vector<8x40xi32>
    %674 = arith.andi %671, %673 : vector<8x40xi1>
    %675 = arith.extui %674 : vector<8x40xi1> to vector<8x40xi32>
    %676 = arith.sitofp %675 : vector<8x40xi32> to vector<8x40xf32>
    %677 = vector.broadcast %662 : vector<8x1xf32> to vector<8x40xf32>
    %678 = arith.mulf %677, %676 : vector<8x40xf32>
    %679 = arith.addf %641, %678 : vector<8x40xf32>
    %680 = arith.mulf %659, %5 : vector<8x1xf32>
    %cst_181 = arith.constant dense<0.000000e+00> : vector<8xf32>
    %681 = vector.multi_reduction <add>, %680, %cst_181 [1] : vector<8x1xf32> to vector<8xf32>
    %682 = vector.shape_cast %681 : vector<8xf32> to vector<8x1xf32>
    %cst_182 = arith.constant dense<0.000000e+00> : vector<1xf32>
    %683 = vector.multi_reduction <add>, %682, %cst_182 [0] : vector<8x1xf32> to vector<1xf32>
    %684 = vector.shape_cast %683 : vector<1xf32> to vector<1x1xf32>
    %c15_i32 = arith.constant 15 : i32
    %685 = vector.broadcast %c15_i32 : i32 to vector<1x128xi32>
    %686 = arith.cmpi eq, %0, %685 : vector<1x128xi32>
    %cst_183 = arith.constant 0.000000e+00 : f32
    %687 = vector.shape_cast %684 : vector<1x1xf32> to vector<1x1xf32>
    %688 = vector.broadcast %687 : vector<1x1xf32> to vector<1x128xf32>
    %689 = vector.broadcast %cst_183 : f32 to vector<1x128xf32>
    %690 = arith.select %686, %688, %689 : vector<1x128xi1>, vector<1x128xf32>
    %691 = arith.addf %653, %690 : vector<1x128xf32>
    %cst_184 = arith.constant dense<0.000000e+00> : vector<8xf32>
    %692 = vector.multi_reduction <add>, %669, %cst_184 [1] : vector<8x4xf32> to vector<8xf32>
    %693 = vector.shape_cast %692 : vector<8xf32> to vector<8x1xf32>
    %694 = vector.broadcast %389 : vector<1x4xf32> to vector<8x4xf32>
    %695 = arith.mulf %669, %694 : vector<8x4xf32>
    %cst_185 = arith.constant dense<0.000000e+00> : vector<8xf32>
    %696 = vector.multi_reduction <add>, %695, %cst_185 [1] : vector<8x4xf32> to vector<8xf32>
    %697 = vector.shape_cast %696 : vector<8xf32> to vector<8x1xf32>
    %cst_186 = arith.constant 1.000000e+00 : f32
    %698 = vector.broadcast %cst_186 : f32 to vector<8x1xf32>
    %699 = arith.subf %698, %693 : vector<8x1xf32>
    %cst_187 = arith.constant 1.000000e+00 : f32
    %700 = vector.broadcast %cst_187 : f32 to vector<8x1xf32>
    %701 = arith.mulf %699, %700 : vector<8x1xf32>
    %702 = arith.addf %697, %701 : vector<8x1xf32>
    %cst_188 = arith.constant 0.000000e+00 : f32
    %703 = vector.broadcast %cst_188 : f32 to vector<8x1xf32>
    %704 = arith.cmpf oeq, %702, %703 : vector<8x1xf32>
    %705 = arith.select %704, %409, %410 : vector<8x1xi1>, vector<8x1xf32>
    %cst_189 = arith.constant 0.000000e+00 : f32
    %706 = vector.broadcast %cst_189 : f32 to vector<8x1xf32>
    %707 = arith.subf %706, %705 : vector<8x1xf32>
    %cst_190 = arith.constant dense<0.000000e+00> : vector<8xf32>
    %708 = vector.multi_reduction <add>, %707, %cst_190 [1] : vector<8x1xf32> to vector<8xf32>
    %709 = vector.shape_cast %708 : vector<8xf32> to vector<8x1xf32>
    %cst_191 = arith.constant dense<0.000000e+00> : vector<1xf32>
    %710 = vector.multi_reduction <add>, %709, %cst_191 [0] : vector<8x1xf32> to vector<1xf32>
    %711 = vector.shape_cast %710 : vector<1xf32> to vector<1x1xf32>
    %712 = arith.addf %343, %711 : vector<1x1xf32>
    %713 = arith.mulf %669, %426 : vector<8x4xf32>
    %cst_192 = arith.constant dense<0.000000e+00> : vector<8xf32>
    %714 = vector.multi_reduction <add>, %713, %cst_192 [1] : vector<8x4xf32> to vector<8xf32>
    %715 = vector.shape_cast %714 : vector<8xf32> to vector<8x1xf32>
    %cst_193 = arith.constant dense<0.000000e+00> : vector<1xf32>
    %716 = vector.multi_reduction <add>, %715, %cst_193 [0] : vector<8x1xf32> to vector<1xf32>
    %717 = vector.shape_cast %716 : vector<1xf32> to vector<1x1xf32>
    %718 = arith.addf %349, %717 : vector<1x1xf32>
    %719 = arith.mulf %669, %431 : vector<8x4xf32>
    %cst_194 = arith.constant dense<0.000000e+00> : vector<8xf32>
    %720 = vector.multi_reduction <add>, %719, %cst_194 [1] : vector<8x4xf32> to vector<8xf32>
    %721 = vector.shape_cast %720 : vector<8xf32> to vector<8x1xf32>
    %cst_195 = arith.constant dense<0.000000e+00> : vector<1xf32>
    %722 = vector.multi_reduction <add>, %721, %cst_195 [0] : vector<8x1xf32> to vector<1xf32>
    %723 = vector.shape_cast %722 : vector<1xf32> to vector<1x1xf32>
    %724 = arith.addf %355, %723 : vector<1x1xf32>
    %725 = arith.mulf %679, %478 : vector<8x40xf32>
    %cst_196 = arith.constant dense<0.000000e+00> : vector<8xf32>
    %726 = vector.multi_reduction <add>, %725, %cst_196 [1] : vector<8x40xf32> to vector<8xf32>
    %727 = vector.shape_cast %726 : vector<8xf32> to vector<8x1xf32>
    %cst_197 = arith.constant dense<0.000000e+00> : vector<1xf32>
    %728 = vector.multi_reduction <add>, %727, %cst_197 [0] : vector<8x1xf32> to vector<1xf32>
    %729 = vector.shape_cast %728 : vector<1xf32> to vector<1x1xf32>
    %730 = arith.addf %361, %729 : vector<1x1xf32>
    %731 = vector.extract_strided_slice %380 {offsets = [0, 0], sizes = [8, 1], strides = [1, 1]} : vector<8x2xf32> to vector<8x1xf32>
    %732 = vector.extract_strided_slice %380 {offsets = [0, 1], sizes = [8, 1], strides = [1, 1]} : vector<8x2xf32> to vector<8x1xf32>
    %733 = arith.cmpf oge, %731, %732 : vector<8x1xf32>
    %734 = arith.extui %733 : vector<8x1xi1> to vector<8x1xi32>
    %735 = arith.sitofp %734 : vector<8x1xi32> to vector<8x1xf32>
    %cst_198 = arith.constant dense<0.000000e+00> : vector<8xf32>
    %736 = vector.multi_reduction <add>, %735, %cst_198 [1] : vector<8x1xf32> to vector<8xf32>
    %737 = vector.shape_cast %736 : vector<8xf32> to vector<8x1xf32>
    %cst_199 = arith.constant dense<0.000000e+00> : vector<1xf32>
    %738 = vector.multi_reduction <add>, %737, %cst_199 [0] : vector<8x1xf32> to vector<1xf32>
    %739 = vector.shape_cast %738 : vector<1xf32> to vector<1x1xf32>
    %cst_200 = arith.constant dense<0.000000e+00> : vector<1xf32>
    %740 = vector.multi_reduction <add>, %392, %cst_200 [1] : vector<1x4xf32> to vector<1xf32>
    %741 = vector.shape_cast %740 : vector<1xf32> to vector<1x1xf32>
    %cst_201 = arith.constant dense<0.000000e+00> : vector<1xf32>
    %742 = vector.multi_reduction <add>, %741, %cst_201 [0] : vector<1x1xf32> to vector<1xf32>
    %743 = vector.shape_cast %742 : vector<1xf32> to vector<1x1xf32>
    %744 = arith.subf %739, %743 : vector<1x1xf32>
    %745 = math.absf %744 : vector<1x1xf32>
    %746 = arith.addf %377, %745 : vector<1x1xf32>
    %747 = arith.addf %378, %743 : vector<1x1xf32>
    %cst_202 = arith.constant 6.250000e-02 : f32
    %748 = vector.broadcast %cst_202 : f32 to vector<1x1xf32>
    %749 = arith.mulf %712, %748 : vector<1x1xf32>
    %cst_203 = arith.constant 5.000000e-01 : f32
    %750 = vector.broadcast %cst_203 : f32 to vector<1x1xf32>
    %751 = arith.mulf %746, %750 : vector<1x1xf32>
    %cst_204 = arith.constant 1.000000e+00 : f32
    %752 = vector.broadcast %cst_204 : f32 to vector<1x1xf32>
    %753 = arith.maximumf %747, %752 : vector<1x1xf32>
    %754 = arith.divf %718, %753 : vector<1x1xf32>
    %755 = arith.divf %724, %753 : vector<1x1xf32>
    %756 = arith.divf %730, %753 : vector<1x1xf32>
    %cst_205 = arith.constant 3.000000e+00 : f32
    %757 = vector.broadcast %cst_205 : f32 to vector<1x1xf32>
    %758 = arith.mulf %757, %749 : vector<1x1xf32>
    %cst_206 = arith.constant 5.000000e+00 : f32
    %759 = vector.broadcast %cst_206 : f32 to vector<1x1xf32>
    %760 = arith.mulf %759, %756 : vector<1x1xf32>
    %761 = arith.addf %758, %760 : vector<1x1xf32>
    %cst_207 = arith.constant 2.000000e+00 : f32
    %762 = vector.broadcast %cst_207 : f32 to vector<1x1xf32>
    %763 = arith.mulf %762, %754 : vector<1x1xf32>
    %764 = arith.addf %761, %763 : vector<1x1xf32>
    %cst_208 = arith.constant 2.000000e+00 : f32
    %765 = vector.broadcast %cst_208 : f32 to vector<1x1xf32>
    %766 = arith.mulf %765, %755 : vector<1x1xf32>
    %767 = arith.addf %764, %766 : vector<1x1xf32>
    %c0_i32_209 = arith.constant 0 : i32
    %768 = vector.broadcast %c0_i32_209 : i32 to vector<1x128xi32>
    %769 = arith.cmpi eq, %0, %768 : vector<1x128xi32>
    %cst_210 = arith.constant 0.000000e+00 : f32
    %770 = vector.shape_cast %749 : vector<1x1xf32> to vector<1x1xf32>
    %771 = vector.broadcast %770 : vector<1x1xf32> to vector<1x128xf32>
    %772 = vector.broadcast %cst_210 : f32 to vector<1x128xf32>
    %773 = arith.select %769, %771, %772 : vector<1x128xi1>, vector<1x128xf32>
    %774 = arith.addf %691, %773 : vector<1x128xf32>
    %c1_i32_211 = arith.constant 1 : i32
    %775 = vector.broadcast %c1_i32_211 : i32 to vector<1x128xi32>
    %776 = arith.cmpi eq, %0, %775 : vector<1x128xi32>
    %cst_212 = arith.constant 0.000000e+00 : f32
    %777 = vector.shape_cast %751 : vector<1x1xf32> to vector<1x1xf32>
    %778 = vector.broadcast %777 : vector<1x1xf32> to vector<1x128xf32>
    %779 = vector.broadcast %cst_212 : f32 to vector<1x128xf32>
    %780 = arith.select %776, %778, %779 : vector<1x128xi1>, vector<1x128xf32>
    %781 = arith.addf %774, %780 : vector<1x128xf32>
    %c2_i32_213 = arith.constant 2 : i32
    %782 = vector.broadcast %c2_i32_213 : i32 to vector<1x128xi32>
    %783 = arith.cmpi eq, %0, %782 : vector<1x128xi32>
    %cst_214 = arith.constant 0.000000e+00 : f32
    %784 = vector.shape_cast %754 : vector<1x1xf32> to vector<1x1xf32>
    %785 = vector.broadcast %784 : vector<1x1xf32> to vector<1x128xf32>
    %786 = vector.broadcast %cst_214 : f32 to vector<1x128xf32>
    %787 = arith.select %783, %785, %786 : vector<1x128xi1>, vector<1x128xf32>
    %788 = arith.addf %781, %787 : vector<1x128xf32>
    %c3_i32_215 = arith.constant 3 : i32
    %789 = vector.broadcast %c3_i32_215 : i32 to vector<1x128xi32>
    %790 = arith.cmpi eq, %0, %789 : vector<1x128xi32>
    %cst_216 = arith.constant 0.000000e+00 : f32
    %791 = vector.shape_cast %755 : vector<1x1xf32> to vector<1x1xf32>
    %792 = vector.broadcast %791 : vector<1x1xf32> to vector<1x128xf32>
    %793 = vector.broadcast %cst_216 : f32 to vector<1x128xf32>
    %794 = arith.select %790, %792, %793 : vector<1x128xi1>, vector<1x128xf32>
    %795 = arith.addf %788, %794 : vector<1x128xf32>
    %c4_i32 = arith.constant 4 : i32
    %796 = vector.broadcast %c4_i32 : i32 to vector<1x128xi32>
    %797 = arith.cmpi eq, %0, %796 : vector<1x128xi32>
    %cst_217 = arith.constant 0.000000e+00 : f32
    %798 = vector.shape_cast %756 : vector<1x1xf32> to vector<1x1xf32>
    %799 = vector.broadcast %798 : vector<1x1xf32> to vector<1x128xf32>
    %800 = vector.broadcast %cst_217 : f32 to vector<1x128xf32>
    %801 = arith.select %797, %799, %800 : vector<1x128xi1>, vector<1x128xf32>
    %802 = arith.addf %795, %801 : vector<1x128xf32>
    %c5_i32 = arith.constant 5 : i32
    %803 = vector.broadcast %c5_i32 : i32 to vector<1x128xi32>
    %804 = arith.cmpi eq, %0, %803 : vector<1x128xi32>
    %cst_218 = arith.constant 0.000000e+00 : f32
    %805 = vector.shape_cast %767 : vector<1x1xf32> to vector<1x1xf32>
    %806 = vector.broadcast %805 : vector<1x1xf32> to vector<1x128xf32>
    %807 = vector.broadcast %cst_218 : f32 to vector<1x128xf32>
    %808 = arith.select %804, %806, %807 : vector<1x128xi1>, vector<1x128xf32>
    %809 = arith.addf %802, %808 : vector<1x128xf32>
    %c0_219 = arith.constant 0 : index
    %c0_220 = arith.constant 0 : index
    %810 = vector.load %arg5[%c0_219, %c0_220] : memref<1x128xf32, #tpu.memory_space<vmem>>, vector<1x128xf32>
    tpu.vector_store %arg5[%c0_219, %c0_220], %809 {strides = array<i32>} : memref<1x128xf32, #tpu.memory_space<vmem>>, vector<1x128xf32>,
    return
  }
}

</mosaic_0001>

<bundles_post_ra>
// kernel: _criterion_device.1
= control target key start
LH: loop header
LB: loop body
LE: loop exit
PB: predicated region body
PF: predicated region fallthrough
CT: control target
= control target key end

     0   :  { %10 = vsyncpa [#allocation3], 0  ;;  %s4376_s0 = inlined_call_operand.vmem [shape: f32[2,8,2], index: 0, kind: input, shape index: {}]   ;;  %s4377_s1 = inlined_call_operand.vmem [shape: f32[2,8,8], index: 1, kind: input, shape index: {}]   ;;  %s4378_s2 = inlined_call_operand.hbm [shape: f32[2,4,40], index: 2, kind: input, shape index: {}]   ;;  %s4379_s3 = inlined_call_operand.hbm [shape: f32[4,8,1680], index: 3, kind: input, shape index: {}]   ;;  %s4380_s4 = inlined_call_operand.hbm [shape: f32[40,4], index: 4, kind: input, shape index: {}]   ;;  %s4381_s5 = inlined_call_operand.vmem [shape: f32[1,128], index: 5, kind: output, shape index: {}]  }
   0x1   :  { %11 = vsyncpa [#allocation5], 0  ;;  %s2698_s18 = smov [#allocation4]  }
   0x2   :  { %s33_s19 = sshll.u32 %s2698_s18, 4  ;;  %s34_s19 = int_to_ptr.vmem [resolvable:$true] %s33_s19 }
   0x3   :  { %s2642_s20 = scalar_lea.vmem %s34_s19, 7168  ;;  %p2647_p1 = scmp.lt.s32.totalorder %s34_s19, %s34_s19 }
   0x4   :  { %p2643_p0 = scmp.ne.s32.totalorder %s34_s19, %s2642_s20  ;;  %p2648_p2 = scmp.lt.s32.totalorder %s2642_s20, %s2642_s20 }
   0x6   :  { %p2649_p3 = por %p2648_p2, %p2647_p1 }
   0x8   :  { %p2650_p4 = pnand %p2649_p3, %p2643_p0 }
   0xa   :  { %2653 = shalt.err (!%p2650_p4)
}
   0xb   :  { %s2699_s21 = smov 1792   ;;  %s2700_s22 = smov 112  }
   0xc   :  { %39 = dma.hbm_to_vmem [thread:$0]  %s4379_s3, 7168, %s34_s19, [#allocation5], %s2699_s21, %s2699_s21, %s2700_s22  }
   0xd   :  { %s2701_s25 = smov [#allocation2]  }
   0xe   :  { %s21_s26 = sshll.u32 %s2701_s25, 4  ;;  %s22_s26 = int_to_ptr.vmem [resolvable:$true] %s21_s26 }
   0xf   :  { %s2662_s27 = scalar_lea.vmem %s22_s26, 128  ;;  %p2667_p6 = scmp.lt.s32.totalorder %s22_s26, %s22_s26 }
  0x10   :  { %p2663_p5 = scmp.ne.s32.totalorder %s22_s26, %s2662_s27  ;;  %p2668_p7 = scmp.lt.s32.totalorder %s2662_s27, %s2662_s27 }
  0x12   :  { %p2669_p8 = por %p2668_p7, %p2667_p6 }
  0x14   :  { %p2670_p9 = pnand %p2669_p8, %p2663_p5 }
  0x16   :  { %2673 = shalt.err (!%p2670_p9)
}
  0x17   :  { %s2702_s28 = smov 64   ;;  %s2703_s29 = smov 4  }
  0x18   :  { %27 = dma.hbm_to_vmem [thread:$0]  %s4378_s2, 128, %s22_s26, [#allocation3], %s2702_s28, %s2702_s28, %s2703_s29  }
  0x19   :  { %s2704_s7 = smov [#allocation6]  }
  0x1a   :  { %s45_s8 = sshll.u32 %s2704_s7, 4  ;;  %s46_s8 = int_to_ptr.vmem [resolvable:$true] %s45_s8 }
  0x1b   :  { %s2682_s3 = scalar_lea.vmem %s46_s8, 640  ;;  %p2687_p11 = scmp.lt.s32.totalorder %s46_s8, %s46_s8 }
  0x1c   :  { %p2683_p10 = scmp.ne.s32.totalorder %s46_s8, %s2682_s3  ;;  %p2688_p12 = scmp.lt.s32.totalorder %s2682_s3, %s2682_s3 }
  0x1e   :  { %p2689_p13 = por %p2688_p12, %p2687_p11 }
  0x20   :  { %p2690_p0 = pnand %p2689_p13, %p2683_p10 }
  0x22   :  { %2693 = shalt.err (!%p2690_p0)
}
  0x23   :  { %s2705_s9 = smov 128   ;;  %s2706_s10 = smov 8  }
  0x24   :  { %51 = dma.hbm_to_vmem [thread:$0]  %s4380_s4, 640, %s46_s8, [#allocation5], %s2705_s9, %s2705_s9, %s2706_s10  }
  0x25   :  { %2694 = dma.done.wait [#allocation3], 128  }
  0x26   :  { %2695 = vsyncadd [#allocation3], 4294967168 }
  0x27   :  { %2696 = dma.done.wait [#allocation5], 7808  }
  0x28   :  { %2697 = vsyncadd [#allocation5], 4294959488  ;;  %v2707_v0 = vmov 2   ;;  %v2708_v1 = vmov 3   ;;  %v2770_v2 = vld [vmem:[%s4377_s1] sm:$0xff]  ;;  %v2777_v3 = vld [vmem:[%s4377_s1 + $0x8] sm:$0xff]  ;;  %v4386_v20 = vlaneseq }
  0x29   :  { %2511 = vset.pattern.permute.xlu1 %v2707_v0  ;;  %2510 = vset.pattern.permute.xlu0 %v2708_v1  ;;  %v2709_v4 = vmov 4   ;;  %v2710_v5 = vmov 5   ;;  %v2711_v6 = vmov 6   ;;  %v2712_v7 = vmov 7   ;;  %v67_v9 = vld [vmem:[#allocation6 + $0x20] sm:$0xff]  ;;  %v66_v10 = vld [vmem:[#allocation6 + $0x18] sm:$0xff] }
  0x2a   :  { %170 = vperm.xlu1 %2511, %v2770_v2   ;;  %156 = vperm.xlu0 %2510, %v2770_v2   ;;  %v4384_v8 = vmov 0.0   ;;  %v4382_v11 = vmov 0   ;;  %v65_v12 = vld [vmem:[#allocation6 + $0x10] sm:$0xff]  ;;  %v64_v13 = vld [vmem:[#allocation6 + $0x8] sm:$0xff]  ;;  %v63_v14 = vld [vmem:[#allocation6] sm:$0xff]  ;;  %vm2715_vm0 = vmmov 0  }
  0x2b   :  { %2456 = vmatprep.subr.mxu0 %v4384_v8  ;;  %2469 = vmatprep.subr.mxu1 %v4384_v8  ;;  %vm101_vm1 = vcmask 15360   ;;  %v2806_v15 = vld [vmem:[%s4376_s0 + $0x8] sm:$0xff]  ;;  %v2813_v17 = vld [vmem:[%s4376_s0] sm:$0xff]  ;;  %v2716_v19 = vmov 1   ;;  %v2821_v21 = vshrl.u32 %v4386_v20, 7  ;;  %vm215_vm9 = vcmask 326656  }
  0x2c   :  { %2457 = vmatpush3.msra.mxu0 %v67_v9  ;;  %2470 = vmatpush3.msra.mxu1 %v67_v9  ;;  %v1278_v16 = vsel %vm101_vm1, %v2806_v15, -inf  ;;  %v102_v18 = vsel %vm101_vm1, %v2813_v17, -inf  ;;  %v2824_v23 = vld [vmem:[#allocation2] sm:$0xf]  ;;  %v2827_v25 = vld [vmem:[#allocation2 + $0x4] sm:$0xf] }
  0x2d   :  { %2458 = vmatprep.subr.mxu0 %v4384_v8  ;;  %2471 = vmatprep.subr.mxu1 %v4384_v8  ;;  %4478 = vst [vmem:[#allocation9_spill] sm:$0xff] %v2821_v21  ;;  %v153_v22 = vsub.s32 1, %v2821_v21  ;;  %v2717_v31 = vmov -1e-05   ;;  %vm196_vm6 = vcmp.ge.f32.partialorder %v2824_v23, 0.0  ;;  %v199_v56 = vsub.s32 0, %v2821_v21 }
  0x2e   :  { %1346 = vperm.xlu1 %2511, %v2777_v3   ;;  %1332 = vperm.xlu0 %2510, %v2777_v3   ;;  %v203_v61 = vsel %vm196_vm6, 1, %v4382_v11  ;;  %vm1372_vm7 = vcmp.ge.f32.partialorder %v2827_v25, 0.0  ;;  %s2718_s18 = smov 124   ;;  %s2719_s19 = smov 120   ;;  %vm116_vm11 = vcmp.eq.f32.partialorder %v2824_v23, 0.0  ;;  %vm1292_vm12 = vcmp.eq.f32.partialorder %v2827_v25, 0.0 }
  0x2f   :  { %2459 = vmatpush3.msra.mxu0 %v66_v10  ;;  %2472 = vmatpush3.msra.mxu1 %v66_v10  ;;  %v154_v24 = vrot.slane %v2824_v23, %v153_v22  ;;  %v1330_v28 = vrot.slane %v2827_v25, %v153_v22  ;;  %v207_v9 = vrot.slane %v203_v61, %v199_v56  ;;  %s2720_s20 = smov 116   ;;  %vm420_vm15 = vcmask 130048   ;;  %s2721_s21 = smov 127  }
  0x30   :  { %2460 = vmatprep.subr.mxu0 %v4384_v8  ;;  %2473 = vmatprep.subr.mxu1 %v4384_v8 }
  0x31   :  { %2461 = vmatpush3.msra.mxu0 %v65_v12  ;;  %2474 = vmatpush3.msra.mxu1 %v65_v12  ;;  %vm208_vm8 = vcmp.eq.s32.totalorder %v207_v9, 1 }
  0x32   :  { %2513 = vset.pattern.permute.xlu1 %v2709_v4  ;;  %2512 = vset.pattern.permute.xlu0 %v2709_v4 }
  0x33   :  { %1351 = vperm.xlu1 %2513, %v2777_v3   ;;  %175 = vperm.xlu0 %2512, %v2770_v2  }
  0x34   :  { %2462 = vmatprep.subr.mxu0 %v4384_v8  ;;  %2475 = vmatprep.subr.mxu1 %v4384_v8 }
  0x35   :  { %2463 = vmatpush3.msra.mxu0 %v64_v13  ;;  %2476 = vmatpush3.msra.mxu1 %v64_v13  ;;  %v1379_v13 = vsel %vm1372_vm7, 1, %v4382_v11 }
  0x36   :  { %2464 = vmatprep.subr.mxu0 %v4384_v8  ;;  %2466 = vmatprep.mubr.msk.f32.mxu0 %vm2715_vm0, %v4384_v8 }
  0x37   :  { %2514 = vset.pattern.permute.xlu1 %v2710_v5  ;;  %2515 = vset.pattern.permute.xlu0 %v2711_v6 }
  0x38   :  { %181 = vperm.xlu1 %2514, %v2770_v2   ;;  %186 = vperm.xlu0 %2515, %v2770_v2  }
  0x39   :  { %2465 = vmatpush3.msra.mxu0 %v63_v14  ;;  %2477 = vmatprep.subr.mxu1 %v4384_v8 }
  0x3a   :  { %2479 = vmatprep.mubr.msk.f32.mxu1 %vm2715_vm0, %v4384_v8  ;;  %2478 = vmatpush3.msra.mxu1 %v63_v14 }
  0x3c   :  { %1357 = vperm.xlu1 %2514, %v2777_v3   ;;  %2517 = vset.pattern.permute.xlu0 %v2712_v7 }
  0x3d   :  { %192 = vperm.xlu0 %2517, %v2770_v2  }
  0x40   :  { %2516 = vset.pattern.permute.xlu1 %v2711_v6  ;;  %v200_v6 = vrot.slane %v2824_v23, %v199_v56 }
  0x41   :  { %1362 = vperm.xlu1 %2516, %v2777_v3   ;;  %2519 = vset.pattern.permute.xlu0 %v4382_v11 }
  0x45   :  { %2518 = vset.pattern.permute.xlu1 %v2712_v7  ;;  %v212_v7 = vsub.s32 2, %v2821_v21 }
  0x46   :  { %1368 = vperm.xlu1 %2518, %v2777_v3  }
  0x4a   :  { %2520 = vset.pattern.permute.xlu1 %v4382_v11 }
  0x5c   :  { %1279 = vmax.xlane.f32.xlu0 %v1278_v16  ;;  %v1376_v16 = vrot.slane %v2827_v25, %v199_v56 }
  0x6a   :  { %103 = vmax.xlane.f32.xlu1 %v102_v18 }
  0x7b   :  { %1312 = vperm.xlu1 %2520, %v2777_v3  }
  0x7f   :  { %2521 = vset.pattern.permute.xlu1 %v2716_v19 }
  0x80   :  { %146 = vperm.xlu1 %2521, %v2770_v2  }
  0xa5   :  { %v157_v26 = vpop.permute.xlu0 %156  ;;  %v171_v30 = vpop.permute.xlu1 %170 }
  0xa6   :  { %v159_v27 = vsub.f32 %v154_v24, %v157_v26 }
  0xa8   :  { %v160_v29 = vand.u32 2147483647, %v159_v27  ;;  %vm162_vm2 = vcmp.ge.f32.partialorder %v159_v27, 0.0 }
  0xa9   :  { %v163_v32 = vsel %vm162_vm2, 1e-05, %v2717_v31  ;;  %v1333_v33 = vpop.permute.xlu0 %1332  ;;  %v1347_v38 = vpop.permute.xlu1 %1346 }
  0xaa   :  { %vm161_vm3 = vcmp.lt.f32.partialorder %v160_v29, 1e-05  ;;  %v1335_v34 = vsub.f32 %v1330_v28, %v1333_v33 }
  0xab   :  { %v164_v35 = vsel %vm161_vm3, %v163_v32, %v159_v27  ;;  %v213_v27 = vrot.slane %v2824_v23, %v212_v7 }
  0xac   :  { %2541 = vrcp.f32 %v164_v35  ;;  %v1336_v36 = vand.u32 2147483647, %v1335_v34  ;;  %vm1338_vm4 = vcmp.ge.f32.partialorder %v1335_v34, 0.0 }
  0xad   :  { %v1339_v37 = vsel %vm1338_vm4, 1e-05, %v2717_v31 }
  0xae   :  { %vm1337_vm5 = vcmp.lt.f32.partialorder %v1336_v36, 1e-05  ;;  %v1352_v40 = vpop.permute.xlu1 %1351  ;;  %v176_v44 = vpop.permute.xlu0 %175 }
  0xaf   :  { %v1340_v39 = vsel %vm1337_vm5, %v1339_v37, %v1335_v34 }
  0xb0   :  { %2543 = vrcp.f32 %v1340_v39 }
  0xb3   :  { %v182_v43 = vpop.permute.xlu1 %181  ;;  %v187_v52 = vpop.permute.xlu0 %186 }
  0xb4   :  { %v189_v58 = vmul.f32 %v187_v52, %v154_v24  ;;  %v1383_v24 = vrot.slane %v1379_v13, %v199_v56 }
  0xb6   :  { %vm1384_vm10 = vcmp.eq.s32.totalorder %v1383_v24, 1  ;;  %v1293_v24 = vsel %vm1292_vm12, 1, %v4382_v11 }
  0xb7   :  { %v1358_v51 = vpop.permute.xlu1 %1357 }
  0xb8   :  { %v193_v63 = vpop.permute.xlu0 %192 }
  0xb9   :  { %v2542_v41 = vpop.eup %2541 }
  0xba   :  { %v166_v42 = vmul.f32 %v2542_v41, %v164_v35 }
  0xbc   :  { %v167_v45 = vsub.f32 2.0, %v166_v42  ;;  %v1363_v62 = vpop.permute.xlu1 %1362 }
  0xbd   :  { %v2544_v46 = vpop.eup %2543  ;;  %v1365_v12 = vmul.f32 %v1363_v62, %v1330_v28  ;;  %v1389_v28 = vrot.slane %v2827_v25, %v212_v7 }
  0xbe   :  { %v1342_v47 = vmul.f32 %v2544_v46, %v1340_v39  ;;  %v168_v48 = vmul.f32 %v2542_v41, %v167_v45 }
  0xc0   :  { %v1343_v49 = vsub.f32 2.0, %v1342_v47  ;;  %v173_v50 = vmul.f32 %v171_v30, %v168_v48 }
  0xc1   :  { %v1369_v26 = vpop.permute.xlu1 %1368 }
  0xc2   :  { %v1344_v53 = vmul.f32 %v2544_v46, %v1343_v49  ;;  %v178_v54 = vadd.f32 %v176_v44, %v173_v50 }
  0xc4   :  { %v1349_v55 = vmul.f32 %v1347_v38, %v1344_v53  ;;  %v179_v57 = vmul.f32 %v178_v54, %v168_v48 }
  0xc6   :  { %v1354_v59 = vadd.f32 %v1352_v40, %v1349_v55  ;;  %v184_v60 = vadd.f32 %v182_v43, %v179_v57 }
  0xc8   :  { %v1355_v4 = vmul.f32 %v1354_v59, %v1344_v53  ;;  %v190_v5 = vadd.f32 %v189_v58, %v184_v60 }
  0xca   :  { %v1360_v10 = vadd.f32 %v1358_v51, %v1355_v4  ;;  %v195_v14 = vsub.f32 %v190_v5, %v193_v63 }
  0xcc   :  { %v1366_v18 = vadd.f32 %v1365_v12, %v1360_v10  ;;  %v201_v22 = vsub.f32 %v195_v14, %v200_v6 }
  0xce   :  { %v1371_v29 = vsub.f32 %v1366_v18, %v1369_v26  ;;  %v202_v30 = vand.u32 2147483647, %v201_v22 }
  0xd0   :  { %v1377_v31 = vsub.f32 %v1371_v29, %v1376_v16  ;;  %v209_v32 = vsel %vm208_vm8, %v202_v30, 0.0  ;;  %v117_v16 = vsel %vm116_vm11, 1, %v4382_v11 }
  0xd1   :  { %v2840_v33 = vmul.f32 %v213_v27, %v209_v32 }
  0xd2   :  { %v1378_v34 = vand.u32 2147483647, %v1377_v31 }
  0xd3   :  { %4479 = vst [vmem:[#allocation10_spill] sm:$0xff] %v2840_v33  ;;  %2467 = vmatmul.mubr.msk.f32.vlgmr.msra.gmra.mxu0 %vm215_vm9, %v2840_v33 }
  0xd4   :  { %v1385_v35 = vsel %vm1384_vm10, %v1378_v34, 0.0 }
  0xd5   :  { %v2844_v36 = vmul.f32 %v1389_v28, %v1385_v35 }
  0xd7   :  { %4480 = vst [vmem:[#allocation11_spill] sm:$0xff] %v2844_v36  ;;  %2480 = vmatmul.mubr.msk.f32.vlgmr.msra.gmra.mxu1 %vm215_vm9, %v2844_v36 }
  0xe5   :  { %v1280_v37 = vpop.xlane.xlu0 %1279 }
  0xe6   :  { %v2849_v38 = vsub.f32 %v2806_v15, %v1280_v37  ;;  %v2860_v15 = vsub.s32 3, %v2821_v21 }
  0xe8   :  { %4481 = vst [vmem:[#allocation12_spill] sm:$0xff] %v2849_v38  ;;  %v1282_v39 = vmul.f32 1.442695, %v2849_v38  ;;  %v2890_v4 = vrot.slane %v2824_v23, %v2860_v15  ;;  %v121_v18 = vrot.slane %v117_v16, %v2860_v15  ;;  %v1297_v26 = vrot.slane %v1293_v24, %v2860_v15 }
  0xea   :  { %2545 = vpow2.f32 %v1282_v39  ;;  %4488 = vst [vmem:[#allocation19_spill] sm:$0xff] %v2890_v4  ;;  %vm122_vm13 = vcmp.eq.s32.totalorder %v121_v18, 1  ;;  %vm1298_vm14 = vcmp.eq.s32.totalorder %v1297_v26, 1 }
  0xf3   :  { %v104_v40 = vpop.xlane.xlu1 %103 }
  0xf4   :  { %v2853_v41 = vsub.f32 %v2813_v17, %v104_v40  ;;  %v2865_v17 = vrot.slane %v2827_v25, %v2860_v15 }
  0xf6   :  { %4482 = vst [vmem:[#allocation13_spill] sm:$0xff] %v2853_v41  ;;  %v106_v42 = vmul.f32 1.442695, %v2853_v41  ;;  %4483 = vst [vmem:[#allocation14_spill] sm:$0xff] %v2865_v17 }
  0xf7   :  { %v2546_v43 = vpop.eup %2545  ;;  %v1313_v47 = vpop.permute.xlu1 %1312 }
  0xf8   :  { %2547 = vpow2.f32 %v106_v42  ;;  %v1284_v44 = vsel %vm101_vm1, %v2546_v43, 0.0  ;;  %v1319_v48 = vsub.f32 %v1313_v47, %v2865_v17 }
  0xf9   :  { %1285 = vadd.xlane.f32.xlu1 %v1284_v44 }
  0xfa   :  { %v2868_v49 = vand.u32 2147483647, %v1319_v48 }
  0xfc   :  { %4484 = vst [vmem:[#allocation15_spill] sm:$0xff] %v2868_v49  ;;  %v1467_v50 = vmul.f32 2.0, %v2868_v49 }
 0x105   :  { %v2548_v45 = vpop.eup %2547 }
 0x106   :  { %v108_v46 = vsel %vm101_vm1, %v2548_v45, 0.0 }
 0x107   :  { %109 = vadd.xlane.f32.xlu0 %v108_v46 }
 0x10a   :  { %1322 = vperm.xlu1 %2521, %v2777_v3   ;;  %v147_v3 = vpop.permute.xlu1 %146 }
 0x10b   :  { %v149_v9 = vsub.f32 %v147_v3, %v2890_v4 }
 0x10d   :  { %v2899_v12 = vand.u32 2147483647, %v149_v9 }
 0x10e   :  { %2522 = vset.pattern.permute.xlu1 %v4382_v11 }
 0x10f   :  { %4490 = vst [vmem:[#allocation21_spill] sm:$0xff] %v2899_v12  ;;  %v298_v13 = vmul.f32 2.0, %v2899_v12 }
 0x11d   :  { %136 = vperm.xlu0 %2519, %v2770_v2  }
 0x121   :  { %1469 = vrot.lane.b32.xlu0 %v1467_v50, %s2718_s18 }
 0x122   :  { %2527 = vset.pattern.permute.xlu0 %v2716_v19 }
 0x182   :  { %v2874_v51 = vpop.xlane.xlu1 %1285 }
 0x183   :  { %4485 = vst [vmem:[#allocation16_spill] sm:$0xff] %v2874_v51 }
 0x186   :  { %v1323_v52 = vpop.permute.xlu1 %1322 }
 0x187   :  { %v1325_v53 = vsub.f32 %v1323_v52, %v2865_v17 }
 0x189   :  { %v2877_v54 = vand.u32 2147483647, %v1325_v53  ;;  %v2918_v53 = vld [vmem:[#allocation4] sm:$0xff] }
 0x18b   :  { %4486 = vst [vmem:[#allocation17_spill] sm:$0xff] %v2877_v54  ;;  %v1473_v55 = vmul.f32 2.0, %v2877_v54 }
 0x18d   :  { %1475 = vrot.lane.b32.xlu0 %v1473_v55, %s2719_s19  ;;  %v2920_v55 = vld [vmem:[#allocation4 + $0x8] sm:$0xff] }
 0x190   :  { %v2881_v2 = vpop.xlane.xlu0 %109 }
 0x191   :  { %4487 = vst [vmem:[#allocation18_spill] sm:$0xff] %v2881_v2  ;;  %2549 = vrcp.f32 %v2881_v2  ;;  %1480 = vrot.lane.b32.xlu0 %v2865_v17, %s2720_s20 }
 0x192   :  { %2551 = vrcp.f32 %v2874_v51 }
 0x193   :  { %v285_v56 = vpop.f32.mrf.mxu0 }
 0x194   :  { %v290_v25 = vmul.f32 5.0, %v285_v56  ;;  %v2922_v56 = vld [vmem:[#allocation4 + $0x10] sm:$0xff] }
 0x195   :  { %v2468_v57 = vpop.f32.mrf.mxu0 }
 0x196   :  { %v2924_v57 = vld [vmem:[#allocation4 + $0x18] sm:$0xff] }
 0x197   :  { %v1460_v58 = vpop.f32.mrf.mxu1 }
 0x198   :  { %v137_v62 = vpop.permute.xlu0 %136  ;;  %v1465_v34 = vmul.f32 5.0, %v1460_v58  ;;  %v2926_v58 = vld [vmem:[#allocation4 + $0x20] sm:$0xff] }
 0x199   :  { %v2481_v59 = vpop.f32.mrf.mxu1  ;;  %v143_v5 = vsub.f32 %v137_v62, %v2890_v4  ;;  %v318_v62 = vld [vmem:[#allocation4 + $0x48] sm:$0xff] }
 0x19a   :  { %v2930_v59 = vld [vmem:[#allocation4 + $0x30] sm:$0xff] }
 0x19b   :  { %v2894_v7 = vand.u32 2147483647, %v143_v5  ;;  %v321_v5 = vld [vmem:[#allocation4 + $0x60] sm:$0xff] }
 0x19c   :  { %v1470_v39 = vpop.permute.xlu0 %1469 }
 0x19d   :  { %4489 = vst [vmem:[#allocation20_spill] sm:$0xff] %v2894_v7  ;;  %v292_v10 = vmul.f32 2.0, %v2894_v7 }
 0x19e   :  { %v2550_v60 = vpop.eup %2549 }
 0x19f   :  { %v112_v61 = vmul.f32 %v2550_v60, %v2548_v45  ;;  %v2552_v63 = vpop.eup %2551  ;;  %v316_v60 = vld [vmem:[#allocation4 + $0x38] sm:$0xff] }
 0x1a0   :  { %v1288_v6 = vmul.f32 %v2552_v63, %v2546_v43  ;;  %v320_v63 = vld [vmem:[#allocation4 + $0x58] sm:$0xff] }
 0x1a1   :  { %125 = vperm.xlu1 %2522, %v112_v61  }
 0x1a5   :  { %2523 = vset.pattern.permute.xlu1 %v2716_v19 }
 0x1a6   :  { %129 = vperm.xlu1 %2523, %v112_v61  }
 0x1aa   :  { %2524 = vset.pattern.permute.xlu1 %v4382_v11 }
 0x1ab   :  { %1301 = vperm.xlu1 %2524, %v1288_v6  }
 0x1af   :  { %2525 = vset.pattern.permute.xlu1 %v2716_v19 }
 0x1b0   :  { %1305 = vperm.xlu1 %2525, %v1288_v6   ;;  %v322_v6 = vld [vmem:[#allocation4 + $0x68] sm:$0xff] }
 0x1b4   :  { %294 = vrot.lane.b32.xlu1 %v292_v10, %s2718_s18 }
 0x1b5   :  { %2526 = vset.pattern.permute.xlu1 %v4382_v11 }
 0x1b8   :  { %300 = vrot.lane.b32.xlu1 %v298_v13, %s2719_s19 }
 0x1bc   :  { %305 = vrot.lane.b32.xlu1 %v2890_v4, %s2720_s20 }
 0x1ff   :  { %v1476_v46 = vpop.permute.xlu0 %1475 }
 0x203   :  { %v1481_v3 = vpop.permute.xlu0 %1480 }
 0x21c   :  { %v126_v14 = vpop.permute.xlu1 %125 }
 0x221   :  { %v130_v22 = vpop.permute.xlu1 %129 }
 0x222   :  { %v132_v29 = vsel %vm122_vm13, %v126_v14, %v130_v22 }
 0x223   :  { %v133_v30 = vsub.f32 0.0, %v132_v29 }
 0x225   :  { %v289_v28 = vmul.f32 3.0, %v133_v30 }
 0x226   :  { %v1302_v27 = vpop.permute.xlu1 %1301 }
 0x227   :  { %v291_v42 = vadd.f32 %v290_v25, %v289_v28 }
 0x22b   :  { %v1306_v31 = vpop.permute.xlu1 %1305 }
 0x22c   :  { %v1308_v32 = vsel %vm1298_vm14, %v1302_v27, %v1306_v31 }
 0x22d   :  { %v1309_v23 = vsub.f32 0.0, %v1308_v32 }
 0x22f   :  { %v1464_v35 = vmul.f32 3.0, %v1309_v23  ;;  %v295_v37 = vpop.permute.xlu1 %294 }
 0x230   :  { %v297_v44 = vadd.f32 %v295_v37, %v291_v42 }
 0x231   :  { %v1466_v40 = vadd.f32 %v1465_v34, %v1464_v35 }
 0x233   :  { %v301_v43 = vpop.permute.xlu1 %300  ;;  %v1472_v45 = vadd.f32 %v1470_v39, %v1466_v40 }
 0x234   :  { %v303_v15 = vadd.f32 %v301_v43, %v297_v44 }
 0x235   :  { %v1478_v48 = vadd.f32 %v1476_v46, %v1472_v45 }
 0x237   :  { %v306_v47 = vpop.permute.xlu1 %305  ;;  %v1483_v52 = vmul.f32 %v1481_v3, %v1478_v48 }
 0x238   :  { %v308_v50 = vmul.f32 %v306_v47, %v303_v15 }
 0x23a   :  { %458 = vperm.xlu0 %2527, %v308_v50   ;;  %325 = vperm.xlu1 %2526, %v308_v50  }
 0x23e   :  { %2529 = vset.pattern.permute.xlu0 %v2707_v0  ;;  %1486 = vperm.xlu1 %2526, %v1483_v52  }
 0x23f   :  { %590 = vperm.xlu0 %2529, %v308_v50  }
 0x242   :  { %2528 = vset.pattern.permute.xlu1 %v2716_v19  ;;  %v2928_v19 = vld [vmem:[#allocation4 + $0x28] sm:$0xff] }
 0x243   :  { %2532 = vset.pattern.permute.xlu0 %v2708_v1  ;;  %1603 = vperm.xlu1 %2528, %v1483_v52  }
 0x244   :  { %1837 = vperm.xlu0 %2532, %v1483_v52  }
 0x247   :  { %2530 = vset.pattern.permute.xlu1 %v2707_v0  ;;  %v317_v0 = vld [vmem:[#allocation4 + $0x40] sm:$0xff] }
 0x248   :  { %1720 = vperm.xlu1 %2530, %v1483_v52  }
 0x24c   :  { %2531 = vset.pattern.permute.xlu1 %v2708_v1  ;;  %v319_v1 = vld [vmem:[#allocation4 + $0x50] sm:$0xff] }
 0x24d   :  { %722 = vperm.xlu1 %2531, %v308_v50  }
 0x2b5   :  { %v326_v61 = vpop.permute.xlu1 %325 }
 0x2b6   :  { %v328_v9 = vmul.f32 %v326_v61, %v2918_v53  ;;  %v329_v10 = vmul.f32 %v326_v61, %v2920_v55  ;;  %v330_v13 = vmul.f32 %v326_v61, %v2922_v56  ;;  %v331_v14 = vmul.f32 %v326_v61, %v2924_v57 }
 0x2b7   :  { %v332_v16 = vmul.f32 %v326_v61, %v2926_v58  ;;  %v333_v18 = vmul.f32 %v326_v61, %v2928_v19  ;;  %v334_v22 = vmul.f32 %v326_v61, %v2930_v59  ;;  %v335_v24 = vmul.f32 %v326_v61, %v316_v60 }
 0x2b8   :  { %v2939_v26 = vmul.f32 %v326_v61, %v317_v0  ;;  %v2941_v27 = vmul.f32 %v326_v61, %v318_v62  ;;  %v2943_v29 = vmul.f32 %v326_v61, %v319_v1  ;;  %v2945_v30 = vmul.f32 %v326_v61, %v320_v63 }
 0x2b9   :  { %v2947_v31 = vmul.f32 %v326_v61, %v321_v5  ;;  %v341_v32 = vmul.f32 %v326_v61, %v322_v6  ;;  %v342_v23 = vrot.slane %v328_v9, 4  ;;  %v348_v28 = vrot.slane %v329_v10, 4 }
 0x2ba   :  { %v354_v34 = vrot.slane %v330_v13, 4  ;;  %v360_v35 = vrot.slane %v331_v14, 4  ;;  %v366_v37 = vrot.slane %v332_v16, 4  ;;  %v372_v25 = vrot.slane %v333_v18, 4 }
 0x2bb   :  { %v343_v39 = vadd.f32 %v342_v23, %v328_v9  ;;  %v349_v40 = vadd.f32 %v348_v28, %v329_v10  ;;  %v378_v42 = vrot.slane %v334_v22, 4  ;;  %v384_v43 = vrot.slane %v335_v24, 4 }
 0x2bc   :  { %v355_v44 = vadd.f32 %v354_v34, %v330_v13  ;;  %v361_v45 = vadd.f32 %v360_v35, %v331_v14  ;;  %v367_v46 = vadd.f32 %v366_v37, %v332_v16  ;;  %v373_v15 = vadd.f32 %v372_v25, %v333_v18 }
 0x2bd   :  { %v344_v47 = vrot.slane %v343_v39, 2  ;;  %v350_v48 = vrot.slane %v349_v40, 2  ;;  %v379_v50 = vadd.f32 %v378_v42, %v334_v22  ;;  %v385_v3 = vadd.f32 %v384_v43, %v335_v24 }
 0x2be   :  { %v356_v52 = vrot.slane %v355_v44, 2  ;;  %v362_v60 = vrot.slane %v361_v45, 2  ;;  %v368_v0 = vrot.slane %v367_v46, 2  ;;  %v374_v61 = vrot.slane %v373_v15, 2 }
 0x2bf   :  { %v345_v62 = vadd.f32 %v344_v47, %v343_v39  ;;  %v351_v1 = vadd.f32 %v350_v48, %v349_v40  ;;  %v380_v63 = vrot.slane %v379_v50, 2  ;;  %v386_v5 = vrot.slane %v385_v3, 2  ;;  %v443_v48 = vld [vmem:[#allocation4 + $0x70] sm:$0xff] }
 0x2c0   :  { %v357_v6 = vadd.f32 %v356_v52, %v355_v44  ;;  %v363_v9 = vadd.f32 %v362_v60, %v361_v45  ;;  %v369_v10 = vadd.f32 %v368_v0, %v367_v46  ;;  %v375_v23 = vadd.f32 %v374_v61, %v373_v15  ;;  %v2959_v44 = vpop.permute.xlu0 %458  ;;  %v444_v0 = vld [vmem:[#allocation4 + $0x78] sm:$0xff] }
 0x2c1   :  { %v346_v13 = vrot.slane %v345_v62, 1  ;;  %v352_v14 = vrot.slane %v351_v1, 1  ;;  %v381_v16 = vadd.f32 %v380_v63, %v379_v50  ;;  %v387_v18 = vadd.f32 %v386_v5, %v385_v3  ;;  %v445_v5 = vld [vmem:[#allocation4 + $0x80] sm:$0xff] }
 0x2c2   :  { %v358_v28 = vrot.slane %v357_v6, 1  ;;  %v364_v34 = vrot.slane %v363_v9, 1  ;;  %v370_v22 = vrot.slane %v369_v10, 1  ;;  %v376_v24 = vrot.slane %v375_v23, 1 }
 0x2c3   :  { %v2949_v35 = vadd.f32 %v346_v13, %v345_v62  ;;  %v382_v37 = vrot.slane %v381_v16, 1  ;;  %v388_v25 = vrot.slane %v387_v18, 1  ;;  %v2951_v39 = vadd.f32 %v352_v14, %v351_v1 }
 0x2c4   :  { %v2953_v40 = vadd.f32 %v358_v28, %v357_v6  ;;  %v2955_v42 = vadd.f32 %v364_v34, %v363_v9  ;;  %v2957_v43 = vadd.f32 %v370_v22, %v369_v10  ;;  %v2961_v45 = vadd.f32 %v376_v24, %v375_v23  ;;  %v446_v23 = vld [vmem:[#allocation4 + $0x88] sm:$0xff]  ;;  %v2980_v22 = vld [vmem:[#allocation4 + $0x98] sm:$0xff] }
 0x2c5   :  { %v2963_v46 = vadd.f32 %v382_v37, %v381_v16  ;;  %v390_v15 = vrot.slane %v2939_v26, 4  ;;  %v396_v47 = vrot.slane %v2941_v27, 4  ;;  %v402_v50 = vrot.slane %v2943_v29, 4  ;;  %4491 = vst [vmem:[#allocation22_spill] sm:$0xff] %v2980_v22 }
 0x2c6   :  { %v408_v3 = vrot.slane %v2945_v30, 4  ;;  %v414_v52 = vrot.slane %v2947_v31, 4  ;;  %v421_v60 = vsel %vm420_vm15, %v341_v32, 0.0  ;;  %v2971_v61 = vadd.f32 %v388_v25, %v387_v18  ;;  %v447_v18 = vld [vmem:[#allocation4 + $0x90] sm:$0xff] }
 0x2c7   :  { %v391_v62 = vadd.f32 %v390_v15, %v2939_v26  ;;  %v397_v1 = vadd.f32 %v396_v47, %v2941_v27  ;;  %v422_v63 = vrot.slane %v421_v60, 4  ;;  %v403_v6 = vadd.f32 %v402_v50, %v2943_v29  ;;  %v2986_v50 = vld [vmem:[#allocation4 + $0xa8] sm:$0xff] }
 0x2c8   :  { %v409_v9 = vadd.f32 %v408_v3, %v2945_v30  ;;  %v415_v10 = vadd.f32 %v414_v52, %v2947_v31  ;;  %v461_v13 = vmul.f32 %v2959_v44, %v443_v48  ;;  %v462_v28 = vmul.f32 %v2959_v44, %v444_v0  ;;  %v2983_v31 = vld [vmem:[#allocation4 + $0xa0] sm:$0xff]  ;;  %4493 = vst [vmem:[#allocation24_spill] sm:$0xff] %v2986_v50 }
 0x2c9   :  { %v392_v14 = vrot.slane %v391_v62, 2  ;;  %v398_v32 = vrot.slane %v397_v1, 2  ;;  %v423_v16 = vadd.f32 %v422_v63, %v421_v60  ;;  %v404_v26 = vrot.slane %v403_v6, 2  ;;  %4492 = vst [vmem:[#allocation23_spill] sm:$0xff] %v2983_v31  ;;  %v2991_v63 = vld [vmem:[#allocation4 + $0xb0] sm:$0xff] }
 0x2ca   :  { %v410_v34 = vrot.slane %v409_v9, 2  ;;  %v416_v27 = vrot.slane %v415_v10, 2  ;;  %v463_v29 = vmul.f32 %v2959_v44, %v445_v5  ;;  %v464_v25 = vmul.f32 %v2959_v44, %v446_v23  ;;  %4494 = vst [vmem:[#allocation25_spill] sm:$0xff] %v2991_v63 }
 0x2cb   :  { %v393_v24 = vadd.f32 %v392_v14, %v391_v62  ;;  %v399_v30 = vadd.f32 %v398_v32, %v397_v1  ;;  %v424_v37 = vrot.slane %v423_v16, 2  ;;  %v405_v15 = vadd.f32 %v404_v26, %v403_v6  ;;  %v2993_v62 = vld [vmem:[#allocation4 + $0xb8] sm:$0xff]  ;;  %v3001_v14 = vld [vmem:[#allocation4 + $0xd0] sm:$0xff] }
 0x2cc   :  { %v411_v47 = vadd.f32 %v410_v34, %v409_v9  ;;  %v417_v48 = vadd.f32 %v416_v27, %v415_v10  ;;  %v465_v3 = vmul.f32 %v2959_v44, %v447_v18  ;;  %4495 = vst [vmem:[#allocation26_spill] sm:$0xff] %v2993_v62  ;;  %v466_v1 = vmul.f32 %v2959_v44, %v2980_v22  ;;  %v2997_v9 = vld [vmem:[#allocation4 + $0xc0] sm:$0xff]  ;;  %v2999_v10 = vld [vmem:[#allocation4 + $0xc8] sm:$0xff]  ;;  %v456_v34 = vld [vmem:[#allocation4 + $0xd8] sm:$0xff] }
 0x2cd   :  { %v394_v52 = vrot.slane %v393_v24, 1  ;;  %v400_v60 = vrot.slane %v399_v30, 1  ;;  %v2989_v0 = vadd.f32 %v424_v37, %v423_v16  ;;  %v406_v5 = vrot.slane %v405_v15, 1  ;;  %4496 = vst [vmem:[#allocation27_spill] sm:$0xff] %v2997_v9  ;;  %4497 = vst [vmem:[#allocation28_spill] sm:$0xff] %v2999_v10 }
 0x2ce   :  { %v412_v23 = vrot.slane %v411_v47, 1  ;;  %v418_v6 = vrot.slane %v417_v48, 1  ;;  %4498 = vst [vmem:[#allocation29_spill] sm:$0xff] %v3001_v14  ;;  %v467_v32 = vmul.f32 %v2959_v44, %v2983_v31  ;;  %v468_v27 = vmul.f32 %v2959_v44, %v2986_v50 }
 0x2cf   :  { %v3005_v16 = vadd.f32 %v394_v52, %v393_v24  ;;  %v3007_v18 = vadd.f32 %v400_v60, %v399_v30  ;;  %v426_v26 = vrot.slane %v2989_v0, 1  ;;  %v3012_v37 = vadd.f32 %v406_v5, %v405_v15 }
 0x2d0   :  { %v3014_v11 = vadd.f32 %v412_v23, %v411_v47  ;;  %v3016_v8 = vadd.f32 %v418_v6, %v417_v48  ;;  %v469_v20 = vmul.f32 %v2959_v44, %v2991_v63  ;;  %v470_v24 = vmul.f32 %v2959_v44, %v2993_v62 }
 0x2d1   :  { %v471_v30 = vmul.f32 %v2959_v44, %v2997_v9  ;;  %v472_v52 = vmul.f32 %v2959_v44, %v2999_v10  ;;  %v473_v15 = vmul.f32 %v2959_v44, %v3001_v14  ;;  %v474_v47 = vmul.f32 %v2959_v44, %v456_v34 }
 0x2d2   :  { %v475_v60 = vrot.slane %v461_v13, 4  ;;  %v481_v48 = vrot.slane %v462_v28, 4  ;;  %v487_v5 = vrot.slane %v463_v29, 4  ;;  %v493_v23 = vrot.slane %v464_v25, 4 }
 0x2d3   :  { %v499_v6 = vrot.slane %v465_v3, 4  ;;  %v505_v36 = vrot.slane %v466_v1, 4  ;;  %v511_v33 = vrot.slane %v467_v32, 4  ;;  %v517_v17 = vrot.slane %v468_v27, 4 }
 0x2d4   :  { %v476_v54 = vadd.f32 %v475_v60, %v461_v13  ;;  %v482_v49 = vadd.f32 %v481_v48, %v462_v28  ;;  %v488_v38 = vadd.f32 %v487_v5, %v463_v29  ;;  %v494_v51 = vadd.f32 %v493_v23, %v464_v25 }
 0x2d5   :  { %v500_v4 = vadd.f32 %v499_v6, %v465_v3  ;;  %v506_v21 = vadd.f32 %v505_v36, %v466_v1  ;;  %v512_v7 = vadd.f32 %v511_v33, %v467_v32  ;;  %v518_v14 = vadd.f32 %v517_v17, %v468_v27 }
 0x2d6   :  { %v477_v41 = vrot.slane %v476_v54, 2  ;;  %v483_v2 = vrot.slane %v482_v49, 2  ;;  %v489_v12 = vrot.slane %v488_v38, 2  ;;  %v495_v44 = vrot.slane %v494_v51, 2 }
 0x2d7   :  { %v501_v34 = vrot.slane %v500_v4, 2  ;;  %v507_v10 = vrot.slane %v506_v21, 2  ;;  %v513_v9 = vrot.slane %v512_v7, 2  ;;  %v519_v31 = vrot.slane %v518_v14, 2 }
 0x2d8   :  { %v478_v62 = vadd.f32 %v477_v41, %v476_v54  ;;  %v484_v63 = vadd.f32 %v483_v2, %v482_v49  ;;  %v490_v50 = vadd.f32 %v489_v12, %v488_v38  ;;  %v496_v13 = vadd.f32 %v495_v44, %v494_v51 }
 0x2d9   :  { %v502_v28 = vadd.f32 %v501_v34, %v500_v4  ;;  %v508_v29 = vadd.f32 %v507_v10, %v506_v21  ;;  %v514_v60 = vadd.f32 %v513_v9, %v512_v7  ;;  %v520_v33 = vadd.f32 %v519_v31, %v518_v14 }
 0x2da   :  { %v479_v25 = vrot.slane %v478_v62, 1  ;;  %v485_v3 = vrot.slane %v484_v63, 1  ;;  %v491_v36 = vrot.slane %v490_v50, 1  ;;  %v497_v1 = vrot.slane %v496_v13, 1 }
 0x2db   :  { %v503_v32 = vrot.slane %v502_v28, 1  ;;  %v509_v48 = vrot.slane %v508_v29, 1  ;;  %v515_v17 = vrot.slane %v514_v60, 1  ;;  %v3030_v27 = vadd.f32 %v426_v26, %v2989_v0 }
 0x2dc   :  { %v480_v5 = vadd.f32 %v479_v25, %v478_v62  ;;  %v486_v41 = vadd.f32 %v485_v3, %v484_v63  ;;  %v521_v49 = vrot.slane %v520_v33, 1  ;;  %v492_v38 = vadd.f32 %v491_v36, %v490_v50 }
 0x2dd   :  { %v498_v54 = vadd.f32 %v497_v1, %v496_v13  ;;  %v504_v51 = vadd.f32 %v503_v32, %v502_v28  ;;  %v510_v2 = vadd.f32 %v509_v48, %v508_v29  ;;  %v516_v21 = vadd.f32 %v515_v17, %v514_v60  ;;  %v3051_v17 = vld [vmem:[#allocation4 + $0xe0] sm:$0xff] }
 0x2de   :  { %v523_v4 = vrot.slane %v469_v20, 4  ;;  %v529_v7 = vrot.slane %v470_v24, 4  ;;  %v535_v12 = vrot.slane %v471_v30, 4  ;;  %v522_v9 = vadd.f32 %v521_v49, %v520_v33  ;;  %v591_v33 = vpop.permute.xlu0 %590  ;;  %4499 = vst [vmem:[#allocation30_spill] sm:$0xff] %v3051_v17 }
 0x2df   :  { %v541_v31 = vrot.slane %v472_v52, 4  ;;  %v547_v10 = vrot.slane %v473_v15, 4  ;;  %v553_v14 = vsel %vm420_vm15, %v474_v47, 0.0  ;;  %v3034_v50 = vadd.f32 %v480_v5, %v2949_v35 }
 0x2e0   :  { %v524_v23 = vadd.f32 %v523_v4, %v469_v20  ;;  %v530_v6 = vadd.f32 %v529_v7, %v470_v24  ;;  %v536_v0 = vadd.f32 %v535_v12, %v471_v30  ;;  %v554_v26 = vrot.slane %v553_v14, 4  ;;  %v3063_v4 = vld [vmem:[#allocation4 + $0xf8] sm:$0xff]  ;;  %v3065_v7 = vld [vmem:[#allocation4 + $0x100] sm:$0xff]  ;;  %v3067_v12 = vld [vmem:[#allocation4 + $0x108] sm:$0xff] }
 0x2e1   :  { %v542_v62 = vadd.f32 %v541_v31, %v472_v52  ;;  %v548_v63 = vadd.f32 %v547_v10, %v473_v15  ;;  %v3037_v44 = vadd.f32 %v486_v41, %v2951_v39  ;;  %v3040_v47 = vadd.f32 %v492_v38, %v2953_v40  ;;  %v3061_v38 = vld [vmem:[#allocation4 + $0xf0] sm:$0xff]  ;;  %4502 = vst [vmem:[#allocation33_spill] sm:$0xff] %v3063_v4 }
 0x2e2   :  { %v525_v34 = vrot.slane %v524_v23, 2  ;;  %v531_v13 = vrot.slane %v530_v6, 2  ;;  %v537_v28 = vrot.slane %v536_v0, 2  ;;  %v555_v29 = vadd.f32 %v554_v26, %v553_v14  ;;  %4501 = vst [vmem:[#allocation32_spill] sm:$0xff] %v3061_v38  ;;  %4503 = vst [vmem:[#allocation34_spill] sm:$0xff] %v3065_v7  ;;  %v3069_v14 = vld [vmem:[#allocation4 + $0x110] sm:$0xff] }
 0x2e3   :  { %v543_v60 = vrot.slane %v542_v62, 2  ;;  %v549_v25 = vrot.slane %v548_v63, 2  ;;  %v3043_v20 = vadd.f32 %v498_v54, %v2955_v42  ;;  %v3046_v39 = vadd.f32 %v504_v51, %v2957_v43  ;;  %v3053_v42 = vld [vmem:[#allocation4 + $0xe8] sm:$0xff]  ;;  %4504 = vst [vmem:[#allocation35_spill] sm:$0xff] %v3067_v12  ;;  %4505 = vst [vmem:[#allocation36_spill] sm:$0xff] %v3069_v14 }
 0x2e4   :  { %v526_v24 = vadd.f32 %v525_v34, %v524_v23  ;;  %v532_v30 = vadd.f32 %v531_v13, %v530_v6  ;;  %v538_v52 = vadd.f32 %v537_v28, %v536_v0  ;;  %v556_v35 = vrot.slane %v555_v29, 2  ;;  %4500 = vst [vmem:[#allocation31_spill] sm:$0xff] %v3053_v42  ;;  %v3085_v26 = vld [vmem:[#allocation4 + $0x128] sm:$0xff] }
 0x2e5   :  { %v544_v15 = vadd.f32 %v543_v60, %v542_v62  ;;  %v550_v3 = vadd.f32 %v549_v25, %v548_v63  ;;  %v3049_v36 = vadd.f32 %v510_v2, %v2961_v45  ;;  %v3056_v49 = vadd.f32 %v516_v21, %v2963_v46  ;;  %v3071_v46 = vld [vmem:[#allocation4 + $0x118] sm:$0xff]  ;;  %4508 = vst [vmem:[#allocation39_spill] sm:$0xff] %v3085_v26  ;;  %v3087_v62 = vld [vmem:[#allocation4 + $0x130] sm:$0xff] }
 0x2e6   :  { %v527_v1 = vrot.slane %v526_v24, 1  ;;  %v533_v32 = vrot.slane %v532_v30, 1  ;;  %v539_v40 = vrot.slane %v538_v52, 1  ;;  %v557_v48 = vadd.f32 %v556_v35, %v555_v29  ;;  %4506 = vst [vmem:[#allocation37_spill] sm:$0xff] %v3071_v46  ;;  %4509 = vst [vmem:[#allocation40_spill] sm:$0xff] %v3087_v62  ;;  %v3089_v63 = vld [vmem:[#allocation4 + $0x138] sm:$0xff] }
 0x2e7   :  { %v545_v5 = vrot.slane %v544_v15, 1  ;;  %v551_v41 = vrot.slane %v550_v3, 1  ;;  %v3059_v43 = vadd.f32 %v522_v9, %v2971_v61  ;;  %v3073_v61 = vld [vmem:[#allocation4 + $0x120] sm:$0xff]  ;;  %v593_v21 = vmul.f32 %v591_v33, %v3051_v17  ;;  %4510 = vst [vmem:[#allocation41_spill] sm:$0xff] %v3089_v63 }
 0x2e8   :  { %v528_v45 = vadd.f32 %v527_v1, %v526_v24  ;;  %v534_v54 = vadd.f32 %v533_v32, %v532_v30  ;;  %v540_v51 = vadd.f32 %v539_v40, %v538_v52  ;;  %v558_v2 = vrot.slane %v557_v48, 1  ;;  %4507 = vst [vmem:[#allocation38_spill] sm:$0xff] %v3073_v61  ;;  %v3098_v29 = vld [vmem:[#allocation4 + $0x140] sm:$0xff] }
 0x2e9   :  { %v546_v31 = vadd.f32 %v545_v5, %v544_v15  ;;  %v552_v10 = vadd.f32 %v551_v41, %v550_v3  ;;  %v594_v9 = vmul.f32 %v591_v33, %v3053_v42  ;;  %v595_v34 = vmul.f32 %v591_v33, %v3061_v38  ;;  %4511 = vst [vmem:[#allocation42_spill] sm:$0xff] %v3098_v29 }
 0x2ea   :  { %v3077_v23 = vadd.f32 %v558_v2, %v557_v48  ;;  %v3080_v6 = vadd.f32 %v528_v45, %v3005_v16  ;;  %v3083_v0 = vadd.f32 %v534_v54, %v3007_v18  ;;  %v3093_v13 = vadd.f32 %v540_v51, %v3012_v37  ;;  %v588_v16 = vld [vmem:[#allocation4 + $0x148] sm:$0xff]  ;;  %v3123_v45 = vpop.permute.xlu1 %1486 }
 0x2eb   :  { %v3096_v28 = vadd.f32 %v546_v31, %v3014_v11  ;;  %v596_v18 = vmul.f32 %v591_v33, %v3063_v4  ;;  %v597_v60 = vmul.f32 %v591_v33, %v3065_v7  ;;  %v3103_v25 = vadd.f32 %v552_v10, %v3016_v8 }
 0x2ec   :  { %v598_v24 = vmul.f32 %v591_v33, %v3067_v12  ;;  %v599_v30 = vmul.f32 %v591_v33, %v3069_v14  ;;  %v600_v37 = vmul.f32 %v591_v33, %v3071_v46  ;;  %v3109_v52 = vmul.f32 %v591_v33, %v3073_v61 }
 0x2ed   :  { %v3112_v11 = vmul.f32 %v591_v33, %v3085_v26  ;;  %v3115_v35 = vmul.f32 %v591_v33, %v3087_v62  ;;  %v3118_v15 = vmul.f32 %v591_v33, %v3089_v63  ;;  %v3121_v8 = vmul.f32 %v591_v33, %v3098_v29 }
 0x2ee   :  { %v606_v3 = vmul.f32 %v591_v33, %v588_v16  ;;  %v607_v1 = vrot.slane %v593_v21, 4  ;;  %v613_v32 = vrot.slane %v594_v9, 4  ;;  %v619_v40 = vrot.slane %v595_v34, 4 }
 0x2ef   :  { %v625_v48 = vrot.slane %v596_v18, 4  ;;  %v631_v5 = vrot.slane %v597_v60, 4  ;;  %v637_v41 = vrot.slane %v598_v24, 4  ;;  %v643_v2 = vrot.slane %v599_v30, 4 }
 0x2f0   :  { %v608_v54 = vadd.f32 %v607_v1, %v593_v21  ;;  %v614_v51 = vadd.f32 %v613_v32, %v594_v9  ;;  %v649_v31 = vrot.slane %v600_v37, 4  ;;  %v620_v10 = vadd.f32 %v619_v40, %v595_v34  ;;  %v3125_v34 = vpop.permute.xlu1 %1603 }
 0x2f1   :  { %v626_v62 = vadd.f32 %v625_v48, %v596_v18  ;;  %v632_v63 = vadd.f32 %v631_v5, %v597_v60  ;;  %v638_v26 = vadd.f32 %v637_v41, %v598_v24  ;;  %v644_v46 = vadd.f32 %v643_v2, %v599_v30  ;;  %4512 = vst [vmem:[#allocation43_spill] sm:$0xff] %v3125_v34 }
 0x2f2   :  { %v609_v61 = vrot.slane %v608_v54, 2  ;;  %v615_v29 = vrot.slane %v614_v51, 2  ;;  %v650_v33 = vadd.f32 %v649_v31, %v600_v37  ;;  %v621_v16 = vrot.slane %v620_v10, 2 }
 0x2f3   :  { %v627_v14 = vrot.slane %v626_v62, 2  ;;  %v633_v12 = vrot.slane %v632_v63, 2  ;;  %v639_v7 = vrot.slane %v638_v26, 2  ;;  %v645_v42 = vrot.slane %v644_v46, 2 }
 0x2f4   :  { %v610_v4 = vadd.f32 %v609_v61, %v608_v54  ;;  %v616_v38 = vadd.f32 %v615_v29, %v614_v51  ;;  %v651_v17 = vrot.slane %v650_v33, 2  ;;  %v622_v21 = vadd.f32 %v621_v16, %v620_v10 }
 0x2f5   :  { %v628_v9 = vadd.f32 %v627_v14, %v626_v62  ;;  %v634_v1 = vadd.f32 %v633_v12, %v632_v63  ;;  %v640_v32 = vadd.f32 %v639_v7, %v638_v26  ;;  %v646_v24 = vadd.f32 %v645_v42, %v644_v46 }
 0x2f6   :  { %v611_v18 = vrot.slane %v610_v4, 1  ;;  %v617_v60 = vrot.slane %v616_v38, 1  ;;  %v652_v40 = vadd.f32 %v651_v17, %v650_v33  ;;  %v623_v30 = vrot.slane %v622_v21, 1 }
 0x2f7   :  { %v629_v37 = vrot.slane %v628_v9, 1  ;;  %v635_v48 = vrot.slane %v634_v1, 1  ;;  %v641_v5 = vrot.slane %v640_v32, 1  ;;  %v3129_v61 = vadd.f32 %v3077_v23, %v3030_v27  ;;  %v3137_v23 = vpop.permute.xlu1 %1720 }
 0x2f8   :  { %v612_v29 = vadd.f32 %v611_v18, %v610_v4  ;;  %v647_v41 = vrot.slane %v646_v24, 1  ;;  %v653_v54 = vrot.slane %v652_v40, 1  ;;  %v618_v14 = vadd.f32 %v617_v60, %v616_v38  ;;  %4513 = vst [vmem:[#allocation44_spill] sm:$0xff] %v3137_v23 }
 0x2f9   :  { %v624_v12 = vadd.f32 %v623_v30, %v622_v21  ;;  %v630_v7 = vadd.f32 %v629_v37, %v628_v9  ;;  %v636_v26 = vadd.f32 %v635_v48, %v634_v1  ;;  %v642_v62 = vadd.f32 %v641_v5, %v640_v32 }
 0x2fa   :  { %v648_v63 = vadd.f32 %v647_v41, %v646_v24  ;;  %v655_v42 = vrot.slane %v3109_v52, 4  ;;  %v661_v17 = vrot.slane %v3112_v11, 4  ;;  %v667_v46 = vrot.slane %v3115_v35, 4 }
 0x2fb   :  { %v673_v51 = vrot.slane %v3118_v15, 4  ;;  %v679_v27 = vrot.slane %v3121_v8, 4  ;;  %v685_v4 = vsel %vm420_vm15, %v606_v3, 0.0  ;;  %v654_v38 = vadd.f32 %v653_v54, %v652_v40 }
 0x2fc   :  { %v656_v2 = vadd.f32 %v655_v42, %v3109_v52  ;;  %v662_v31 = vadd.f32 %v661_v17, %v3112_v11  ;;  %v686_v10 = vrot.slane %v685_v4, 4  ;;  %v668_v33 = vadd.f32 %v667_v46, %v3115_v35 }
 0x2fd   :  { %v674_v16 = vadd.f32 %v673_v51, %v3118_v15  ;;  %v680_v21 = vadd.f32 %v679_v27, %v3121_v8  ;;  %v3145_v9 = vadd.f32 %v612_v29, %v3034_v50  ;;  %v3148_v18 = vadd.f32 %v618_v14, %v3037_v44  ;;  %v723_v44 = vpop.permute.xlu1 %722 }
 0x2fe   :  { %v657_v1 = vrot.slane %v656_v2, 2  ;;  %v663_v32 = vrot.slane %v662_v31, 2  ;;  %v687_v3 = vadd.f32 %v686_v10, %v685_v4  ;;  %v669_v60 = vrot.slane %v668_v33, 2  ;;  %v3170_v4 = vld [vmem:[#allocation4 + $0x158] sm:$0xff] }
 0x2ff   :  { %v675_v52 = vrot.slane %v674_v16, 2  ;;  %v681_v24 = vrot.slane %v680_v21, 2  ;;  %v3151_v11 = vadd.f32 %v624_v12, %v3040_v47  ;;  %v3154_v8 = vadd.f32 %v630_v7, %v3043_v20  ;;  %4515 = vst [vmem:[#allocation46_spill] sm:$0xff] %v3170_v4 }
 0x300   :  { %v658_v35 = vadd.f32 %v657_v1, %v656_v2  ;;  %v664_v40 = vadd.f32 %v663_v32, %v662_v31  ;;  %v688_v15 = vrot.slane %v687_v3, 2  ;;  %v670_v50 = vadd.f32 %v669_v60, %v668_v33  ;;  %v3181_v2 = vld [vmem:[#allocation4 + $0x160] sm:$0xff] }
 0x301   :  { %v676_v30 = vadd.f32 %v675_v52, %v674_v16  ;;  %v682_v37 = vadd.f32 %v681_v24, %v680_v21  ;;  %v3157_v48 = vadd.f32 %v636_v26, %v3046_v39  ;;  %v3160_v54 = vadd.f32 %v642_v62, %v3049_v36  ;;  %v3168_v39 = vld [vmem:[#allocation4 + $0x150] sm:$0xff]  ;;  %4516 = vst [vmem:[#allocation47_spill] sm:$0xff] %v3181_v2  ;;  %v3194_v16 = vld [vmem:[#allocation4 + $0x178] sm:$0xff]  ;;  %v3209_v60 = vld [vmem:[#allocation4 + $0x1a0] sm:$0xff] }
 0x302   :  { %v659_v5 = vrot.slane %v658_v35, 1  ;;  %v665_v29 = vrot.slane %v664_v40, 1  ;;  %v689_v41 = vadd.f32 %v688_v15, %v687_v3  ;;  %v671_v47 = vrot.slane %v670_v50, 1  ;;  %4514 = vst [vmem:[#allocation45_spill] sm:$0xff] %v3168_v39  ;;  %4519 = vst [vmem:[#allocation50_spill] sm:$0xff] %v3194_v16  ;;  %v3205_v3 = vld [vmem:[#allocation4 + $0x190] sm:$0xff] }
 0x303   :  { %v677_v14 = vrot.slane %v676_v30, 1  ;;  %v683_v12 = vrot.slane %v682_v37, 1  ;;  %v3163_v42 = vadd.f32 %v648_v63, %v3056_v49  ;;  %v3166_v46 = vadd.f32 %v654_v38, %v3059_v43  ;;  %v3183_v43 = vld [vmem:[#allocation4 + $0x168] sm:$0xff]  ;;  %v3185_v38 = vld [vmem:[#allocation4 + $0x170] sm:$0xff]  ;;  %4522 = vst [vmem:[#allocation53_spill] sm:$0xff] %v3205_v3  ;;  %4524 = vst [vmem:[#allocation55_spill] sm:$0xff] %v3209_v60 }
 0x304   :  { %v660_v20 = vadd.f32 %v659_v5, %v658_v35  ;;  %v666_v7 = vadd.f32 %v665_v29, %v664_v40  ;;  %v690_v17 = vrot.slane %v689_v41, 1  ;;  %v672_v26 = vadd.f32 %v671_v47, %v670_v50  ;;  %4517 = vst [vmem:[#allocation48_spill] sm:$0xff] %v3183_v43  ;;  %4518 = vst [vmem:[#allocation49_spill] sm:$0xff] %v3185_v38  ;;  %v3214_v35 = vld [vmem:[#allocation4 + $0x1a8] sm:$0xff]  ;;  %v3216_v40 = vld [vmem:[#allocation4 + $0x1b0] sm:$0xff] }
 0x305   :  { %v678_v51 = vadd.f32 %v677_v14, %v676_v30  ;;  %v684_v27 = vadd.f32 %v683_v12, %v682_v37  ;;  %v725_v36 = vmul.f32 %v723_v44, %v3168_v39  ;;  %v726_v31 = vmul.f32 %v723_v44, %v3170_v4  ;;  %4525 = vst [vmem:[#allocation56_spill] sm:$0xff] %v3214_v35  ;;  %v3218_v15 = vld [vmem:[#allocation4 + $0x1b8] sm:$0xff] }
 0x306   :  { %v3173_v62 = vadd.f32 %v690_v17, %v689_v41  ;;  %v3176_v49 = vadd.f32 %v660_v20, %v3080_v6  ;;  %v3179_v63 = vadd.f32 %v666_v7, %v3083_v0  ;;  %v3189_v10 = vadd.f32 %v672_v26, %v3093_v13  ;;  %v3196_v6 = vld [vmem:[#allocation4 + $0x180] sm:$0xff]  ;;  %v3198_v0 = vld [vmem:[#allocation4 + $0x188] sm:$0xff]  ;;  %v3207_v13 = vld [vmem:[#allocation4 + $0x198] sm:$0xff]  ;;  %4526 = vst [vmem:[#allocation57_spill] sm:$0xff] %v3216_v40 }
 0x307   :  { %v3192_v33 = vadd.f32 %v678_v51, %v3096_v28  ;;  %4520 = vst [vmem:[#allocation51_spill] sm:$0xff] %v3196_v6  ;;  %4521 = vst [vmem:[#allocation52_spill] sm:$0xff] %v3198_v0  ;;  %v727_v21 = vmul.f32 %v723_v44, %v3181_v2  ;;  %v728_v1 = vmul.f32 %v723_v44, %v3183_v43  ;;  %v739_v47 = vrot.slane %v725_v36, 4 }
 0x308   :  { %v3203_v32 = vadd.f32 %v684_v27, %v3103_v25  ;;  %4523 = vst [vmem:[#allocation54_spill] sm:$0xff] %v3207_v13  ;;  %v729_v28 = vmul.f32 %v723_v44, %v3185_v38  ;;  %v730_v52 = vmul.f32 %v723_v44, %v3194_v16  ;;  %v731_v24 = vmul.f32 %v723_v44, %v3196_v6 }
 0x309   :  { %4527 = vst [vmem:[#allocation58_spill] sm:$0xff] %v3218_v15  ;;  %v732_v25 = vmul.f32 %v723_v44, %v3198_v0  ;;  %v733_v50 = vmul.f32 %v723_v44, %v3205_v3  ;;  %v734_v30 = vmul.f32 %v723_v44, %v3207_v13  ;;  %v735_v37 = vmul.f32 %v723_v44, %v3209_v60 }
 0x30a   :  { %v736_v5 = vmul.f32 %v723_v44, %v3214_v35  ;;  %v737_v29 = vmul.f32 %v723_v44, %v3216_v40  ;;  %v738_v41 = vmul.f32 %v723_v44, %v3218_v15  ;;  %v745_v14 = vrot.slane %v726_v31, 4 }
 0x30b   :  { %v751_v12 = vrot.slane %v727_v21, 4  ;;  %v757_v20 = vrot.slane %v728_v1, 4  ;;  %v763_v7 = vrot.slane %v729_v28, 4  ;;  %v740_v17 = vadd.f32 %v739_v47, %v725_v36 }
 0x30c   :  { %v769_v26 = vrot.slane %v730_v52, 4  ;;  %v775_v51 = vrot.slane %v731_v24, 4  ;;  %v781_v27 = vrot.slane %v732_v25, 4  ;;  %v746_v3 = vadd.f32 %v745_v14, %v726_v31 }
 0x30d   :  { %v752_v0 = vadd.f32 %v751_v12, %v727_v21  ;;  %v758_v13 = vadd.f32 %v757_v20, %v728_v1  ;;  %v764_v6 = vadd.f32 %v763_v7, %v729_v28  ;;  %v741_v60 = vrot.slane %v740_v17, 2 }
 0x30e   :  { %v770_v16 = vadd.f32 %v769_v26, %v730_v52  ;;  %v776_v35 = vadd.f32 %v775_v51, %v731_v24  ;;  %v782_v38 = vadd.f32 %v781_v27, %v732_v25  ;;  %v747_v40 = vrot.slane %v746_v3, 2 }
 0x30f   :  { %v753_v43 = vrot.slane %v752_v0, 2  ;;  %v759_v44 = vrot.slane %v758_v13, 2  ;;  %v765_v15 = vrot.slane %v764_v6, 2  ;;  %v742_v2 = vadd.f32 %v741_v60, %v740_v17 }
 0x310   :  { %v771_v4 = vrot.slane %v770_v16, 2  ;;  %v777_v39 = vrot.slane %v776_v35, 2  ;;  %v783_v23 = vrot.slane %v782_v38, 2  ;;  %v748_v36 = vadd.f32 %v747_v40, %v746_v3 }
 0x311   :  { %v754_v47 = vadd.f32 %v753_v43, %v752_v0  ;;  %v760_v22 = vadd.f32 %v759_v44, %v758_v13  ;;  %v766_v34 = vadd.f32 %v765_v15, %v764_v6  ;;  %v743_v31 = vrot.slane %v742_v2, 1 }
 0x312   :  { %v772_v21 = vadd.f32 %v771_v4, %v770_v16  ;;  %v778_v1 = vadd.f32 %v777_v39, %v776_v35  ;;  %v784_v28 = vadd.f32 %v783_v23, %v782_v38  ;;  %v749_v14 = vrot.slane %v748_v36, 1 }
 0x313   :  { %v755_v52 = vrot.slane %v754_v47, 1  ;;  %v761_v24 = vrot.slane %v760_v22, 1  ;;  %v767_v25 = vrot.slane %v766_v34, 1  ;;  %v744_v12 = vadd.f32 %v743_v31, %v742_v2 }
 0x314   :  { %v773_v20 = vrot.slane %v772_v21, 1  ;;  %v779_v7 = vrot.slane %v778_v1, 1  ;;  %v785_v26 = vrot.slane %v784_v28, 1  ;;  %v750_v60 = vadd.f32 %v749_v14, %v748_v36 }
 0x315   :  { %v756_v17 = vadd.f32 %v755_v52, %v754_v47  ;;  %v762_v51 = vadd.f32 %v761_v24, %v760_v22  ;;  %v768_v27 = vadd.f32 %v767_v25, %v766_v34  ;;  %v787_v6 = vrot.slane %v733_v50, 4 }
 0x316   :  { %v774_v3 = vadd.f32 %v773_v20, %v772_v21  ;;  %v780_v43 = vadd.f32 %v779_v7, %v778_v1  ;;  %v786_v0 = vadd.f32 %v785_v26, %v784_v28  ;;  %v793_v13 = vrot.slane %v734_v30, 4 }
 0x317   :  { %v799_v4 = vrot.slane %v735_v37, 4  ;;  %v805_v39 = vrot.slane %v736_v5, 4  ;;  %v811_v23 = vrot.slane %v737_v29, 4  ;;  %v788_v38 = vadd.f32 %v787_v6, %v733_v50 }
 0x318   :  { %v817_v16 = vsel %vm420_vm15, %v738_v41, 0.0  ;;  %v3229_v2 = vadd.f32 %v744_v12, %v3145_v9  ;;  %v3232_v35 = vadd.f32 %v750_v60, %v3148_v18  ;;  %v794_v40 = vadd.f32 %v793_v13, %v734_v30 }
 0x319   :  { %v800_v22 = vadd.f32 %v799_v4, %v735_v37  ;;  %v806_v34 = vadd.f32 %v805_v39, %v736_v5  ;;  %v812_v15 = vadd.f32 %v811_v23, %v737_v29  ;;  %v789_v44 = vrot.slane %v788_v38, 2 }
 0x31a   :  { %v818_v36 = vrot.slane %v817_v16, 4  ;;  %v3235_v47 = vadd.f32 %v756_v17, %v3151_v11  ;;  %v3238_v31 = vadd.f32 %v762_v51, %v3154_v8  ;;  %v795_v50 = vrot.slane %v794_v40, 2 }
 0x31b   :  { %v801_v41 = vrot.slane %v800_v22, 2  ;;  %v807_v21 = vrot.slane %v806_v34, 2  ;;  %v813_v9 = vrot.slane %v812_v15, 2  ;;  %v790_v1 = vadd.f32 %v789_v44, %v788_v38 }
 0x31c   :  { %v819_v28 = vadd.f32 %v818_v36, %v817_v16  ;;  %v3241_v18 = vadd.f32 %v768_v27, %v3157_v48  ;;  %v3244_v30 = vadd.f32 %v774_v3, %v3160_v54  ;;  %v796_v37 = vadd.f32 %v795_v50, %v794_v40  ;;  %v2559_v36 = vld [vmem:[#allocation4 + $0x38] sm:$0xff]  ;;  %v2560_v50 = vld [vmem:[#allocation4 + $0x40] sm:$0xff] }
 0x31d   :  { %v802_v5 = vadd.f32 %v801_v41, %v800_v22  ;;  %v808_v29 = vadd.f32 %v807_v21, %v806_v34  ;;  %v814_v11 = vadd.f32 %v813_v9, %v812_v15  ;;  %v791_v14 = vrot.slane %v790_v1, 1  ;;  %v2561_v21 = vld [vmem:[#allocation4 + $0x48] sm:$0xff] }
 0x31e   :  { %v820_v52 = vrot.slane %v819_v28, 2  ;;  %v3247_v8 = vadd.f32 %v780_v43, %v3163_v42  ;;  %v3250_v24 = vadd.f32 %v786_v0, %v3166_v46  ;;  %v797_v25 = vrot.slane %v796_v37, 1 }
 0x31f   :  { %v803_v12 = vrot.slane %v802_v5, 1  ;;  %v809_v20 = vrot.slane %v808_v29, 1  ;;  %v815_v48 = vrot.slane %v814_v11, 1  ;;  %v792_v7 = vadd.f32 %v791_v14, %v790_v1 }
 0x320   :  { %4528 = vst [vmem:[#allocation59_spill] sm:$0xff] %v3247_v8  ;;  %4529 = vst [vmem:[#allocation60_spill] sm:$0xff] %v3250_v24  ;;  %v821_v26 = vadd.f32 %v820_v52, %v819_v28  ;;  %v838_v54 = vmin.f32 %v3229_v2, %v3241_v18  ;;  %v839_v60 = vmin.f32 %v3232_v35, %v3244_v30 }
 0x321   :  { %v798_v17 = vadd.f32 %v797_v25, %v796_v37  ;;  %v804_v51 = vadd.f32 %v803_v12, %v802_v5  ;;  %v810_v27 = vadd.f32 %v809_v20, %v808_v29  ;;  %v816_v42 = vadd.f32 %v815_v48, %v814_v11 }
 0x322   :  { %v822_v3 = vrot.slane %v821_v26, 1  ;;  %v3257_v46 = vadd.f32 %v792_v7, %v3176_v49  ;;  %v840_v43 = vmin.f32 %v3235_v47, %v3247_v8  ;;  %v841_v0 = vmin.f32 %v3238_v31, %v3250_v24 }
 0x323   :  { %v3264_v6 = vadd.f32 %v798_v17, %v3179_v63  ;;  %v3267_v13 = vadd.f32 %v804_v51, %v3189_v10  ;;  %v3270_v4 = vadd.f32 %v810_v27, %v3192_v33  ;;  %v705_v39 = vadd.f32 %v3173_v62, %v3129_v61 }
 0x324   :  { %4530 = vst [vmem:[#allocation61_spill] sm:$0xff] %v3257_v46  ;;  %v823_v49 = vadd.f32 %v822_v3, %v821_v26  ;;  %v3275_v23 = vadd.f32 %v816_v42, %v3203_v32  ;;  %v842_v38 = vmin.f32 %v838_v54, %v3257_v46  ;;  %v1489_v10 = vmul.f32 %v3123_v45, %v2918_v53 }
 0x325   :  { %4531 = vst [vmem:[#allocation62_spill] sm:$0xff] %v3264_v6  ;;  %4532 = vst [vmem:[#allocation63_spill] sm:$0xff] %v3267_v13  ;;  %v843_v16 = vmin.f32 %v839_v60, %v3264_v6  ;;  %v844_v63 = vmin.f32 %v840_v43, %v3267_v13  ;;  %v845_v40 = vmin.f32 %v841_v0, %v3270_v4 }
 0x326   :  { %4533 = vst [vmem:[#allocation64_spill] sm:$0xff] %v3270_v4  ;;  %4534 = vst [vmem:[#allocation65_spill] sm:$0xff] %v3275_v23  ;;  %v3283_v33 = vadd.f32 %v823_v49, %v705_v39  ;;  %v1490_v61 = vmul.f32 %v3123_v45, %v2920_v55  ;;  %v1491_v62 = vmul.f32 %v3123_v45, %v2922_v56  ;;  %v1503_v28 = vrot.slane %v1489_v10, 4 }
 0x327   :  { %v1492_v32 = vmul.f32 %v3123_v45, %v2924_v57  ;;  %v846_v22 = vmin.f32 %v842_v38, %v3275_v23  ;;  %v1493_v34 = vmul.f32 %v3123_v45, %v2926_v58  ;;  %v1494_v15 = vmul.f32 %v3123_v45, %v2928_v19  ;;  %v2562_v19 = vld [vmem:[#allocation4 + $0x50] sm:$0xff] }
 0x328   :  { %4535 = vst [vmem:[#allocation66_spill] sm:$0xff] %v3283_v33  ;;  %v1495_v53 = vmul.f32 %v3123_v45, %v2930_v59  ;;  %v847_v55 = vsel %vm420_vm15, %v3283_v33, inf  ;;  %v850_v44 = vmin.f32 %v844_v63, %v845_v40  ;;  %v1496_v56 = vmul.f32 %v2559_v36, %v3123_v45  ;;  %v2563_v59 = vld [vmem:[#allocation4 + $0x58] sm:$0xff]  ;;  %v2565_v36 = vld [vmem:[#allocation4 + $0x68] sm:$0xff] }
 0x329   :  { %v3302_v57 = vmul.f32 %v2560_v50, %v3123_v45  ;;  %v848_v41 = vmin.f32 %v843_v16, %v847_v55  ;;  %v3305_v58 = vmul.f32 %v2561_v21, %v3123_v45  ;;  %v3308_v9 = vmul.f32 %v2562_v19, %v3123_v45  ;;  %v2564_v55 = vld [vmem:[#allocation4 + $0x60] sm:$0xff] }
 0x32a   :  { %v1500_v1 = vmul.f32 %v2563_v59, %v3123_v45  ;;  %v1509_v37 = vrot.slane %v1490_v61, 4  ;;  %v1515_v5 = vrot.slane %v1491_v62, 4  ;;  %v1521_v29 = vrot.slane %v1492_v32, 4 }
 0x32b   :  { %v849_v11 = vmin.f32 %v846_v22, %v848_v41  ;;  %v1527_v14 = vrot.slane %v1493_v34, 4  ;;  %v1533_v52 = vrot.slane %v1494_v15, 4  ;;  %v1539_v25 = vrot.slane %v1495_v53, 4 }
 0x32c   :  { %v1504_v12 = vadd.f32 %v1503_v28, %v1489_v10  ;;  %v1510_v20 = vadd.f32 %v1509_v37, %v1490_v61  ;;  %v1516_v48 = vadd.f32 %v1515_v5, %v1491_v62  ;;  %v1522_v7 = vadd.f32 %v1521_v29, %v1492_v32 }
 0x32d   :  { %v851_v26 = vmin.f32 %v849_v11, %v850_v44  ;;  %v1528_v54 = vadd.f32 %v1527_v14, %v1493_v34  ;;  %v1534_v60 = vadd.f32 %v1533_v52, %v1494_v15  ;;  %v1540_v17 = vadd.f32 %v1539_v25, %v1495_v53 }
 0x32e   :  { %v1505_v51 = vrot.slane %v1504_v12, 2  ;;  %v1511_v27 = vrot.slane %v1510_v20, 2  ;;  %v1517_v42 = vrot.slane %v1516_v48, 2  ;;  %v1523_v3 = vrot.slane %v1522_v7, 2 }
 0x32f   :  { %852 = vmin.xlane.f32.xlu1 %v851_v26  ;;  %v1529_v43 = vrot.slane %v1528_v54, 2  ;;  %v1535_v0 = vrot.slane %v1534_v60, 2  ;;  %v1541_v39 = vrot.slane %v1540_v17, 2  ;;  %v1545_v49 = vrot.slane %v1496_v56, 4 }
 0x330   :  { %v1506_v38 = vadd.f32 %v1505_v51, %v1504_v12  ;;  %v1512_v16 = vadd.f32 %v1511_v27, %v1510_v20  ;;  %v1518_v63 = vadd.f32 %v1517_v42, %v1516_v48  ;;  %v1524_v40 = vadd.f32 %v1523_v3, %v1522_v7 }
 0x331   :  { %v1530_v10 = vadd.f32 %v1529_v43, %v1528_v54  ;;  %v1536_v61 = vadd.f32 %v1535_v0, %v1534_v60  ;;  %v1542_v62 = vadd.f32 %v1541_v39, %v1540_v17  ;;  %v1546_v32 = vadd.f32 %v1545_v49, %v1496_v56 }
 0x332   :  { %v1507_v22 = vrot.slane %v1506_v38, 1  ;;  %v1513_v34 = vrot.slane %v1512_v16, 1  ;;  %v1519_v15 = vrot.slane %v1518_v63, 1  ;;  %v1525_v53 = vrot.slane %v1524_v40, 1 }
 0x333   :  { %v1501_v44 = vmul.f32 %v2564_v55, %v3123_v45  ;;  %v1502_v50 = vmul.f32 %v2565_v36, %v3123_v45  ;;  %v1531_v41 = vrot.slane %v1530_v10, 1  ;;  %v1547_v21 = vrot.slane %v1546_v32, 2 }
 0x334   :  { %v3313_v19 = vadd.f32 %v1507_v22, %v1506_v38  ;;  %v1537_v59 = vrot.slane %v1536_v61, 1  ;;  %v1543_v28 = vrot.slane %v1542_v62, 1  ;;  %v3315_v37 = vadd.f32 %v1513_v34, %v1512_v16  ;;  %v2568_v34 = vld [vmem:[#allocation4 + $0x80] sm:$0xff] }
 0x335   :  { %v3317_v5 = vadd.f32 %v1519_v15, %v1518_v63  ;;  %v3319_v56 = vadd.f32 %v1525_v53, %v1524_v40  ;;  %v1548_v29 = vadd.f32 %v1547_v21, %v1546_v32  ;;  %v1551_v11 = vrot.slane %v3302_v57, 4  ;;  %v4536_v63 = vld [vmem:[#allocation43_spill] sm:$0xff] }
 0x336   :  { %v1557_v14 = vrot.slane %v3305_v58, 4  ;;  %v1563_v52 = vrot.slane %v3308_v9, 4  ;;  %v1569_v45 = vrot.slane %v1500_v1, 4  ;;  %v3324_v25 = vadd.f32 %v1531_v41, %v1530_v10  ;;  %v2567_v32 = vld [vmem:[#allocation4 + $0x78] sm:$0xff]  ;;  %v2569_v41 = vld [vmem:[#allocation4 + $0x88] sm:$0xff] }
 0x337   :  { %v1549_v12 = vrot.slane %v1548_v29, 1  ;;  %v1575_v20 = vrot.slane %v1501_v44, 4  ;;  %v1581_v48 = vsel %vm420_vm15, %v1502_v50, 0.0  ;;  %v1552_v7 = vadd.f32 %v1551_v11, %v3302_v57  ;;  %v2566_v57 = vld [vmem:[#allocation4 + $0x70] sm:$0xff] }
 0x338   :  { %v1558_v26 = vadd.f32 %v1557_v14, %v3305_v58  ;;  %v1564_v54 = vadd.f32 %v1563_v52, %v3308_v9  ;;  %v1570_v60 = vadd.f32 %v1569_v45, %v1500_v1  ;;  %v3330_v17 = vadd.f32 %v1537_v59, %v1536_v61  ;;  %v2570_v59 = vld [vmem:[#allocation4 + $0x90] sm:$0xff]  ;;  %v4538_v45 = vld [vmem:[#allocation23_spill] sm:$0xff] }
 0x339   :  { %v3332_v51 = vadd.f32 %v1543_v28, %v1542_v62  ;;  %v1576_v27 = vadd.f32 %v1575_v20, %v1501_v44  ;;  %v1582_v42 = vrot.slane %v1581_v48, 4  ;;  %v1553_v3 = vrot.slane %v1552_v7, 2  ;;  %v4539_v20 = vld [vmem:[#allocation24_spill] sm:$0xff] }
 0x33a   :  { %v1559_v43 = vrot.slane %v1558_v26, 2  ;;  %v1565_v0 = vrot.slane %v1564_v54, 2  ;;  %v1571_v39 = vrot.slane %v1570_v60, 2  ;;  %v3334_v49 = vadd.f32 %v1549_v12, %v1548_v29  ;;  %v4537_v29 = vld [vmem:[#allocation22_spill] sm:$0xff] }
 0x33b   :  { %v1577_v38 = vrot.slane %v1576_v27, 2  ;;  %v1583_v16 = vadd.f32 %v1582_v42, %v1581_v48  ;;  %v1606_v58 = vmul.f32 %v2566_v57, %v4536_v63  ;;  %v1554_v40 = vadd.f32 %v1553_v3, %v1552_v7  ;;  %v4541_v3 = vld [vmem:[#allocation26_spill] sm:$0xff]  ;;  %v4544_v57 = vld [vmem:[#allocation29_spill] sm:$0xff] }
 0x33c   :  { %v1560_v9 = vadd.f32 %v1559_v43, %v1558_v26  ;;  %v1566_v1 = vadd.f32 %v1565_v0, %v1564_v54  ;;  %v1572_v10 = vadd.f32 %v1571_v39, %v1570_v60  ;;  %v1607_v22 = vmul.f32 %v2567_v32, %v4536_v63  ;;  %v4542_v0 = vld [vmem:[#allocation27_spill] sm:$0xff] }
 0x33d   :  { %v3337_v61 = vadd.f32 %v1577_v38, %v1576_v27  ;;  %v1584_v62 = vrot.slane %v1583_v16, 2  ;;  %v1608_v15 = vmul.f32 %v2568_v34, %v4536_v63  ;;  %v1555_v53 = vrot.slane %v1554_v40, 1  ;;  %v4540_v27 = vld [vmem:[#allocation25_spill] sm:$0xff]  ;;  %v4543_v38 = vld [vmem:[#allocation28_spill] sm:$0xff] }
 0x33e   :  { %v1561_v55 = vrot.slane %v1560_v9, 1  ;;  %v1567_v44 = vrot.slane %v1566_v1, 1  ;;  %v1573_v36 = vrot.slane %v1572_v10, 1  ;;  %v1609_v21 = vmul.f32 %v2569_v41, %v4536_v63 }
 0x33f   :  { %v1585_v50 = vadd.f32 %v1584_v62, %v1583_v16  ;;  %v1610_v28 = vmul.f32 %v2570_v59, %v4536_v63  ;;  %v1611_v11 = vmul.f32 %v4536_v63, %v4537_v29  ;;  %v3345_v14 = vadd.f32 %v1555_v53, %v1554_v40 }
 0x340   :  { %v1579_v52 = vrot.slane %v3337_v61, 1  ;;  %v1612_v12 = vmul.f32 %v4536_v63, %v4538_v45  ;;  %v1613_v48 = vmul.f32 %v4536_v63, %v4539_v20  ;;  %v3352_v7 = vadd.f32 %v1561_v55, %v1560_v9 }
 0x341   :  { %v3354_v26 = vadd.f32 %v1567_v44, %v1566_v1  ;;  %v3356_v54 = vadd.f32 %v1573_v36, %v1572_v10  ;;  %v1586_v60 = vrot.slane %v1585_v50, 1  ;;  %v1614_v42 = vmul.f32 %v4536_v63, %v4540_v27 }
 0x342   :  { %v1615_v43 = vmul.f32 %v4536_v63, %v4541_v3  ;;  %v1616_v39 = vmul.f32 %v4536_v63, %v4542_v0  ;;  %v3366_v16 = vmul.f32 %v4536_v63, %v4543_v38  ;;  %v3370_v40 = vmul.f32 %v4536_v63, %v4544_v57 }
 0x343   :  { %v1620_v9 = vrot.slane %v1606_v58, 4  ;;  %v1626_v1 = vrot.slane %v1607_v22, 4  ;;  %v1632_v10 = vrot.slane %v1608_v15, 4  ;;  %v1638_v62 = vrot.slane %v1609_v21, 4 }
 0x344   :  { %v1644_v32 = vrot.slane %v1610_v28, 4  ;;  %v1650_v34 = vrot.slane %v1611_v11, 4  ;;  %v1656_v53 = vrot.slane %v1612_v12, 4  ;;  %v1662_v41 = vrot.slane %v1613_v48, 4 }
 0x345   :  { %v1621_v55 = vadd.f32 %v1620_v9, %v1606_v58  ;;  %v1627_v44 = vadd.f32 %v1626_v1, %v1607_v22  ;;  %v1633_v36 = vadd.f32 %v1632_v10, %v1608_v15  ;;  %v1639_v59 = vadd.f32 %v1638_v62, %v1609_v21  ;;  %v2571_v1 = vld [vmem:[#allocation4 + $0xd8] sm:$0xff] }
 0x346   :  { %v1645_v29 = vadd.f32 %v1644_v32, %v1610_v28  ;;  %v1651_v45 = vadd.f32 %v1650_v34, %v1611_v11  ;;  %v1657_v20 = vadd.f32 %v1656_v53, %v1612_v12  ;;  %v1663_v38 = vadd.f32 %v1662_v41, %v1613_v48 }
 0x347   :  { %v1622_v27 = vrot.slane %v1621_v55, 2  ;;  %v1628_v3 = vrot.slane %v1627_v44, 2  ;;  %v1634_v0 = vrot.slane %v1633_v36, 2  ;;  %v1640_v57 = vrot.slane %v1639_v59, 2 }
 0x348   :  { %v1646_v23 = vrot.slane %v1645_v29, 2  ;;  %v1652_v4 = vrot.slane %v1651_v45, 2  ;;  %v1658_v13 = vrot.slane %v1657_v20, 2  ;;  %v1664_v24 = vrot.slane %v1663_v38, 2 }
 0x349   :  { %v1623_v33 = vadd.f32 %v1622_v27, %v1621_v55  ;;  %v1629_v6 = vadd.f32 %v1628_v3, %v1627_v44  ;;  %v1635_v46 = vadd.f32 %v1634_v0, %v1633_v36  ;;  %v1641_v58 = vadd.f32 %v1640_v57, %v1639_v59 }
 0x34a   :  { %v1647_v22 = vadd.f32 %v1646_v23, %v1645_v29  ;;  %v1653_v15 = vadd.f32 %v1652_v4, %v1651_v45  ;;  %v1659_v9 = vadd.f32 %v1658_v13, %v1657_v20  ;;  %v1665_v12 = vadd.f32 %v1664_v24, %v1663_v38 }
 0x34b   :  { %v1624_v21 = vrot.slane %v1623_v33, 1  ;;  %v1630_v28 = vrot.slane %v1629_v6, 1  ;;  %v1636_v11 = vrot.slane %v1635_v46, 1  ;;  %v1619_v10 = vmul.f32 %v2571_v1, %v4536_v63 }
 0x34c   :  { %v1642_v48 = vrot.slane %v1641_v58, 1  ;;  %v1648_v62 = vrot.slane %v1647_v22, 1  ;;  %v1654_v32 = vrot.slane %v1653_v15, 1  ;;  %v3374_v34 = vadd.f32 %v1579_v52, %v3337_v61 }
 0x34d   :  { %v3376_v53 = vadd.f32 %v1586_v60, %v1585_v50  ;;  %v1625_v55 = vadd.f32 %v1624_v21, %v1623_v33  ;;  %v1660_v44 = vrot.slane %v1659_v9, 1  ;;  %v1631_v23 = vadd.f32 %v1630_v28, %v1629_v6 }
 0x34e   :  { %v1637_v4 = vadd.f32 %v1636_v11, %v1635_v46  ;;  %v1643_v13 = vadd.f32 %v1642_v48, %v1641_v58  ;;  %v1666_v36 = vrot.slane %v1665_v12, 1  ;;  %v1649_v41 = vadd.f32 %v1648_v62, %v1647_v22 }
 0x34f   :  { %v1668_v59 = vrot.slane %v1614_v42, 4  ;;  %v1674_v24 = vrot.slane %v1615_v43, 4  ;;  %v1680_v29 = vrot.slane %v1616_v39, 4  ;;  %v1655_v45 = vadd.f32 %v1654_v32, %v1653_v15 }
 0x350   :  { %v1686_v63 = vrot.slane %v3366_v16, 4  ;;  %v1692_v20 = vrot.slane %v3370_v40, 4  ;;  %v1698_v61 = vsel %vm420_vm15, %v1619_v10, 0.0  ;;  %v1661_v27 = vadd.f32 %v1660_v44, %v1659_v9 }
 0x351   :  { %v1669_v52 = vadd.f32 %v1668_v59, %v1614_v42  ;;  %v1675_v50 = vadd.f32 %v1674_v24, %v1615_v43  ;;  %v1681_v60 = vadd.f32 %v1680_v29, %v1616_v39  ;;  %v1699_v33 = vrot.slane %v1698_v61, 4  ;;  %v4545_v59 = vld [vmem:[#allocation30_spill] sm:$0xff]  ;;  %v4546_v24 = vld [vmem:[#allocation44_spill] sm:$0xff] }
 0x352   :  { %v1667_v6 = vadd.f32 %v1666_v36, %v1665_v12  ;;  %v1687_v46 = vadd.f32 %v1686_v63, %v3366_v16  ;;  %v1693_v3 = vadd.f32 %v1692_v20, %v3370_v40  ;;  %v3384_v21 = vadd.f32 %v1625_v55, %v3313_v19 }
 0x353   :  { %v1670_v0 = vrot.slane %v1669_v52, 2  ;;  %v1676_v38 = vrot.slane %v1675_v50, 2  ;;  %v1682_v57 = vrot.slane %v1681_v60, 2  ;;  %v1700_v58 = vadd.f32 %v1699_v33, %v1698_v61 }
 0x354   :  { %v1688_v22 = vrot.slane %v1687_v46, 2  ;;  %v1694_v15 = vrot.slane %v1693_v3, 2  ;;  %v3387_v42 = vadd.f32 %v1631_v23, %v3315_v37  ;;  %v3390_v40 = vadd.f32 %v1637_v4, %v3317_v5 }
 0x355   :  { %v1671_v43 = vadd.f32 %v1670_v0, %v1669_v52  ;;  %v1677_v39 = vadd.f32 %v1676_v38, %v1675_v50  ;;  %v1683_v9 = vadd.f32 %v1682_v57, %v1681_v60  ;;  %v1701_v28 = vrot.slane %v1700_v58, 2  ;;  %v4549_v52 = vld [vmem:[#allocation33_spill] sm:$0xff]  ;;  %v4550_v50 = vld [vmem:[#allocation34_spill] sm:$0xff] }
 0x356   :  { %v1689_v11 = vadd.f32 %v1688_v22, %v1687_v46  ;;  %v1695_v16 = vadd.f32 %v1694_v15, %v1693_v3  ;;  %v3393_v12 = vadd.f32 %v1643_v13, %v3319_v56  ;;  %v3396_v37 = vadd.f32 %v1649_v41, %v3324_v25  ;;  %v4547_v41 = vld [vmem:[#allocation31_spill] sm:$0xff]  ;;  %v4552_v46 = vld [vmem:[#allocation36_spill] sm:$0xff]  ;;  %v4554_v38 = vld [vmem:[#allocation38_spill] sm:$0xff] }
 0x357   :  { %v1672_v1 = vrot.slane %v1671_v43, 1  ;;  %v1678_v10 = vrot.slane %v1677_v39, 1  ;;  %v1684_v48 = vrot.slane %v1683_v9, 1  ;;  %v1702_v19 = vadd.f32 %v1701_v28, %v1700_v58  ;;  %v4555_v58 = vld [vmem:[#allocation39_spill] sm:$0xff] }
 0x358   :  { %v1690_v62 = vrot.slane %v1689_v11, 1  ;;  %v1696_v32 = vrot.slane %v1695_v16, 1  ;;  %v3399_v55 = vadd.f32 %v1655_v45, %v3330_v17  ;;  %v3402_v56 = vadd.f32 %v1661_v27, %v3332_v51  ;;  %v4548_v45 = vld [vmem:[#allocation32_spill] sm:$0xff]  ;;  %v4551_v27 = vld [vmem:[#allocation35_spill] sm:$0xff] }
 0x359   :  { %v1673_v44 = vadd.f32 %v1672_v1, %v1671_v43  ;;  %v1679_v23 = vadd.f32 %v1678_v10, %v1677_v39  ;;  %v1685_v36 = vadd.f32 %v1684_v48, %v1683_v9  ;;  %v1703_v5 = vrot.slane %v1702_v19, 1  ;;  %v4557_v43 = vld [vmem:[#allocation41_spill] sm:$0xff]  ;;  %v4558_v9 = vld [vmem:[#allocation42_spill] sm:$0xff] }
 0x35a   :  { %v1691_v4 = vadd.f32 %v1690_v62, %v1689_v11  ;;  %v3405_v13 = vadd.f32 %v1667_v6, %v3334_v49  ;;  %v1723_v29 = vmul.f32 %v4546_v24, %v4545_v59  ;;  %v1697_v63 = vadd.f32 %v1696_v32, %v1695_v16 }
 0x35b   :  { %v1704_v25 = vadd.f32 %v1703_v5, %v1702_v19  ;;  %v1724_v17 = vmul.f32 %v4546_v24, %v4547_v41  ;;  %v1725_v20 = vmul.f32 %v4546_v24, %v4548_v45  ;;  %v3414_v61 = vadd.f32 %v1673_v44, %v3345_v14  ;;  %v4553_v14 = vld [vmem:[#allocation37_spill] sm:$0xff] }
 0x35c   :  { %v3417_v51 = vadd.f32 %v1679_v23, %v3352_v7  ;;  %v1726_v49 = vmul.f32 %v4546_v24, %v4549_v52  ;;  %v1727_v60 = vmul.f32 %v4546_v24, %v4550_v50  ;;  %v3424_v33 = vadd.f32 %v1685_v36, %v3354_v26  ;;  %v4556_v26 = vld [vmem:[#allocation40_spill] sm:$0xff] }
 0x35d   :  { %v1728_v6 = vmul.f32 %v4546_v24, %v4551_v27  ;;  %v1729_v3 = vmul.f32 %v4546_v24, %v4552_v46  ;;  %v1730_v0 = vmul.f32 %v4546_v24, %v4553_v14  ;;  %v3433_v7 = vadd.f32 %v1691_v4, %v3356_v54 }
 0x35e   :  { %v1731_v57 = vmul.f32 %v4546_v24, %v4554_v38  ;;  %v1732_v22 = vmul.f32 %v4546_v24, %v4555_v58  ;;  %v3441_v15 = vmul.f32 %v4546_v24, %v4556_v26  ;;  %v3445_v39 = vmul.f32 %v4546_v24, %v4557_v43 }
 0x35f   :  { %v3449_v28 = vmul.f32 %v4546_v24, %v4558_v9  ;;  %v1737_v54 = vrot.slane %v1723_v29, 4  ;;  %v1743_v11 = vrot.slane %v1724_v17, 4  ;;  %v1749_v16 = vrot.slane %v1725_v20, 4 }
 0x360   :  { %v1755_v1 = vrot.slane %v1726_v49, 4  ;;  %v1761_v10 = vrot.slane %v1727_v60, 4  ;;  %v1767_v48 = vrot.slane %v1728_v6, 4  ;;  %v1773_v32 = vrot.slane %v1729_v3, 4 }
 0x361   :  { %v1738_v19 = vadd.f32 %v1737_v54, %v1723_v29  ;;  %v1744_v62 = vadd.f32 %v1743_v11, %v1724_v17  ;;  %v1779_v44 = vrot.slane %v1730_v0, 4  ;;  %v1750_v23 = vadd.f32 %v1749_v16, %v1725_v20  ;;  %v3451_v11 = vld [vmem:[#allocation4 + $0x148] sm:$0xff] }
 0x362   :  { %v1756_v36 = vadd.f32 %v1755_v1, %v1726_v49  ;;  %v1762_v5 = vadd.f32 %v1761_v10, %v1727_v60  ;;  %v1768_v4 = vadd.f32 %v1767_v48, %v1728_v6  ;;  %v1774_v45 = vadd.f32 %v1773_v32, %v1729_v3  ;;  %4559 = vst [vmem:[#allocation43_spill] sm:$0xff] %v3451_v11 }
 0x363   :  { %v1739_v59 = vrot.slane %v1738_v19, 2  ;;  %v1745_v41 = vrot.slane %v1744_v62, 2  ;;  %v1780_v52 = vadd.f32 %v1779_v44, %v1730_v0  ;;  %v1751_v50 = vrot.slane %v1750_v23, 2 }
 0x364   :  { %v1757_v27 = vrot.slane %v1756_v36, 2  ;;  %v1763_v46 = vrot.slane %v1762_v5, 2  ;;  %v1769_v14 = vrot.slane %v1768_v4, 2  ;;  %v1775_v26 = vrot.slane %v1774_v45, 2 }
 0x365   :  { %v1740_v38 = vadd.f32 %v1739_v59, %v1738_v19  ;;  %v1746_v58 = vadd.f32 %v1745_v41, %v1744_v62  ;;  %v1781_v43 = vrot.slane %v1780_v52, 2  ;;  %v1752_v29 = vadd.f32 %v1751_v50, %v1750_v23 }
 0x366   :  { %v1758_v17 = vadd.f32 %v1757_v27, %v1756_v36  ;;  %v1764_v9 = vadd.f32 %v1763_v46, %v1762_v5  ;;  %v1770_v54 = vadd.f32 %v1769_v14, %v1768_v4  ;;  %v1776_v60 = vadd.f32 %v1775_v26, %v1774_v45 }
 0x367   :  { %v1741_v20 = vrot.slane %v1740_v38, 1  ;;  %v1747_v49 = vrot.slane %v1746_v58, 1  ;;  %v1782_v6 = vadd.f32 %v1781_v43, %v1780_v52  ;;  %v1736_v3 = vmul.f32 %v3451_v11, %v4546_v24 }
 0x368   :  { %v1753_v0 = vrot.slane %v1752_v29, 1  ;;  %v1759_v16 = vrot.slane %v1758_v17, 1  ;;  %v1765_v1 = vrot.slane %v1764_v9, 1  ;;  %v3456_v10 = vadd.f32 %v1697_v63, %v3374_v34 }
 0x369   :  { %v3459_v48 = vadd.f32 %v1704_v25, %v3376_v53  ;;  %v1742_v19 = vadd.f32 %v1741_v20, %v1740_v38  ;;  %v1771_v62 = vrot.slane %v1770_v54, 1  ;;  %v1748_v32 = vadd.f32 %v1747_v49, %v1746_v58 }
 0x36a   :  { %v1754_v44 = vadd.f32 %v1753_v0, %v1752_v29  ;;  %v1777_v23 = vrot.slane %v1776_v60, 1  ;;  %v1783_v36 = vrot.slane %v1782_v6, 1  ;;  %v1760_v5 = vadd.f32 %v1759_v16, %v1758_v17 }
 0x36b   :  { %v1766_v4 = vadd.f32 %v1765_v1, %v1764_v9  ;;  %v1785_v59 = vrot.slane %v1731_v57, 4  ;;  %v1791_v41 = vrot.slane %v1732_v22, 4  ;;  %v1797_v24 = vrot.slane %v3441_v15, 4 }
 0x36c   :  { %v1803_v45 = vrot.slane %v3445_v39, 4  ;;  %v1809_v34 = vrot.slane %v3449_v28, 4  ;;  %v1815_v63 = vsel %vm420_vm15, %v1736_v3, 0.0  ;;  %v1772_v53 = vadd.f32 %v1771_v62, %v1770_v54 }
 0x36d   :  { %v1786_v25 = vadd.f32 %v1785_v59, %v1731_v57  ;;  %v1792_v52 = vadd.f32 %v1791_v41, %v1732_v22  ;;  %v1816_v50 = vrot.slane %v1815_v63, 4  ;;  %v1778_v27 = vadd.f32 %v1777_v23, %v1776_v60 }
 0x36e   :  { %v1798_v46 = vadd.f32 %v1797_v24, %v3441_v15  ;;  %v1804_v14 = vadd.f32 %v1803_v45, %v3445_v39  ;;  %v1810_v38 = vadd.f32 %v1809_v34, %v3449_v28  ;;  %v1784_v58 = vadd.f32 %v1783_v36, %v1782_v6  ;;  %v1838_v6 = vpop.permute.xlu0 %1837 }
 0x36f   :  { %v1787_v26 = vrot.slane %v1786_v25, 2  ;;  %v1793_v43 = vrot.slane %v1792_v52, 2  ;;  %v1817_v29 = vadd.f32 %v1816_v50, %v1815_v63  ;;  %v3469_v49 = vadd.f32 %v1742_v19, %v3384_v21 }
 0x370   :  { %v1799_v17 = vrot.slane %v1798_v46, 2  ;;  %v1805_v9 = vrot.slane %v1804_v14, 2  ;;  %v1811_v20 = vrot.slane %v1810_v38, 2  ;;  %v3472_v60 = vadd.f32 %v1748_v32, %v3387_v42 }
 0x371   :  { %v1788_v57 = vadd.f32 %v1787_v26, %v1786_v25  ;;  %v1794_v22 = vadd.f32 %v1793_v43, %v1792_v52  ;;  %v1818_v54 = vrot.slane %v1817_v29, 2  ;;  %v3475_v28 = vadd.f32 %v1754_v44, %v3390_v40  ;;  %v4567_v43 = vld [vmem:[#allocation52_spill] sm:$0xff] }
 0x372   :  { %v1800_v15 = vadd.f32 %v1799_v17, %v1798_v46  ;;  %v1806_v39 = vadd.f32 %v1805_v9, %v1804_v14  ;;  %v1812_v3 = vadd.f32 %v1811_v20, %v1810_v38  ;;  %v3478_v62 = vadd.f32 %v1760_v5, %v3393_v12  ;;  %v4560_v12 = vld [vmem:[#allocation45_spill] sm:$0xff]  ;;  %v4565_v14 = vld [vmem:[#allocation50_spill] sm:$0xff]  ;;  %v4570_v20 = vld [vmem:[#allocation55_spill] sm:$0xff] }
 0x373   :  { %v1789_v0 = vrot.slane %v1788_v57, 1  ;;  %v1795_v16 = vrot.slane %v1794_v22, 1  ;;  %v1819_v1 = vadd.f32 %v1818_v54, %v1817_v29  ;;  %v3481_v36 = vadd.f32 %v1766_v4, %v3396_v37  ;;  %v4561_v4 = vld [vmem:[#allocation46_spill] sm:$0xff] }
 0x374   :  { %v1801_v21 = vrot.slane %v1800_v15, 1  ;;  %v1807_v19 = vrot.slane %v1806_v39, 1  ;;  %v1813_v23 = vrot.slane %v1812_v3, 1  ;;  %v3484_v41 = vadd.f32 %v1772_v53, %v3399_v55  ;;  %v4569_v9 = vld [vmem:[#allocation54_spill] sm:$0xff] }
 0x375   :  { %v1790_v42 = vadd.f32 %v1789_v0, %v1788_v57  ;;  %v1796_v32 = vadd.f32 %v1795_v16, %v1794_v22  ;;  %v1820_v59 = vrot.slane %v1819_v1, 1  ;;  %v3487_v44 = vadd.f32 %v1778_v27, %v3402_v56  ;;  %v4562_v56 = vld [vmem:[#allocation47_spill] sm:$0xff]  ;;  %v4564_v27 = vld [vmem:[#allocation49_spill] sm:$0xff]  ;;  %v4571_v22 = vld [vmem:[#allocation56_spill] sm:$0xff] }
 0x376   :  { %v1802_v40 = vadd.f32 %v1801_v21, %v1800_v15  ;;  %v3490_v24 = vadd.f32 %v1784_v58, %v3405_v13  ;;  %v1840_v5 = vmul.f32 %v1838_v6, %v4560_v12  ;;  %v3493_v45 = vadd.f32 %v1807_v19, %v1806_v39  ;;  %v4563_v13 = vld [vmem:[#allocation48_spill] sm:$0xff]  ;;  %v4566_v58 = vld [vmem:[#allocation51_spill] sm:$0xff]  ;;  %v4572_v15 = vld [vmem:[#allocation57_spill] sm:$0xff] }
 0x377   :  { %v3495_v34 = vadd.f32 %v1813_v23, %v1812_v3  ;;  %v3497_v37 = vadd.f32 %v1820_v59, %v1819_v1  ;;  %v1841_v63 = vmul.f32 %v1838_v6, %v4561_v4  ;;  %v3501_v55 = vadd.f32 %v1790_v42, %v3414_v61  ;;  %v4568_v61 = vld [vmem:[#allocation53_spill] sm:$0xff] }
 0x378   :  { %v3504_v53 = vadd.f32 %v1796_v32, %v3417_v51  ;;  %v1842_v25 = vmul.f32 %v1838_v6, %v4562_v56  ;;  %v1843_v52 = vmul.f32 %v1838_v6, %v4563_v13  ;;  %v3509_v50 = vadd.f32 %v1802_v40, %v3424_v33  ;;  %v4573_v33 = vld [vmem:[#allocation58_spill] sm:$0xff] }
 0x379   :  { %v1844_v46 = vmul.f32 %v1838_v6, %v4564_v27  ;;  %v1845_v38 = vmul.f32 %v1838_v6, %v4565_v14  ;;  %v1846_v26 = vmul.f32 %v1838_v6, %v4566_v58  ;;  %v1847_v29 = vmul.f32 %v1838_v6, %v4567_v43 }
 0x37a   :  { %v1848_v17 = vmul.f32 %v1838_v6, %v4568_v61  ;;  %v1849_v51 = vmul.f32 %v1838_v6, %v4569_v9  ;;  %v1850_v57 = vmul.f32 %v1838_v6, %v4570_v20  ;;  %v1851_v54 = vmul.f32 %v1838_v6, %v4571_v22 }
 0x37b   :  { %v1852_v39 = vmul.f32 %v1838_v6, %v4572_v15  ;;  %v1853_v3 = vmul.f32 %v1838_v6, %v4573_v33  ;;  %v1854_v0 = vrot.slane %v1840_v5, 4  ;;  %v1860_v16 = vrot.slane %v1841_v63, 4 }
 0x37c   :  { %v1866_v1 = vrot.slane %v1842_v25, 4  ;;  %v1872_v21 = vrot.slane %v1843_v52, 4  ;;  %v1878_v19 = vrot.slane %v1844_v46, 4  ;;  %v1884_v42 = vrot.slane %v1845_v38, 4 }
 0x37d   :  { %v1855_v23 = vadd.f32 %v1854_v0, %v1840_v5  ;;  %v1890_v32 = vrot.slane %v1846_v26, 4  ;;  %v1896_v59 = vrot.slane %v1847_v29, 4  ;;  %v1861_v40 = vadd.f32 %v1860_v16, %v1841_v63 }
 0x37e   :  { %v1867_v12 = vadd.f32 %v1866_v1, %v1842_v25  ;;  %v1873_v4 = vadd.f32 %v1872_v21, %v1843_v52  ;;  %v1879_v56 = vadd.f32 %v1878_v19, %v1844_v46  ;;  %v1885_v27 = vadd.f32 %v1884_v42, %v1845_v38 }
 0x37f   :  { %v1856_v13 = vrot.slane %v1855_v23, 2  ;;  %v1891_v14 = vadd.f32 %v1890_v32, %v1846_v26  ;;  %v1897_v58 = vadd.f32 %v1896_v59, %v1847_v29  ;;  %v1862_v43 = vrot.slane %v1861_v40, 2 }
 0x380   :  { %v1868_v61 = vrot.slane %v1867_v12, 2  ;;  %v1874_v6 = vrot.slane %v1873_v4, 2  ;;  %v1880_v9 = vrot.slane %v1879_v56, 2  ;;  %v1886_v22 = vrot.slane %v1885_v27, 2 }
 0x381   :  { %v1857_v20 = vadd.f32 %v1856_v13, %v1855_v23  ;;  %v1892_v15 = vrot.slane %v1891_v14, 2  ;;  %v1898_v33 = vrot.slane %v1897_v58, 2  ;;  %v1863_v5 = vadd.f32 %v1862_v43, %v1861_v40 }
 0x382   :  { %v1869_v0 = vadd.f32 %v1868_v61, %v1867_v12  ;;  %v1875_v11 = vadd.f32 %v1874_v6, %v1873_v4  ;;  %v1881_v8 = vadd.f32 %v1880_v9, %v1879_v56  ;;  %v1887_v25 = vadd.f32 %v1886_v22, %v1885_v27 }
 0x383   :  { %v1858_v63 = vrot.slane %v1857_v20, 1  ;;  %v1893_v52 = vadd.f32 %v1892_v15, %v1891_v14  ;;  %v1899_v46 = vadd.f32 %v1898_v33, %v1897_v58  ;;  %v1864_v16 = vrot.slane %v1863_v5, 1 }
 0x384   :  { %v1870_v38 = vrot.slane %v1869_v0, 1  ;;  %v1876_v26 = vrot.slane %v1875_v11, 1  ;;  %v1882_v29 = vrot.slane %v1881_v8, 1  ;;  %v1888_v21 = vrot.slane %v1887_v25, 1 }
 0x385   :  { %v1859_v1 = vadd.f32 %v1858_v63, %v1857_v20  ;;  %v1894_v19 = vrot.slane %v1893_v52, 1  ;;  %v1900_v42 = vrot.slane %v1899_v46, 1  ;;  %v1865_v23 = vadd.f32 %v1864_v16, %v1863_v5 }
 0x386   :  { %v1871_v32 = vadd.f32 %v1870_v38, %v1869_v0  ;;  %v1877_v59 = vadd.f32 %v1876_v26, %v1875_v11  ;;  %v1883_v13 = vadd.f32 %v1882_v29, %v1881_v8  ;;  %v1889_v40 = vadd.f32 %v1888_v21, %v1887_v25 }
 0x387   :  { %v1895_v12 = vadd.f32 %v1894_v19, %v1893_v52  ;;  %v1901_v4 = vadd.f32 %v1900_v42, %v1899_v46  ;;  %v1902_v56 = vrot.slane %v1848_v17, 4  ;;  %v1908_v43 = vrot.slane %v1849_v51, 4 }
 0x388   :  { %v1914_v27 = vrot.slane %v1850_v57, 4  ;;  %v1920_v14 = vrot.slane %v1851_v54, 4  ;;  %v1926_v58 = vrot.slane %v1852_v39, 4  ;;  %v1932_v6 = vsel %vm420_vm15, %v1853_v3, 0.0 }
 0x389   :  { %v1903_v61 = vadd.f32 %v1902_v56, %v1848_v17  ;;  %v3523_v9 = vadd.f32 %v1859_v1, %v3469_v49  ;;  %v3526_v20 = vadd.f32 %v1865_v23, %v3472_v60  ;;  %v1909_v22 = vadd.f32 %v1908_v43, %v1849_v51 }
 0x38a   :  { %v1915_v11 = vadd.f32 %v1914_v27, %v1850_v57  ;;  %v1921_v8 = vadd.f32 %v1920_v14, %v1851_v54  ;;  %v1927_v15 = vadd.f32 %v1926_v58, %v1852_v39  ;;  %v1933_v5 = vrot.slane %v1932_v6, 4 }
 0x38b   :  { %v1904_v33 = vrot.slane %v1903_v61, 2  ;;  %v3529_v0 = vadd.f32 %v1871_v32, %v3475_v28  ;;  %v3532_v63 = vadd.f32 %v1877_v59, %v3478_v62  ;;  %v1910_v17 = vrot.slane %v1909_v22, 2 }
 0x38c   :  { %v1916_v3 = vrot.slane %v1915_v11, 2  ;;  %v1922_v25 = vrot.slane %v1921_v8, 2  ;;  %v1928_v49 = vrot.slane %v1927_v15, 2  ;;  %v1934_v46 = vadd.f32 %v1933_v5, %v1932_v6  ;;  %v4576_v5 = vld [vmem:[#allocation21_spill] sm:$0xff] }
 0x38d   :  { %v1905_v52 = vadd.f32 %v1904_v33, %v1903_v61  ;;  %v3535_v60 = vadd.f32 %v1883_v13, %v3481_v36  ;;  %v3538_v51 = vadd.f32 %v1889_v40, %v3484_v41  ;;  %v1911_v57 = vadd.f32 %v1910_v17, %v1909_v22 }
 0x38e   :  { %v1917_v54 = vadd.f32 %v1916_v3, %v1915_v11  ;;  %v1923_v39 = vadd.f32 %v1922_v25, %v1921_v8  ;;  %v1929_v28 = vadd.f32 %v1928_v49, %v1927_v15  ;;  %v1935_v38 = vrot.slane %v1934_v46, 2 }
 0x38f   :  { %v1906_v16 = vrot.slane %v1905_v52, 1  ;;  %v3541_v62 = vadd.f32 %v1895_v12, %v3487_v44  ;;  %v3544_v26 = vadd.f32 %v1901_v4, %v3490_v24  ;;  %v1912_v29 = vrot.slane %v1911_v57, 1 }
 0x390   :  { %v1918_v1 = vrot.slane %v1917_v54, 1  ;;  %v1924_v21 = vrot.slane %v1923_v39, 1  ;;  %v1930_v36 = vrot.slane %v1929_v28, 1  ;;  %v1833_v41 = vadd.f32 %v3493_v45, %v3433_v7 }
 0x391   :  { %v1907_v19 = vadd.f32 %v1906_v16, %v1905_v52  ;;  %v1936_v42 = vadd.f32 %v1935_v38, %v1934_v46  ;;  %v1953_v23 = vmin.f32 %v3523_v9, %v3535_v60  ;;  %v1834_v32 = vadd.f32 %v3495_v34, %v3456_v10 }
 0x392   :  { %v1835_v44 = vadd.f32 %v3497_v37, %v3459_v48  ;;  %v1913_v24 = vadd.f32 %v1912_v29, %v1911_v57  ;;  %v1954_v59 = vmin.f32 %v3526_v20, %v3538_v51  ;;  %v1919_v13 = vadd.f32 %v1918_v1, %v1917_v54 }
 0x393   :  { %v1925_v40 = vadd.f32 %v1924_v21, %v1923_v39  ;;  %v1937_v12 = vrot.slane %v1936_v42, 1  ;;  %v3557_v7 = vadd.f32 %v1907_v19, %v3501_v55  ;;  %v1931_v45 = vadd.f32 %v1930_v36, %v1929_v28 }
 0x394   :  { %v3560_v4 = vadd.f32 %v1913_v24, %v3504_v53  ;;  %v1955_v10 = vmin.f32 %v3529_v0, %v3541_v62  ;;  %v1956_v48 = vmin.f32 %v3532_v63, %v3544_v26  ;;  %v3568_v56 = vadd.f32 %v1919_v13, %v3509_v50 }
 0x395   :  { %v1938_v34 = vadd.f32 %v1937_v12, %v1936_v42  ;;  %v1957_v37 = vmin.f32 %v1953_v23, %v3557_v7  ;;  %v3570_v43 = vadd.f32 %v1925_v40, %v1833_v41  ;;  %v3572_v55 = vadd.f32 %v1931_v45, %v1834_v32  ;;  %v4577_v45 = vld [vmem:[#allocation59_spill] sm:$0xff] }
 0x396   :  { %v1958_v27 = vmin.f32 %v1954_v59, %v3560_v4  ;;  %v1959_v14 = vmin.f32 %v1955_v10, %v3568_v56  ;;  %v4574_v15 = vlaneseq  ;;  %v4578_v10 = vld [vmem:[#allocation60_spill] sm:$0xff] }
 0x397   :  { %v3575_v53 = vadd.f32 %v1938_v34, %v1835_v44  ;;  %v1960_v58 = vmin.f32 %v1956_v48, %v3570_v43  ;;  %v1961_v61 = vmin.f32 %v1957_v37, %v3572_v55  ;;  %v4579_v48 = vld [vmem:[#allocation61_spill] sm:$0xff]  ;;  %v4580_v34 = vld [vmem:[#allocation62_spill] sm:$0xff] }
 0x398   :  { %v3583_v33 = vand.u32 127, %v4574_v15 }
 0x399   :  { %v1962_v6 = vsel %vm420_vm15, %v3575_v53, inf  ;;  %v1965_v11 = vmin.f32 %v1959_v14, %v1960_v58  ;;  %v4583_v14 = vld [vmem:[#allocation64_spill] sm:$0xff] }
 0x39a   :  { %v1963_v22 = vmin.f32 %v1958_v27, %v1962_v6  ;;  %4575 = vst [vmem:[#allocation22_spill] sm:$0xff] %v3583_v33  ;;  %v71_v17 = vadd.s32 128, %v3583_v33  ;;  %v72_v3 = vadd.s32 256, %v3583_v33  ;;  %v73_v25 = vadd.s32 384, %v3583_v33  ;;  %v4582_v27 = vld [vmem:[#allocation63_spill] sm:$0xff] }
 0x39b   :  { %v74_v49 = vadd.s32 512, %v3583_v33  ;;  %v75_v52 = vadd.s32 640, %v3583_v33  ;;  %v76_v46 = vadd.s32 768, %v3583_v33  ;;  %v77_v57 = vadd.s32 896, %v3583_v33 }
 0x39c   :  { %v1964_v50 = vmin.f32 %v1961_v61, %v1963_v22  ;;  %v78_v54 = vadd.s32 1024, %v3583_v33  ;;  %v79_v39 = vadd.s32 1152, %v3583_v33  ;;  %v80_v28 = vadd.s32 1280, %v3583_v33  ;;  %v4584_v22 = vld [vmem:[#allocation65_spill] sm:$0xff] }
 0x39d   :  { %v81_v16 = vadd.s32 1408, %v3583_v33  ;;  %v82_v38 = vadd.s32 1536, %v3583_v33  ;;  %v83_v29 = vadd.s32 1664, %v3583_v33  ;;  %v3601_v1 = vcvt.s32.f32 %v3583_v33 }
 0x39e   :  { %v1966_v8 = vmin.f32 %v1964_v50, %v1965_v11  ;;  %v3603_v21 = vcvt.s32.f32 %v71_v17  ;;  %v3605_v36 = vcvt.s32.f32 %v72_v3  ;;  %v3607_v41 = vcvt.s32.f32 %v73_v25 }
 0x39f   :  { %v3609_v19 = vcvt.s32.f32 %v74_v49  ;;  %v3611_v42 = vcvt.s32.f32 %v75_v52  ;;  %v3613_v32 = vcvt.s32.f32 %v76_v46  ;;  %v3615_v44 = vcvt.s32.f32 %v77_v57 }
 0x3a0   :  { %1967 = vmin.xlane.f32.xlu1 %v1966_v8  ;;  %v3617_v24 = vcvt.s32.f32 %v78_v54  ;;  %v3619_v59 = vcvt.s32.f32 %v79_v39  ;;  %v3621_v13 = vcvt.s32.f32 %v80_v28  ;;  %v3623_v40 = vcvt.s32.f32 %v81_v16 }
 0x3a1   :  { %v3631_v12 = vcvt.s32.f32 %v83_v29  ;;  %v3648_v6 = vcvt.s32.f32 %v82_v38 }
 0x3b1   :  { %1219 = vrot.lane.b32.xlu1 %v4576_v5, %s2719_s19 }
 0x3b8   :  { %v853_v23 = vpop.xlane.xlu1 %852 }
 0x3b9   :  { %vm854_vm0 = vcmp.le.f32.partialorder %v3229_v2, %v853_v23  ;;  %vm855_vm1 = vcmp.le.f32.partialorder %v3232_v35, %v853_v23  ;;  %vm856_vm2 = vcmp.le.f32.partialorder %v3235_v47, %v853_v23  ;;  %vm857_vm3 = vcmp.le.f32.partialorder %v3238_v31, %v853_v23  ;;  %v4581_v2 = vld [vmem:[#allocation66_spill] sm:$0xff] }
 0x3ba   :  { %vm858_vm4 = vcmp.le.f32.partialorder %v3241_v18, %v853_v23  ;;  %vm859_vm5 = vcmp.le.f32.partialorder %v3244_v30, %v853_v23  ;;  %vm860_vm6 = vcmp.le.f32.partialorder %v4577_v45, %v853_v23  ;;  %vm861_vm7 = vcmp.le.f32.partialorder %v4578_v10, %v853_v23 }
 0x3bb   :  { %vm862_vm8 = vcmp.le.f32.partialorder %v4579_v48, %v853_v23  ;;  %vm863_vm10 = vcmp.le.f32.partialorder %v4580_v34, %v853_v23  ;;  %vm867_vm11 = vcmp.le.f32.partialorder %v4581_v2, %v853_v23  ;;  %v868_v35 = vsel %vm854_vm0, %v3601_v1, 1680.0 }
 0x3bc   :  { %v869_v47 = vsel %vm855_vm1, %v3603_v21, 1680.0  ;;  %v870_v31 = vsel %vm856_vm2, %v3605_v36, 1680.0  ;;  %v871_v18 = vsel %vm857_vm3, %v3607_v41, 1680.0  ;;  %v872_v30 = vsel %vm858_vm4, %v3609_v19, 1680.0 }
 0x3bd   :  { %v873_v37 = vsel %vm859_vm5, %v3611_v42, 1680.0  ;;  %vm864_vm12 = vcmp.le.f32.partialorder %v4582_v27, %v853_v23  ;;  %vm865_vm13 = vcmp.le.f32.partialorder %v4583_v14, %v853_v23  ;;  %v874_v58 = vsel %vm860_vm6, %v3613_v32, 1680.0 }
 0x3be   :  { %v875_v61 = vsel %vm861_vm7, %v3615_v44, 1680.0  ;;  %vm866_vm14 = vcmp.le.f32.partialorder %v4584_v22, %v853_v23  ;;  %v881_v50 = vsel %vm867_vm11, %v3631_v12, 1680.0  ;;  %v882_v11 = vmin.f32 %v868_v35, %v872_v30 }
 0x3bf   :  { %v883_v8 = vmin.f32 %v869_v47, %v873_v37  ;;  %v884_v15 = vmin.f32 %v870_v31, %v874_v58  ;;  %v885_v5 = vmin.f32 %v871_v18, %v875_v61  ;;  %v876_v17 = vsel %vm862_vm8, %v3617_v24, 1680.0 }
 0x3c0   :  { %v877_v3 = vsel %vm863_vm10, %v3619_v59, 1680.0  ;;  %v878_v25 = vsel %vm864_vm12, %v3621_v13, 1680.0  ;;  %v879_v49 = vsel %vm865_vm13, %v3623_v40, 1680.0  ;;  %v886_v52 = vmin.f32 %v882_v11, %v876_v17  ;;  %v4585_v11 = vld [vmem:[#allocation18_spill] sm:$0xff] }
 0x3c1   :  { %v887_v46 = vmin.f32 %v883_v8, %v877_v3  ;;  %v888_v57 = vmin.f32 %v884_v15, %v878_v25  ;;  %v889_v54 = vmin.f32 %v885_v5, %v879_v49  ;;  %v880_v39 = vsel %vm866_vm14, %v3648_v6, 1680.0  ;;  %v4586_v15 = vld [vmem:[#allocation13_spill] sm:$0xff]  ;;  %v4588_v3 = vld [vmem:[#allocation20_spill] sm:$0xff] }
 0x3c2   :  { %v891_v28 = vsel %vm420_vm15, %v881_v50, inf  ;;  %v890_v16 = vmin.f32 %v886_v52, %v880_v39  ;;  %2553 = vlog2.f32 %v4585_v11  ;;  %v4589_v25 = vmov 0.0  }
 0x3c3   :  { %v892_v38 = vmin.f32 %v887_v46, %v891_v28  ;;  %v894_v45 = vmin.f32 %v888_v57, %v889_v54  ;;  %v2573_v46 = vld [vmem:[%s4376_s0] sm:$0xff]  ;;  %v3726_v54 = vld [vmem:[#allocation4] sm:$0xff]  ;;  %v3730_v28 = vld [vmem:[#allocation4 + $0x8] sm:$0xff] }
 0x3c5   :  { %v893_v29 = vmin.f32 %v890_v16, %v892_v38 }
 0x3c7   :  { %v895_v10 = vmin.f32 %v893_v29, %v894_v45  ;;  %v3741_v29 = vld [vmem:[#allocation4 + $0x10] sm:$0xff] }
 0x3c9   :  { %896 = vmin.xlane.f32.xlu0 %v895_v10 }
 0x429   :  { %v1968_v23 = vpop.xlane.xlu1 %1967 }
 0x42a   :  { %vm1969_vm0 = vcmp.le.f32.partialorder %v3523_v9, %v1968_v23  ;;  %vm1970_vm1 = vcmp.le.f32.partialorder %v3526_v20, %v1968_v23  ;;  %vm1971_vm2 = vcmp.le.f32.partialorder %v3529_v0, %v1968_v23  ;;  %vm1972_vm3 = vcmp.le.f32.partialorder %v3532_v63, %v1968_v23 }
 0x42b   :  { %vm1973_vm4 = vcmp.le.f32.partialorder %v3535_v60, %v1968_v23  ;;  %vm1974_vm5 = vcmp.le.f32.partialorder %v3538_v51, %v1968_v23  ;;  %vm1975_vm6 = vcmp.le.f32.partialorder %v3541_v62, %v1968_v23  ;;  %vm1976_vm7 = vcmp.le.f32.partialorder %v3544_v26, %v1968_v23 }
 0x42c   :  { %vm1977_vm8 = vcmp.le.f32.partialorder %v3557_v7, %v1968_v23  ;;  %vm1978_vm10 = vcmp.le.f32.partialorder %v3560_v4, %v1968_v23  ;;  %vm1982_vm11 = vcmp.le.f32.partialorder %v3575_v53, %v1968_v23  ;;  %v1983_v9 = vsel %vm1969_vm0, %v3601_v1, 1680.0  ;;  %v2554_v4 = vpop.eup %2553 }
 0x42d   :  { %v1984_v20 = vsel %vm1970_vm1, %v3603_v21, 1680.0  ;;  %v1985_v0 = vsel %vm1971_vm2, %v3605_v36, 1680.0  ;;  %v1986_v63 = vsel %vm1972_vm3, %v3607_v41, 1680.0  ;;  %v1987_v60 = vsel %vm1973_vm4, %v3609_v19, 1680.0 }
 0x42e   :  { %v1988_v51 = vsel %vm1974_vm5, %v3611_v42, 1680.0  ;;  %vm1979_vm12 = vcmp.le.f32.partialorder %v3568_v56, %v1968_v23  ;;  %vm1980_vm13 = vcmp.le.f32.partialorder %v3570_v43, %v1968_v23  ;;  %v1989_v62 = vsel %vm1975_vm6, %v3613_v32, 1680.0 }
 0x42f   :  { %v1990_v26 = vsel %vm1976_vm7, %v3615_v44, 1680.0  ;;  %vm1981_vm14 = vcmp.le.f32.partialorder %v3572_v55, %v1968_v23  ;;  %v1996_v53 = vsel %vm1982_vm11, %v3631_v12, 1680.0  ;;  %v1997_v48 = vmin.f32 %v1983_v9, %v1987_v60  ;;  %v3748_v9 = vld [vmem:[#allocation4 + $0xe0] sm:$0xff]  ;;  %v3760_v60 = vld [vmem:[#allocation4 + $0x18] sm:$0xff] }
 0x430   :  { %v1998_v34 = vmin.f32 %v1984_v20, %v1988_v51  ;;  %v1999_v2 = vmin.f32 %v1985_v0, %v1989_v62  ;;  %v2000_v35 = vmin.f32 %v1986_v63, %v1990_v26  ;;  %v1991_v47 = vsel %vm1977_vm8, %v3617_v24, 1680.0  ;;  %v3752_v0 = vld [vmem:[#allocation4 + $0xe8] sm:$0xff] }
 0x431   :  { %v1992_v56 = vsel %vm1978_vm10, %v3619_v59, 1680.0  ;;  %v1993_v43 = vsel %vm1979_vm12, %v3621_v13, 1680.0  ;;  %v1994_v31 = vsel %vm1980_vm13, %v3623_v40, 1680.0  ;;  %v2001_v18 = vmin.f32 %v1997_v48, %v1991_v47 }
 0x432   :  { %v2002_v55 = vmin.f32 %v1998_v34, %v1992_v56  ;;  %v2003_v30 = vmin.f32 %v1999_v2, %v1993_v43  ;;  %v2004_v37 = vmin.f32 %v2000_v35, %v1994_v31  ;;  %v1995_v27 = vsel %vm1981_vm14, %v3648_v6, 1680.0  ;;  %v3789_v35 = vld [vmem:[#allocation4 + $0xf0] sm:$0xff]  ;;  %v3793_v43 = vld [vmem:[#allocation4 + $0x28] sm:$0xff] }
 0x433   :  { %v2006_v14 = vsel %vm420_vm15, %v1996_v53, inf  ;;  %v2005_v58 = vmin.f32 %v2001_v18, %v1995_v27  ;;  %v114_v8 = vmul.f32 0.6931472, %v2554_v4  ;;  %v3780_v53 = vld [vmem:[#allocation4 + $0x20] sm:$0xff]  ;;  %v3833_v4 = vld [vmem:[#allocation4 + $0x30] sm:$0xff] }
 0x434   :  { %v2007_v61 = vmin.f32 %v2002_v55, %v2006_v14  ;;  %v2009_v22 = vmin.f32 %v2003_v30, %v2004_v37  ;;  %v3797_v55 = vld [vmem:[#allocation4 + $0x70] sm:$0xff]  ;;  %v3801_v37 = vld [vmem:[#allocation4 + $0x78] sm:$0xff]  ;;  %4591 = vst [vmem:[#allocation25_spill] sm:$0xff] %v3833_v4 }
 0x435   :  { %v3697_v5 = vsub.f32 %v4586_v15, %v114_v8 }
 0x436   :  { %v2008_v7 = vmin.f32 %v2005_v58, %v2007_v61  ;;  %v3817_v61 = vld [vmem:[#allocation4 + $0xf8] sm:$0xff] }
 0x437   :  { %4587 = vst [vmem:[#allocation23_spill] sm:$0xff] %v3697_v5  ;;  %4590 = vst [vmem:[#allocation24_spill] sm:$0xff] %v3817_v61 }
 0x438   :  { %v2010_v50 = vmin.f32 %v2008_v7, %v2009_v22 }
 0x43a   :  { %2011 = vmin.xlane.f32.xlu0 %v2010_v50 }
 0x450   :  { %1188 = vrot.lane.b32.xlu0 %v3697_v5, %s2721_s21  ;;  %v3873_v5 = vld [vmem:[#allocation4 + $0x150] sm:$0xff] }
 0x451   :  { %4596 = vst [vmem:[#allocation30_spill] sm:$0xff] %v3873_v5 }
 0x452   :  { %v3701_v17 = vpop.xlane.xlu0 %896 }
 0x453   :  { %vm898_vm0 = vcmp.eq.f32.partialorder %v3601_v1, %v3701_v17  ;;  %vm899_vm1 = vcmp.eq.f32.partialorder %v3603_v21, %v3701_v17  ;;  %vm900_vm2 = vcmp.eq.f32.partialorder %v3605_v36, %v3701_v17  ;;  %vm901_vm3 = vcmp.eq.f32.partialorder %v3607_v41, %v3701_v17 }
 0x454   :  { %1204 = vrot.lane.b32.xlu0 %v4588_v3, %s2718_s18  ;;  %v3712_v49 = vsel %vm898_vm0, 1.0, %v4589_v25  ;;  %v3715_v52 = vsel %vm899_vm1, 1.0, %v4589_v25  ;;  %v3724_v57 = vsel %vm900_vm2, 1.0, %v4589_v25  ;;  %vm902_vm4 = vcmp.eq.f32.partialorder %v3609_v19, %v3701_v17 }
 0x455   :  { %v940_v39 = vmul.f32 %v3726_v54, %v3712_v49  ;;  %v941_v16 = vmul.f32 %v3730_v28, %v3715_v52  ;;  %v3737_v38 = vsel %vm901_vm3, 1.0, %v4589_v25  ;;  %vm903_vm5 = vcmp.eq.f32.partialorder %v3611_v42, %v3701_v17 }
 0x456   :  { %v942_v45 = vmul.f32 %v3741_v29, %v3724_v57  ;;  %v3746_v23 = vsel %vm902_vm4, 1.0, %v4589_v25  ;;  %v1058_v20 = vmul.f32 %v3748_v9, %v3712_v49  ;;  %v1059_v63 = vmul.f32 %v3752_v0, %v3715_v52 }
 0x457   :  { %v954_v10 = vadd.f32 %v941_v16, %v940_v39  ;;  %vm904_vm6 = vcmp.eq.f32.partialorder %v3613_v32, %v3701_v17  ;;  %vm905_vm7 = vcmp.eq.f32.partialorder %v3615_v44, %v3701_v17  ;;  %v943_v51 = vmul.f32 %v3760_v60, %v3737_v38  ;;  %v3849_v39 = vld [vmem:[#allocation4 + $0x100] sm:$0xff] }
 0x458   :  { %1245 = vrot.lane.b32.xlu0 %v2573_v46, %s2721_s21  ;;  %vm906_vm8 = vcmp.eq.f32.partialorder %v3617_v24, %v3701_v17  ;;  %vm907_vm10 = vcmp.eq.f32.partialorder %v3619_v59, %v3701_v17  ;;  %vm908_vm11 = vcmp.eq.f32.partialorder %v3621_v13, %v3701_v17  ;;  %v3774_v26 = vsel %vm903_vm5, 1.0, %v4589_v25  ;;  %4592 = vst [vmem:[#allocation26_spill] sm:$0xff] %v3849_v39 }
 0x459   :  { %v955_v62 = vadd.f32 %v954_v10, %v942_v45  ;;  %vm909_vm12 = vcmp.eq.f32.partialorder %v3623_v40, %v3701_v17  ;;  %vm910_vm13 = vcmp.eq.f32.partialorder %v3648_v6, %v3701_v17  ;;  %v944_v48 = vmul.f32 %v3780_v53, %v3746_v23  ;;  %v3853_v10 = vld [vmem:[#allocation4 + $0x38] sm:$0xff] }
 0x45a   :  { %vm911_vm14 = vcmp.eq.f32.partialorder %v3631_v12, %v3701_v17  ;;  %v3787_v2 = vsel %vm904_vm6, 1.0, %v4589_v25  ;;  %v1060_v47 = vmul.f32 %v3789_v35, %v3724_v57  ;;  %v1072_v56 = vadd.f32 %v1059_v63, %v1058_v20  ;;  %4593 = vst [vmem:[#allocation27_spill] sm:$0xff] %v3853_v10  ;;  %v3899_v17 = vld [vmem:[#allocation4 + $0x90] sm:$0xff] }
 0x45b   :  { %v956_v34 = vadd.f32 %v955_v62, %v943_v51  ;;  %v945_v31 = vmul.f32 %v3793_v43, %v3774_v26  ;;  %v999_v30 = vmul.f32 %v3797_v55, %v3712_v49  ;;  %v1000_v27 = vmul.f32 %v3801_v37, %v3715_v52  ;;  %v3857_v51 = vld [vmem:[#allocation4 + $0x80] sm:$0xff] }
 0x45c   :  { %v3809_v14 = vsel %vm905_vm7, 1.0, %v4589_v25  ;;  %v3815_v58 = vsel %vm906_vm8, 1.0, %v4589_v25  ;;  %v1061_v7 = vmul.f32 %v3817_v61, %v3737_v38  ;;  %v1073_v22 = vadd.f32 %v1072_v56, %v1060_v47  ;;  %v3865_v56 = vld [vmem:[#allocation4 + $0x108] sm:$0xff]  ;;  %v3927_v61 = vld [vmem:[#allocation4 + $0xa0] sm:$0xff] }
 0x45d   :  { %v957_v18 = vadd.f32 %v956_v34, %v944_v48  ;;  %v3825_v50 = vsel %vm907_vm10, 1.0, %v4589_v25  ;;  %v3831_v11 = vsel %vm908_vm11, 1.0, %v4589_v25  ;;  %v946_v8 = vmul.f32 %v3833_v4, %v3787_v2  ;;  %v3861_v34 = vld [vmem:[#allocation4 + $0x40] sm:$0xff]  ;;  %4595 = vst [vmem:[#allocation29_spill] sm:$0xff] %v3865_v56  ;;  %v3907_v4 = vld [vmem:[#allocation4 + $0x118] sm:$0xff] }
 0x45e   :  { %v3841_v3 = vsel %vm909_vm12, 1.0, %v4589_v25  ;;  %v3847_v46 = vsel %vm910_vm13, 1.0, %v4589_v25  ;;  %v1062_v16 = vmul.f32 %v3849_v39, %v3746_v23  ;;  %v1074_v45 = vadd.f32 %v1073_v22, %v1061_v7  ;;  %4594 = vst [vmem:[#allocation28_spill] sm:$0xff] %v3861_v34  ;;  %v3869_v7 = vld [vmem:[#allocation4 + $0x88] sm:$0xff]  ;;  %v3903_v39 = vld [vmem:[#allocation4 + $0x58] sm:$0xff]  ;;  %4602 = vst [vmem:[#allocation35_spill] sm:$0xff] %v3907_v4 }
 0x45f   :  { %v958_v15 = vadd.f32 %v957_v18, %v945_v31  ;;  %v947_v20 = vmul.f32 %v3853_v10, %v3809_v14  ;;  %v1001_v62 = vmul.f32 %v3857_v51, %v3724_v57  ;;  %v1013_v48 = vadd.f32 %v1000_v27, %v999_v30  ;;  %v3877_v27 = vld [vmem:[#allocation4 + $0x158] sm:$0xff]  ;;  %4601 = vst [vmem:[#allocation34_spill] sm:$0xff] %v3903_v39 }
 0x460   :  { %v948_v47 = vmul.f32 %v3861_v34, %v3815_v58  ;;  %v1063_v31 = vmul.f32 %v3865_v56, %v3774_v26  ;;  %v1075_v18 = vadd.f32 %v1074_v45, %v1062_v16  ;;  %v1002_v22 = vmul.f32 %v3869_v7, %v3737_v38  ;;  %4597 = vst [vmem:[#allocation44_spill] sm:$0xff] %v3877_v27  ;;  %v3887_v45 = vld [vmem:[#allocation4 + $0x48] sm:$0xff] }
 0x461   :  { %v959_v63 = vadd.f32 %v958_v15, %v946_v8  ;;  %v1014_v15 = vadd.f32 %v1013_v48, %v1001_v62  ;;  %v1117_v30 = vmul.f32 %v3873_v5, %v3712_v49  ;;  %v1118_v33 = vmul.f32 %v3877_v27, %v3715_v52  ;;  %4598 = vst [vmem:[#allocation31_spill] sm:$0xff] %v3887_v45  ;;  %v3895_v48 = vld [vmem:[#allocation4 + $0x50] sm:$0xff]  ;;  %v3915_v27 = vld [vmem:[#allocation4 + $0x160] sm:$0xff] }
 0x462   :  { %v3885_v16 = vsel %vm911_vm14, 1.0, %v4589_v25  ;;  %v1076_v62 = vadd.f32 %v1075_v18, %v1063_v31  ;;  %4600 = vst [vmem:[#allocation33_spill] sm:$0xff] %v3895_v48  ;;  %v950_v52 = vmul.f32 %v3895_v48, %v3831_v11  ;;  %v1003_v56 = vmul.f32 %v3899_v17, %v3746_v23  ;;  %4603 = vst [vmem:[#allocation36_spill] sm:$0xff] %v3915_v27 }
 0x463   :  { %v960_v8 = vadd.f32 %v959_v63, %v947_v20  ;;  %v949_v20 = vmul.f32 %v3887_v45, %v3825_v50  ;;  %v3891_v63 = vld [vmem:[#allocation4 + $0x110] sm:$0xff]  ;;  %v1015_v10 = vadd.f32 %v1014_v15, %v1002_v22  ;;  %v951_v45 = vmul.f32 %v3903_v39, %v3841_v3  ;;  %v3919_v39 = vld [vmem:[#allocation4 + $0x68] sm:$0xff] }
 0x464   :  { %4599 = vst [vmem:[#allocation32_spill] sm:$0xff] %v3891_v63  ;;  %v1064_v49 = vmul.f32 %v3891_v63, %v3787_v2  ;;  %v1065_v31 = vmul.f32 %v3907_v4, %v3809_v14  ;;  %v3911_v63 = vld [vmem:[#allocation4 + $0x98] sm:$0xff]  ;;  %v1119_v22 = vmul.f32 %v3915_v27, %v3724_v57  ;;  %v1131_v15 = vadd.f32 %v1118_v33, %v1117_v30  ;;  %v3923_v4 = vld [vmem:[#allocation4 + $0x120] sm:$0xff]  ;;  %v3931_v57 = vld [vmem:[#allocation4 + $0x168] sm:$0xff] }
 0x465   :  { %v961_v34 = vadd.f32 %v960_v8, %v948_v47  ;;  %v1004_v47 = vmul.f32 %v3911_v63, %v3774_v26  ;;  %v1016_v48 = vadd.f32 %v1015_v10, %v1003_v56  ;;  %4604 = vst [vmem:[#allocation37_spill] sm:$0xff] %v3919_v39  ;;  %v953_v5 = vmul.f32 %v3919_v39, %v3885_v16  ;;  %v3943_v27 = vld [vmem:[#allocation4 + $0xa8] sm:$0xff] }
 0x466   :  { %v1077_v18 = vadd.f32 %v1076_v62, %v1064_v49  ;;  %4605 = vst [vmem:[#allocation38_spill] sm:$0xff] %v3923_v4  ;;  %v1066_v49 = vmul.f32 %v3923_v4, %v3815_v58  ;;  %v1005_v10 = vmul.f32 %v3927_v61, %v3787_v2  ;;  %v1120_v33 = vmul.f32 %v3931_v57, %v3737_v38  ;;  %v3939_v4 = vld [vmem:[#allocation4 + $0x128] sm:$0xff]  ;;  %v3947_v38 = vld [vmem:[#allocation4 + $0x170] sm:$0xff] }
 0x467   :  { %v962_v8 = vadd.f32 %v961_v34, %v949_v20  ;;  %v1017_v56 = vadd.f32 %v1016_v48, %v1004_v47  ;;  %v1132_v30 = vadd.f32 %v1131_v15, %v1119_v22  ;;  %v3935_v20 = vld [vmem:[#allocation4 + $0x60] sm:$0xff]  ;;  %4607 = vst [vmem:[#allocation40_spill] sm:$0xff] %v3939_v4  ;;  %v1006_v48 = vmul.f32 %v3943_v27, %v3809_v14 }
 0x468   :  { %v1078_v62 = vadd.f32 %v1077_v18, %v1065_v31  ;;  %4606 = vst [vmem:[#allocation39_spill] sm:$0xff] %v3935_v20  ;;  %v952_v39 = vmul.f32 %v3935_v20, %v3847_v46  ;;  %v1067_v31 = vmul.f32 %v3939_v4, %v3825_v50  ;;  %4608 = vst [vmem:[#allocation41_spill] sm:$0xff] %v3947_v38  ;;  %v966_v15 = vsel %vm420_vm15, %v953_v5, 0.0  ;;  %v3952_v20 = vld [vmem:[#allocation4 + $0x130] sm:$0xff]  ;;  %v3964_v5 = vld [vmem:[#allocation4 + $0x138] sm:$0xff] }
 0x469   :  { %v963_v34 = vadd.f32 %v962_v8, %v950_v52  ;;  %v1018_v47 = vadd.f32 %v1017_v56, %v1005_v10  ;;  %v1121_v8 = vmul.f32 %v3947_v38, %v3746_v23  ;;  %v1133_v22 = vadd.f32 %v1132_v30, %v1120_v33  ;;  %4609 = vst [vmem:[#allocation42_spill] sm:$0xff] %v3952_v20  ;;  %v3956_v4 = vld [vmem:[#allocation4 + $0xb0] sm:$0xff]  ;;  %v3960_v56 = vld [vmem:[#allocation4 + $0x178] sm:$0xff] }
 0x46a   :  { %v1079_v18 = vadd.f32 %v1078_v62, %v1066_v49  ;;  %v1068_v49 = vmul.f32 %v3952_v20, %v3831_v11  ;;  %v1122_v23 = vmul.f32 %v3960_v56, %v3774_v26  ;;  %4610 = vst [vmem:[#allocation45_spill] sm:$0xff] %v3964_v5  ;;  %v1069_v30 = vmul.f32 %v3964_v5, %v3841_v3  ;;  %v3970_v38 = vld [vmem:[#allocation4 + $0xb8] sm:$0xff] }
 0x46b   :  { %v964_v52 = vadd.f32 %v963_v34, %v951_v45  ;;  %v1007_v45 = vmul.f32 %v3956_v4, %v3815_v58  ;;  %v1019_v34 = vadd.f32 %v1018_v47, %v1006_v48  ;;  %v1134_v33 = vadd.f32 %v1133_v22, %v1121_v8  ;;  %v3974_v47 = vld [vmem:[#allocation4 + $0x180] sm:$0xff] }
 0x46c   :  { %v1080_v62 = vadd.f32 %v1079_v18, %v1067_v31  ;;  %v4611_v31 = vld [vmem:[#allocation43_spill] sm:$0xff]  ;;  %4612 = vst [vmem:[#allocation46_spill] sm:$0xff] %v3974_v47  ;;  %v1123_v26 = vmul.f32 %v3974_v47, %v3787_v2  ;;  %v3978_v22 = vld [vmem:[#allocation4 + $0x140] sm:$0xff] }
 0x46d   :  { %v965_v10 = vadd.f32 %v964_v52, %v952_v39  ;;  %v1071_v18 = vmul.f32 %v4611_v31, %v3885_v16  ;;  %v1008_v39 = vmul.f32 %v3970_v38, %v3825_v50  ;;  %v1020_v52 = vadd.f32 %v1019_v34, %v1007_v45  ;;  %4613 = vst [vmem:[#allocation47_spill] sm:$0xff] %v3978_v22  ;;  %v3986_v45 = vld [vmem:[#allocation4 + $0x188] sm:$0xff]  ;;  %v3999_v47 = vld [vmem:[#allocation4 + $0xd8] sm:$0xff] }
 0x46e   :  { %v1081_v20 = vadd.f32 %v1080_v62, %v1068_v49  ;;  %v1135_v8 = vadd.f32 %v1134_v33, %v1122_v23  ;;  %v1070_v5 = vmul.f32 %v3978_v22, %v3847_v46  ;;  %v3982_v49 = vld [vmem:[#allocation4 + $0xc0] sm:$0xff]  ;;  %4614 = vst [vmem:[#allocation48_spill] sm:$0xff] %v3986_v45  ;;  %v3991_v33 = vld [vmem:[#allocation4 + $0xc8] sm:$0xff] }
 0x46f   :  { %v967_v48 = vadd.f32 %v966_v15, %v965_v10  ;;  %v1009_v62 = vmul.f32 %v3982_v49, %v3831_v11  ;;  %v1021_v15 = vadd.f32 %v1020_v52, %v1008_v39  ;;  %v1124_v10 = vmul.f32 %v3986_v45, %v3809_v14  ;;  %v4020_v45 = vld [vmem:[#allocation4 + $0x1b8] sm:$0xff] }
 0x470   :  { %v1082_v31 = vadd.f32 %v1081_v20, %v1069_v30  ;;  %v1136_v2 = vadd.f32 %v1135_v8, %v1123_v26  ;;  %v1084_v23 = vsel %vm420_vm15, %v1071_v18, 0.0  ;;  %v1010_v20 = vmul.f32 %v3991_v33, %v3841_v3  ;;  %v4007_v8 = vld [vmem:[#allocation4 + $0x198] sm:$0xff] }
 0x471   :  { %968 = vadd.xlane.f32.xlu1 %v967_v48  ;;  %v1022_v30 = vadd.f32 %v1021_v15, %v1009_v62  ;;  %v3995_v48 = vld [vmem:[#allocation4 + $0x190] sm:$0xff]  ;;  %v1012_v14 = vmul.f32 %v3999_v47, %v3885_v16  ;;  %v4011_v15 = vld [vmem:[#allocation4 + $0x1a0] sm:$0xff] }
 0x472   :  { %v1083_v34 = vadd.f32 %v1082_v31, %v1070_v5  ;;  %4615 = vst [vmem:[#allocation49_spill] sm:$0xff] %v3995_v48  ;;  %v1125_v39 = vmul.f32 %v3995_v48, %v3815_v58  ;;  %v1137_v52 = vadd.f32 %v1136_v2, %v1124_v10  ;;  %v4003_v5 = vld [vmem:[#allocation4 + $0xd0] sm:$0xff]  ;;  %v1126_v31 = vmul.f32 %v4007_v8, %v3825_v50  ;;  %v4016_v48 = vld [vmem:[#allocation4 + $0x1a8] sm:$0xff] }
 0x473   :  { %v1011_v18 = vmul.f32 %v4003_v5, %v3847_v46  ;;  %v1023_v26 = vadd.f32 %v1022_v30, %v1010_v20  ;;  %v1127_v10 = vmul.f32 %v4011_v15, %v3831_v11  ;;  %v1128_v20 = vmul.f32 %v4016_v48, %v3841_v3 }
 0x474   :  { %v1085_v22 = vadd.f32 %v1084_v23, %v1083_v34  ;;  %v1138_v62 = vadd.f32 %v1137_v52, %v1125_v39  ;;  %v1025_v34 = vsel %vm420_vm15, %v1012_v14, 0.0  ;;  %v1130_v50 = vmul.f32 %v4020_v45, %v3885_v16 }
 0x475   :  { %v1024_v58 = vadd.f32 %v1023_v26, %v1011_v18  ;;  %v2722_v26 = vmov 12  }
 0x476   :  { %v1139_v2 = vadd.f32 %v1138_v62, %v1126_v31  ;;  %v1143_v14 = vsel %vm420_vm15, %v1130_v50, 0.0  ;;  %2533 = vset.pattern.permute.xlu0 %v2722_v26 }
 0x477   :  { %1086 = vadd.xlane.f32.xlu0 %v1085_v22  ;;  %v1026_v23 = vadd.f32 %v1025_v34, %v1024_v58  ;;  %v4024_v22 = vld [vmem:[#allocation4 + $0x1b0] sm:$0xff] }
 0x478   :  { %v1140_v30 = vadd.f32 %v1139_v2, %v1127_v10  ;;  %v1129_v11 = vmul.f32 %v4024_v22, %v3847_v46 }
 0x479   :  { %1027 = vadd.xlane.f32.xlu1 %v1026_v23 }
 0x47a   :  { %v1141_v39 = vadd.f32 %v1140_v30, %v1128_v20 }
 0x47c   :  { %v1142_v52 = vadd.f32 %v1141_v39, %v1129_v11 }
 0x47e   :  { %v1144_v18 = vadd.f32 %v1143_v14, %v1142_v52 }
 0x480   :  { %1145 = vadd.xlane.f32.xlu0 %v1144_v18  ;;  %v4616_v18 = vld [vmem:[#allocation24_spill] sm:$0xff] }
 0x4c3   :  { %v4029_v3 = vpop.xlane.xlu0 %2011 }
 0x4c4   :  { %vm2013_vm0 = vcmp.eq.f32.partialorder %v3601_v1, %v4029_v3  ;;  %vm2014_vm1 = vcmp.eq.f32.partialorder %v3603_v21, %v4029_v3  ;;  %vm2015_vm2 = vcmp.eq.f32.partialorder %v3605_v36, %v4029_v3  ;;  %vm2016_vm3 = vcmp.eq.f32.partialorder %v3607_v41, %v4029_v3 }
 0x4c5   :  { %v2429_v46 = vsel %vm2013_vm0, 1.0, %v4589_v25  ;;  %v2430_v16 = vsel %vm2014_vm1, 1.0, %v4589_v25  ;;  %v4042_v31 = vsel %vm2015_vm2, 1.0, %v4589_v25  ;;  %vm2017_vm4 = vcmp.eq.f32.partialorder %v3609_v19, %v4029_v3 }
 0x4c6   :  { %v2106_v62 = vmul.f32 %v3797_v55, %v2429_v46  ;;  %v2107_v1 = vmul.f32 %v3801_v37, %v2430_v16  ;;  %v4049_v21 = vsel %vm2016_vm3, 1.0, %v4589_v25  ;;  %vm2018_vm5 = vcmp.eq.f32.partialorder %v3611_v42, %v4029_v3 }
 0x4c7   :  { %v2108_v36 = vmul.f32 %v3857_v51, %v4042_v31  ;;  %v4056_v58 = vsel %vm2017_vm4, 1.0, %v4589_v25  ;;  %v2055_v55 = vmul.f32 %v3726_v54, %v2429_v46  ;;  %v2056_v37 = vmul.f32 %v3730_v28, %v2430_v16 }
 0x4c8   :  { %v2120_v41 = vadd.f32 %v2107_v1, %v2106_v62  ;;  %vm2019_vm6 = vcmp.eq.f32.partialorder %v3613_v32, %v4029_v3  ;;  %vm2020_vm7 = vcmp.eq.f32.partialorder %v3615_v44, %v4029_v3  ;;  %v2109_v19 = vmul.f32 %v3869_v7, %v4049_v21  ;;  %v4617_v1 = vld [vmem:[#allocation30_spill] sm:$0xff] }
 0x4c9   :  { %vm2021_vm8 = vcmp.eq.f32.partialorder %v3617_v24, %v4029_v3  ;;  %vm2022_vm10 = vcmp.eq.f32.partialorder %v3619_v59, %v4029_v3  ;;  %vm2023_vm11 = vcmp.eq.f32.partialorder %v3621_v13, %v4029_v3  ;;  %v4073_v54 = vsel %vm2018_vm5, 1.0, %v4589_v25 }
 0x4ca   :  { %v2121_v42 = vadd.f32 %v2120_v41, %v2108_v36  ;;  %vm2024_vm12 = vcmp.eq.f32.partialorder %v3623_v40, %v4029_v3  ;;  %vm2025_vm13 = vcmp.eq.f32.partialorder %v3648_v6, %v4029_v3  ;;  %v2110_v32 = vmul.f32 %v3899_v17, %v4056_v58 }
 0x4cb   :  { %vm2026_vm14 = vcmp.eq.f32.partialorder %v3631_v12, %v4029_v3  ;;  %v4084_v51 = vsel %vm2019_vm6, 1.0, %v4589_v25  ;;  %v2057_v7 = vmul.f32 %v3741_v29, %v4042_v31  ;;  %v2069_v10 = vadd.f32 %v2056_v37, %v2055_v55  ;;  %v4621_v3 = vld [vmem:[#allocation27_spill] sm:$0xff] }
 0x4cc   :  { %v2122_v28 = vadd.f32 %v2121_v42, %v2109_v19  ;;  %v2111_v2 = vmul.f32 %v3911_v63, %v4073_v54  ;;  %v2157_v23 = vmul.f32 %v3748_v9, %v2429_v46  ;;  %v2158_v20 = vmul.f32 %v3752_v0, %v2430_v16 }
 0x4cd   :  { %v4096_v17 = vsel %vm2020_vm7, 1.0, %v4589_v25  ;;  %v4102_v29 = vsel %vm2021_vm8, 1.0, %v4589_v25  ;;  %v2058_v63 = vmul.f32 %v3760_v60, %v4049_v21  ;;  %v2070_v30 = vadd.f32 %v2069_v10, %v2057_v7 }
 0x4ce   :  { %v2123_v34 = vadd.f32 %v2122_v28, %v2110_v32  ;;  %v4110_v9 = vsel %vm2022_vm10, 1.0, %v4589_v25  ;;  %v4116_v44 = vsel %vm2023_vm11, 1.0, %v4589_v25  ;;  %v2112_v24 = vmul.f32 %v3927_v61, %v4084_v51 }
 0x4cf   :  { %v4124_v60 = vsel %vm2024_vm12, 1.0, %v4589_v25  ;;  %v4130_v59 = vsel %vm2025_vm13, 1.0, %v4589_v25  ;;  %v2059_v13 = vmul.f32 %v3780_v53, %v4056_v58  ;;  %v2071_v50 = vadd.f32 %v2070_v30, %v2058_v63  ;;  %v4624_v30 = vld [vmem:[#allocation28_spill] sm:$0xff] }
 0x4d0   :  { %v2124_v0 = vadd.f32 %v2123_v34, %v2111_v2  ;;  %v2113_v61 = vmul.f32 %v3943_v27, %v4096_v17  ;;  %v2159_v39 = vmul.f32 %v3789_v35, %v4042_v31  ;;  %v2171_v40 = vadd.f32 %v2158_v20, %v2157_v23  ;;  %v4618_v27 = vld [vmem:[#allocation44_spill] sm:$0xff] }
 0x4d1   :  { %v2114_v52 = vmul.f32 %v3956_v4, %v4102_v29  ;;  %v2060_v6 = vmul.f32 %v3793_v43, %v4073_v54  ;;  %v2072_v14 = vadd.f32 %v2071_v50, %v2059_v13  ;;  %v2160_v26 = vmul.f32 %v4616_v18, %v4049_v21  ;;  %v4619_v43 = vld [vmem:[#allocation25_spill] sm:$0xff]  ;;  %v4623_v23 = vld [vmem:[#allocation36_spill] sm:$0xff] }
 0x4d2   :  { %v2125_v11 = vadd.f32 %v2124_v0, %v2112_v24  ;;  %v2172_v62 = vadd.f32 %v2171_v40, %v2159_v39  ;;  %v2208_v36 = vmul.f32 %v4617_v1, %v2429_v46  ;;  %v2209_v41 = vmul.f32 %v4618_v27, %v2430_v16  ;;  %v4620_v46 = vld [vmem:[#allocation26_spill] sm:$0xff]  ;;  %v4625_v0 = vld [vmem:[#allocation32_spill] sm:$0xff]  ;;  %v4626_v40 = vld [vmem:[#allocation31_spill] sm:$0xff] }
 0x4d3   :  { %v4150_v35 = vsel %vm2026_vm14, 1.0, %v4589_v25  ;;  %v2115_v4 = vmul.f32 %v3970_v38, %v4110_v9  ;;  %v2061_v55 = vmul.f32 %v4619_v43, %v4084_v51  ;;  %v2073_v37 = vadd.f32 %v2072_v14, %v2060_v6  ;;  %v4622_v38 = vld [vmem:[#allocation29_spill] sm:$0xff]  ;;  %v4627_v6 = vld [vmem:[#allocation35_spill] sm:$0xff] }
 0x4d4   :  { %v2126_v53 = vadd.f32 %v2125_v11, %v2113_v61  ;;  %v2116_v19 = vmul.f32 %v3982_v49, %v4116_v44  ;;  %v2161_v16 = vmul.f32 %v4620_v46, %v4056_v58  ;;  %v2173_v32 = vadd.f32 %v2172_v62, %v2160_v26 }
 0x4d5   :  { %v2117_v12 = vmul.f32 %v3991_v33, %v4124_v60  ;;  %v2062_v28 = vmul.f32 %v4621_v3, %v4096_v17  ;;  %v2074_v7 = vadd.f32 %v2073_v37, %v2061_v55  ;;  %v2162_v10 = vmul.f32 %v4622_v38, %v4073_v54 }
 0x4d6   :  { %v2127_v42 = vadd.f32 %v2126_v53, %v2114_v52  ;;  %v2174_v34 = vadd.f32 %v2173_v32, %v2161_v16  ;;  %v2210_v49 = vmul.f32 %v4623_v23, %v4042_v31  ;;  %v2222_v20 = vadd.f32 %v2209_v41, %v2208_v36  ;;  %v4628_v53 = vld [vmem:[#allocation41_spill] sm:$0xff]  ;;  %v4633_v32 = vld [vmem:[#allocation40_spill] sm:$0xff] }
 0x4d7   :  { %v2119_v63 = vmul.f32 %v3999_v47, %v4150_v35  ;;  %v2063_v24 = vmul.f32 %v4624_v30, %v4102_v29  ;;  %v2075_v33 = vadd.f32 %v2074_v7, %v2062_v28  ;;  %v2163_v13 = vmul.f32 %v4625_v0, %v4084_v51  ;;  %v4634_v7 = vld [vmem:[#allocation46_spill] sm:$0xff]  ;;  %v4638_v0 = vld [vmem:[#allocation45_spill] sm:$0xff] }
 0x4d8   :  { %v2128_v2 = vadd.f32 %v2127_v42, %v2115_v4  ;;  %v2175_v61 = vadd.f32 %v2174_v34, %v2162_v10  ;;  %v2211_v11 = vmul.f32 %v3931_v57, %v4049_v21  ;;  %v2223_v39 = vadd.f32 %v2222_v20, %v2210_v49  ;;  %v4629_v57 = vld [vmem:[#allocation33_spill] sm:$0xff]  ;;  %v4636_v34 = vld [vmem:[#allocation42_spill] sm:$0xff]  ;;  %v4637_v20 = vld [vmem:[#allocation48_spill] sm:$0xff] }
 0x4d9   :  { %v2118_v31 = vmul.f32 %v4003_v5, %v4130_v59  ;;  %v2064_v52 = vmul.f32 %v4626_v40, %v4110_v9  ;;  %v2076_v47 = vadd.f32 %v2075_v33, %v2063_v24  ;;  %v2164_v14 = vmul.f32 %v4627_v6, %v4096_v17  ;;  %v4630_v5 = vld [vmem:[#allocation38_spill] sm:$0xff] }
 0x4da   :  { %v2129_v50 = vadd.f32 %v2128_v2, %v2116_v19  ;;  %v2176_v26 = vadd.f32 %v2175_v61, %v2163_v13  ;;  %v2212_v62 = vmul.f32 %v4628_v53, %v4056_v58  ;;  %v2224_v1 = vadd.f32 %v2223_v39, %v2211_v11  ;;  %v4631_v19 = vld [vmem:[#allocation34_spill] sm:$0xff]  ;;  %v4632_v58 = vld [vmem:[#allocation37_spill] sm:$0xff]  ;;  %v4635_v2 = vld [vmem:[#allocation39_spill] sm:$0xff] }
 0x4db   :  { %v2132_v36 = vsel %vm420_vm15, %v2119_v63, 0.0  ;;  %v2065_v21 = vmul.f32 %v4629_v57, %v4116_v44  ;;  %v2077_v27 = vadd.f32 %v2076_v47, %v2064_v52  ;;  %v2165_v41 = vmul.f32 %v4630_v5, %v4102_v29  ;;  %v4640_v52 = vld [vmem:[#allocation47_spill] sm:$0xff]  ;;  %v4227_v5 = vpop.permute.xlu1 %1219 }
 0x4dc   :  { %v2130_v18 = vadd.f32 %v2129_v50, %v2117_v12  ;;  %v2177_v43 = vadd.f32 %v2176_v26, %v2164_v14  ;;  %v2213_v55 = vmul.f32 %v3960_v56, %v4073_v54  ;;  %v2225_v37 = vadd.f32 %v2224_v1, %v2212_v62  ;;  %v4639_v50 = vld [vmem:[#allocation49_spill] sm:$0xff] }
 0x4dd   :  { %v2066_v42 = vmul.f32 %v4631_v19, %v4124_v60  ;;  %v2068_v46 = vmul.f32 %v4632_v58, %v4150_v35  ;;  %v2078_v16 = vadd.f32 %v2077_v27, %v2065_v21  ;;  %v2166_v12 = vmul.f32 %v4633_v32, %v4110_v9  ;;  %v2630_v58 = vld [vmem:[#allocation2] sm:$0xf] }
 0x4de   :  { %v2131_v4 = vadd.f32 %v2130_v18, %v2118_v31  ;;  %v2178_v28 = vadd.f32 %v2177_v43, %v2165_v41  ;;  %v2214_v38 = vmul.f32 %v4634_v7, %v4084_v51  ;;  %v2226_v10 = vadd.f32 %v2225_v37, %v2213_v55  ;;  %v2629_v31 = vld [vmem:[#allocation4 + $0x148] sm:$0xff] }
 0x4df   :  { %v2067_v56 = vmul.f32 %v4635_v2, %v4130_v59  ;;  %v2079_v54 = vadd.f32 %v2078_v16, %v2066_v42  ;;  %v2167_v23 = vmul.f32 %v4636_v34, %v4116_v44  ;;  %v2215_v63 = vmul.f32 %v4637_v20, %v4096_v17  ;;  %v4641_v41 = vld [vmem:[#allocation9_spill] sm:$0xff] }
 0x4e0   :  { %v2133_v3 = vadd.f32 %v2132_v36, %v2131_v4  ;;  %v2179_v49 = vadd.f32 %v2178_v28, %v2166_v12  ;;  %v2227_v30 = vadd.f32 %v2226_v10, %v2214_v38  ;;  %v2081_v33 = vsel %vm420_vm15, %v2068_v46, 0.0  ;;  %v4642_v4 = vld [vmem:[#allocation19_spill] sm:$0xff] }
 0x4e1   :  { %v2080_v24 = vadd.f32 %v2079_v54, %v2067_v56  ;;  %v2168_v51 = vmul.f32 %v4638_v0, %v4124_v60  ;;  %v2216_v61 = vmul.f32 %v4639_v50, %v4102_v29  ;;  %v2170_v40 = vmul.f32 %v2629_v31, %v4150_v35  ;;  %v4643_v0 = vld [vmem:[#allocation22_spill] sm:$0xff] }
 0x4e2   :  { %2134 = vadd.xlane.f32.xlu1 %v2133_v3  ;;  %v2180_v13 = vadd.f32 %v2179_v49, %v2167_v23  ;;  %v2228_v11 = vadd.f32 %v2227_v30, %v2215_v63  ;;  %v2169_v47 = vmul.f32 %v4640_v52, %v4130_v59  ;;  %v2217_v6 = vmul.f32 %v4007_v8, %v4110_v9 }
 0x4e3   :  { %v2082_v39 = vadd.f32 %v2081_v33, %v2080_v24  ;;  %v2218_v26 = vmul.f32 %v4011_v15, %v4116_v44  ;;  %v2183_v29 = vsel %vm420_vm15, %v2170_v40, 0.0  ;;  %v2219_v1 = vmul.f32 %v4016_v48, %v4124_v60  ;;  %v4225_v44 = vpop.permute.xlu0 %1188 }
 0x4e4   :  { %v2181_v17 = vadd.f32 %v2180_v13, %v2168_v51  ;;  %v2229_v14 = vadd.f32 %v2228_v11, %v2216_v61  ;;  %v2221_v57 = vmul.f32 %v4020_v45, %v4150_v35  ;;  %v2220_v8 = vmul.f32 %v4024_v22, %v4130_v59 }
 0x4e5   :  { %2083 = vadd.xlane.f32.xlu0 %v2082_v39  ;;  %v4230_v48 = vcvt.s32.f32 %v4641_v41  ;;  %v2723_v12 = vmov 13   ;;  %vm1055_vm0 = vcmp.eq.s32.totalorder %v4643_v0, 9  ;;  %vm1114_vm1 = vcmp.eq.s32.totalorder %v4643_v0, 10 }
 0x4e6   :  { %v2182_v18 = vadd.f32 %v2181_v17, %v2169_v47  ;;  %v2230_v53 = vadd.f32 %v2229_v14, %v2217_v6  ;;  %v2234_v27 = vsel %vm420_vm15, %v2221_v57, 0.0  ;;  %2534 = vset.pattern.permute.xlu1 %v2723_v12  ;;  %vm996_vm15 = vcmp.eq.s32.totalorder %v4643_v0, 8 }
 0x4e7   :  { %v4232_v60 = vpop.permute.xlu0 %1204  ;;  %vm1173_vm2 = vcmp.eq.s32.totalorder %v4643_v0, 11  ;;  %vm2103_vm3 = vcmp.eq.s32.totalorder %v4643_v0, 12  ;;  %vm1263_vm4 = vcmask 27651   ;;  %vm2154_vm5 = vcmp.eq.s32.totalorder %v4643_v0, 13 }
 0x4e8   :  { %v2184_v62 = vadd.f32 %v2183_v29, %v2182_v18  ;;  %v2231_v36 = vadd.f32 %v2230_v53, %v2218_v26  ;;  %v4644_v18 = vld [vmem:[#allocation16_spill] sm:$0xff]  ;;  %vm2205_vm6 = vcmp.eq.s32.totalorder %v4643_v0, 14  ;;  %vm2256_vm7 = vcmp.eq.s32.totalorder %v4643_v0, 15 }
 0x4e9   :  { %2555 = vlog2.f32 %v4644_v18  ;;  %vm971_vm8 = vcmp.eq.s32.totalorder %v4643_v0, 0  ;;  %vm1030_vm10 = vcmp.eq.s32.totalorder %v4643_v0, 1  ;;  %vm1089_vm11 = vcmp.eq.s32.totalorder %v4643_v0, 2 }
 0x4ea   :  { %2185 = vadd.xlane.f32.xlu1 %v2184_v62  ;;  %v2232_v9 = vadd.f32 %v2231_v36, %v2219_v1  ;;  %v4645_v36 = vld [vmem:[#allocation14_spill] sm:$0xff]  ;;  %vm1040_vm12 = vcmp.ge.s32.totalorder %v4643_v0, 10  ;;  %vm1041_vm13 = vcmp.lt.s32.totalorder %v4643_v0, 20  ;;  %vm1148_vm14 = vcmp.eq.s32.totalorder %v4643_v0, 3 }
 0x4eb   :  { %v4234_v35 = vpop.permute.xlu0 %1245 }
 0x4ec   :  { %v2233_v21 = vadd.f32 %v2232_v9, %v2220_v8 }
 0x4ee   :  { %v2235_v15 = vadd.f32 %v2234_v27, %v2233_v21 }
 0x4f0   :  { %2236 = vadd.xlane.f32.xlu1 %v2235_v15 }
 0x4fa   :  { %v969_v45 = vpop.xlane.xlu1 %968 }
 0x4fb   :  { %v970_v22 = vmul.f32 %v969_v45, %v4642_v4  ;;  %v988_v59 = vmul.f32 %v969_v45, %v4230_v48 }
 0x4fd   :  { %v990_v43 = vrot.slane %v988_v59, 4  ;;  %976 = vperm.xlu0 %2533, %v970_v22  }
 0x4ff   :  { %v991_v37 = vadd.f32 %v990_v43, %v988_v59  ;;  %v2556_v43 = vpop.eup %2555 }
 0x500   :  { %v4238_v55 = vpop.xlane.xlu0 %1086 }
 0x501   :  { %v1106_v19 = vmul.f32 %v4238_v55, %v4230_v48  ;;  %1260 = vrot.lane.b32.xlu1 %v2630_v58, %s2720_s20  ;;  %v992_v46 = vrot.slane %v991_v37, 2  ;;  %v1088_v18 = vmul.f32 %v4238_v55, %v4642_v4  ;;  %v4649_v55 = vld [vmem:[#allocation17_spill] sm:$0xff] }
 0x502   :  { %v4243_v32 = vpop.xlane.xlu1 %1027 }
 0x503   :  { %v1108_v42 = vrot.slane %v1106_v19, 4  ;;  %v1047_v3 = vmul.f32 %v4243_v32, %v4230_v48  ;;  %v993_v7 = vadd.f32 %v992_v46, %v991_v37  ;;  %v1290_v46 = vmul.f32 0.6931472, %v2556_v43 }
 0x505   :  { %v1109_v16 = vadd.f32 %v1108_v42, %v1106_v19  ;;  %v1049_v38 = vrot.slane %v1047_v3, 4  ;;  %v994_v54 = vrot.slane %v993_v7, 1 }
 0x507   :  { %v1110_v28 = vrot.slane %v1109_v16, 2  ;;  %v1050_v2 = vadd.f32 %v1049_v38, %v1047_v3  ;;  %v995_v30 = vadd.f32 %v994_v54, %v993_v7 }
 0x509   :  { %v1111_v10 = vadd.f32 %v1110_v28, %v1109_v16  ;;  %v4247_v56 = vpop.xlane.xlu0 %1145  ;;  %v1051_v23 = vrot.slane %v1050_v2, 2  ;;  %v997_v61 = vsel %vm996_vm15, %v995_v30, 0.0  ;;  %vm1042_vm15 = vmand %vm1040_vm12, %vm1041_vm13  ;;  %vm1176_vm12 = vcmask 31744  }
 0x50a   :  { %v1165_v34 = vmul.f32 %v4247_v56, %v4230_v48 }
 0x50b   :  { %v1112_v49 = vrot.slane %v1111_v10, 1  ;;  %v1052_v63 = vadd.f32 %v1051_v23, %v1050_v2 }
 0x50c   :  { %v1167_v20 = vrot.slane %v1165_v34, 4 }
 0x50d   :  { %v1053_v33 = vrot.slane %v1052_v63, 1  ;;  %v1113_v51 = vadd.f32 %v1112_v49, %v1111_v10  ;;  %v2724_v10 = vmov 14  }
 0x50e   :  { %v1168_v24 = vadd.f32 %v1167_v20, %v1165_v34  ;;  %v4646_v20 = vld [vmem:[#allocation12_spill] sm:$0xff] }
 0x50f   :  { %v1054_v50 = vadd.f32 %v1053_v33, %v1052_v63  ;;  %v1115_v40 = vsel %vm1114_vm1, %v1113_v51, 0.0  ;;  %v4266_v63 = vsub.f32 %v4646_v20, %v1290_v46  ;;  %vm1100_vm1 = vcmp.lt.s32.totalorder %v4643_v0, 30 }
 0x510   :  { %v1169_v13 = vrot.slane %v1168_v24, 2 }
 0x511   :  { %v1056_v39 = vsel %vm1055_vm0, %v1054_v50, 0.0  ;;  %vm1099_vm0 = vcmp.ge.s32.totalorder %v4643_v0, 20 }
 0x512   :  { %v1170_v11 = vadd.f32 %v1169_v13, %v1168_v24  ;;  %v1057_v31 = vadd.f32 %v1056_v39, %v997_v61  ;;  %v4647_v61 = vmov 0  }
 0x514   :  { %v1171_v52 = vrot.slane %v1170_v11, 1  ;;  %v1116_v47 = vadd.f32 %v1115_v40, %v1057_v31 }
 0x516   :  { %v1172_v17 = vadd.f32 %v1171_v52, %v1170_v11 }
 0x518   :  { %v1174_v6 = vsel %vm1173_vm2, %v1172_v17, 0.0  ;;  %vm1158_vm2 = vcmp.ge.s32.totalorder %v4643_v0, 30 }
 0x519   :  { %v1175_v14 = vadd.f32 %v1174_v6, %v1116_v47 }
 0x56b   :  { %v2135_v26 = vpop.xlane.xlu1 %2134 }
 0x56c   :  { %v2146_v53 = vmul.f32 %v2135_v26, %v4230_v48  ;;  %v2136_v45 = vmul.f32 %v2135_v26, %v4645_v36  ;;  %v1147_v26 = vmul.f32 %v4247_v56, %v4642_v4 }
 0x56e   :  { %v2148_v29 = vrot.slane %v2146_v53, 4  ;;  %v2084_v62 = vpop.xlane.xlu0 %2083 }
 0x56f   :  { %v2085_v57 = vmul.f32 %v2084_v62, %v4645_v36  ;;  %v2095_v8 = vmul.f32 %v2084_v62, %v4230_v48  ;;  %v2631_v62 = vld [vmem:[#allocation2 + $0x4] sm:$0xf] }
 0x570   :  { %v2149_v1 = vadd.f32 %v2148_v29, %v2146_v53  ;;  %v2725_v53 = vmov 15  }
 0x571   :  { %v2097_v21 = vrot.slane %v2095_v8, 4  ;;  %2088 = vperm.xlu0 %2533, %v2085_v57  }
 0x572   :  { %v2150_v9 = vrot.slane %v2149_v1, 2 }
 0x573   :  { %v2098_v27 = vadd.f32 %v2097_v21, %v2095_v8  ;;  %v2186_v41 = vpop.xlane.xlu1 %2185  ;;  %v2417_v21 = vsel %vm971_vm8, 1.0, %v4589_v25 }
 0x574   :  { %v2151_v15 = vadd.f32 %v2150_v9, %v2149_v1  ;;  %v2197_v22 = vmul.f32 %v2186_v41, %v4230_v48  ;;  %v2187_v3 = vmul.f32 %v2186_v41, %v4645_v36 }
 0x575   :  { %v2099_v59 = vrot.slane %v2098_v27, 2  ;;  %2537 = vset.pattern.permute.xlu0 %v2723_v12 }
 0x576   :  { %v2199_v37 = vrot.slane %v2197_v22, 4  ;;  %2139 = vperm.xlu0 %2537, %v2136_v45   ;;  %v2152_v42 = vrot.slane %v2151_v15, 1  ;;  %v2421_v45 = vsel %vm1089_vm11, 1.0, %v4589_v25 }
 0x577   :  { %v2100_v19 = vadd.f32 %v2099_v59, %v2098_v27  ;;  %v2419_v27 = vsel %vm1030_vm10, 1.0, %v4589_v25 }
 0x578   :  { %v2200_v58 = vadd.f32 %v2199_v37, %v2197_v22  ;;  %v2153_v12 = vadd.f32 %v2152_v42, %v2151_v15  ;;  %v977_v1 = vpop.permute.xlu0 %976  ;;  %v2423_v37 = vsel %vm1148_vm14, 1.0, %v4589_v25 }
 0x579   :  { %v2101_v16 = vrot.slane %v2100_v19, 1  ;;  %v2237_v28 = vpop.xlane.xlu1 %2236  ;;  %v979_v22 = vmul.f32 %v2417_v21, %v977_v1 }
 0x57a   :  { %v2201_v7 = vrot.slane %v2200_v58, 2  ;;  %v2248_v38 = vmul.f32 %v2237_v28, %v4230_v48  ;;  %2538 = vset.pattern.permute.xlu0 %v2724_v10  ;;  %v2155_v51 = vsel %vm2154_vm5, %v2153_v12, 0.0  ;;  %v2238_v29 = vmul.f32 %v2237_v28, %v4645_v36 }
 0x57b   :  { %v2102_v2 = vadd.f32 %v2101_v16, %v2100_v19  ;;  %2190 = vperm.xlu0 %2538, %v2187_v3   ;;  %vm982_vm5 = vcmp.lt.s32.totalorder %v4643_v0, 10 }
 0x57c   :  { %v2202_v54 = vadd.f32 %v2201_v7, %v2200_v58  ;;  %v2250_v34 = vrot.slane %v2248_v38, 4  ;;  %v2420_v58 = vsel %vm1042_vm15, 1.0, %v4589_v25 }
 0x57d   :  { %v2104_v23 = vsel %vm2103_vm3, %v2102_v2, 0.0  ;;  %v1261_v49 = vpop.permute.xlu1 %1260  ;;  %vm1159_vm3 = vcmp.lt.s32.totalorder %v4643_v0, 40 }
 0x57e   :  { %v2203_v30 = vrot.slane %v2202_v54, 1  ;;  %v2251_v24 = vadd.f32 %v2250_v34, %v2248_v38  ;;  %v1264_v33 = vsel %vm1263_vm4, %v1261_v49, 0.0  ;;  %v2105_v48 = vadd.f32 %v2104_v23, %v1175_v14 }
 0x57f   :  { %1265 = vadd.xlane.f32.xlu1 %v1264_v33  ;;  %2270 = vrot.lane.b32.xlu0 %v4266_v63, %s2721_s21  ;;  %v1029_v14 = vmul.f32 %v4243_v32, %v4642_v4  ;;  %v4648_v32 = vld [vmem:[#allocation15_spill] sm:$0xff]  ;;  %v2418_v38 = vsel %vm982_vm5, 1.0, %v4589_v25 }
 0x580   :  { %v2204_v13 = vadd.f32 %v2203_v30, %v2202_v54  ;;  %v2252_v50 = vrot.slane %v2251_v24, 2  ;;  %2539 = vset.pattern.permute.xlu0 %v4647_v61  ;;  %v2156_v11 = vadd.f32 %v2155_v51, %v2105_v48  ;;  %v986_v48 = vmul.f32 %v2418_v38, %v977_v1 }
 0x582   :  { %v2253_v39 = vadd.f32 %v2252_v50, %v2251_v24  ;;  %v2206_v31 = vsel %vm2205_vm6, %v2204_v13, 0.0  ;;  %vm1101_vm6 = vmand %vm1099_vm0, %vm1100_vm1  ;;  %vm2384_vm1 = vcmp.eq.s32.totalorder %v4643_v0, 4 }
 0x583   :  { %v2207_v40 = vadd.f32 %v2206_v31, %v2156_v11  ;;  %v2422_v54 = vsel %vm1101_vm6, 1.0, %v4589_v25 }
 0x584   :  { %v2254_v52 = vrot.slane %v2253_v39, 1 }
 0x586   :  { %v2255_v47 = vadd.f32 %v2254_v52, %v2253_v39 }
 0x588   :  { %v2257_v17 = vsel %vm2256_vm7, %v2255_v47, 0.0  ;;  %vm1160_vm7 = vmand %vm1158_vm2, %vm1159_vm3  ;;  %vm2387_vm2 = vcmp.eq.s32.totalorder %v4643_v0, 5 }
 0x589   :  { %v4274_v6 = vadd.f32 %v2257_v17, %v2207_v40  ;;  %v2424_v23 = vsel %vm1160_vm7, 1.0, %v4589_v25 }
 0x590   :  { %1035 = vperm.xlu1 %2534, %v1029_v14  }
 0x594   :  { %2535 = vset.pattern.permute.xlu1 %v2724_v10 }
 0x595   :  { %1094 = vperm.xlu1 %2535, %v1088_v18  }
 0x599   :  { %2536 = vset.pattern.permute.xlu1 %v2725_v53 }
 0x59a   :  { %1153 = vperm.xlu1 %2536, %v1147_v26  }
 0x59e   :  { %2241 = vperm.xlu1 %2536, %v2238_v29  }
 0x5a2   :  { %2341 = vrot.lane.b32.xlu1 %v2631_v62, %s2720_s20 }
 0x5a3   :  { %2540 = vset.pattern.permute.xlu1 %v4647_v61 }
 0x5a6   :  { %2285 = vrot.lane.b32.xlu1 %v4648_v32, %s2718_s18 }
 0x5aa   :  { %2300 = vrot.lane.b32.xlu1 %v4649_v55, %s2719_s19 }
 0x5ec   :  { %v2089_v57 = vpop.permute.xlu0 %2088 }
 0x5ed   :  { %v2091_v16 = vmul.f32 %v2417_v21, %v2089_v57  ;;  %v2093_v51 = vmul.f32 %v2418_v38, %v2089_v57 }
 0x5f1   :  { %v2140_v9 = vpop.permute.xlu0 %2139 }
 0x5f2   :  { %v2142_v19 = vmul.f32 %v2419_v27, %v2140_v9  ;;  %v2144_v12 = vmul.f32 %v2420_v58, %v2140_v9  ;;  %v4651_v9 = vld [vmem:[#allocation11_spill] sm:$0xff] }
 0x5f4   :  { %v2143_v10 = vadd.f32 %v2142_v19, %v2091_v16  ;;  %v2145_v11 = vadd.f32 %v2144_v12, %v2093_v51 }
 0x5f6   :  { %v2191_v43 = vpop.permute.xlu0 %2190 }
 0x5f7   :  { %v2193_v3 = vmul.f32 %v2421_v45, %v2191_v43  ;;  %v2195_v50 = vmul.f32 %v2422_v54, %v2191_v43  ;;  %v4338_v43 = vld [vmem:[%s4376_s0 + $0x8] sm:$0xff] }
 0x5f9   :  { %v2194_v20 = vadd.f32 %v2193_v3, %v2143_v10  ;;  %v2196_v26 = vadd.f32 %v2195_v50, %v2145_v11 }
 0x608   :  { %v4289_v56 = vpop.xlane.xlu1 %1265 }
 0x60c   :  { %v1036_v8 = vpop.permute.xlu1 %1035 }
 0x60d   :  { %v1038_v15 = vmul.f32 %v2419_v27, %v1036_v8  ;;  %v1045_v34 = vmul.f32 %v2420_v58, %v1036_v8 }
 0x60f   :  { %v1039_v42 = vadd.f32 %v1038_v15, %v979_v22  ;;  %v1046_v39 = vadd.f32 %v1045_v34, %v986_v48  ;;  %v4652_v34 = vld [vmem:[#allocation23_spill] sm:$0xff] }
 0x610   :  { %v1095_v41 = vpop.permute.xlu1 %1094 }
 0x611   :  { %v1097_v59 = vmul.f32 %v2421_v45, %v1095_v41  ;;  %v1104_v13 = vmul.f32 %v2422_v54, %v1095_v41 }
 0x613   :  { %v1098_v28 = vadd.f32 %v1097_v59, %v1039_v42  ;;  %v2633_v42 = vld [vmem:[%s4376_s0] sm:$0xff] }
 0x615   :  { %v1154_v46 = vpop.permute.xlu1 %1153 }
 0x616   :  { %v1156_v7 = vmul.f32 %v2423_v37, %v1154_v46  ;;  %v1163_v31 = vmul.f32 %v2424_v23, %v1154_v46 }
 0x618   :  { %v1157_v2 = vadd.f32 %v1156_v7, %v1098_v28 }
 0x619   :  { %v2242_v49 = vpop.permute.xlu1 %2241 }
 0x61a   :  { %v2244_v30 = vmul.f32 %v2423_v37, %v2242_v49  ;;  %v1177_v24 = vsel %vm1176_vm12, %v1157_v2, 0.0  ;;  %v1222_v33 = vmul.f32 %v4227_v5, %v1157_v2  ;;  %v2246_v40 = vmul.f32 %v2424_v23, %v2242_v49  ;;  %v2271_v37 = vpop.permute.xlu0 %2270 }
 0x61b   :  { %1178 = vadd.xlane.f32.xlu1 %v1177_v24  ;;  %v1180_v18 = vmul.f32 %v1157_v2, %v4642_v4  ;;  %v1105_v5 = vadd.f32 %v1104_v13, %v1046_v39  ;;  %v1207_v1 = vmul.f32 %v4232_v60, %v1157_v2  ;;  %v4650_v4 = vld [vmem:[#allocation10_spill] sm:$0xff] }
 0x61c   :  { %v2245_v61 = vadd.f32 %v2244_v30, %v2194_v20  ;;  %v1223_v47 = vsel %vm1176_vm12, %v1222_v33, 0.0  ;;  %v2247_v62 = vadd.f32 %v2246_v40, %v2196_v26 }
 0x61d   :  { %v2342_v52 = vpop.permute.xlu1 %2341  ;;  %v1164_v53 = vadd.f32 %v1163_v31, %v1105_v5  ;;  %v1181_v55 = vsel %vm1176_vm12, %v1180_v18, 0.0  ;;  %v1208_v57 = vsel %vm1176_vm12, %v1207_v1, 0.0 }
 0x61e   :  { %v2259_v17 = vsel %vm1176_vm12, %v2245_v61, 0.0  ;;  %v2262_v14 = vmul.f32 %v2245_v61, %v4645_v36  ;;  %v2344_v36 = vsel %vm1263_vm4, %v2342_v52, 0.0  ;;  %v2314_v21 = vmul.f32 %v2247_v62, %v4651_v9 }
 0x61f   :  { %1224 = vadd.xlane.f32.xlu1 %v1223_v47  ;;  %2260 = vadd.xlane.f32.xlu0 %v2259_v17  ;;  %v1233_v8 = vmul.f32 %v1164_v53, %v4650_v4  ;;  %vm1194_vm4 = vcmask 7168  }
 0x620   :  { %v2263_v32 = vsel %vm1176_vm12, %v2262_v14, 0.0  ;;  %v2315_v22 = vsel %vm215_vm9, %v2314_v21, 0.0 }
 0x621   :  { %v2286_v29 = vpop.permute.xlu1 %2285  ;;  %v1234_v45 = vsel %vm215_vm9, %v1233_v8, 0.0  ;;  %vm1248_vm9 = vcmp.ge.f32.partialorder %v2633_v42, %v4234_v35 }
 0x622   :  { %v2288_v15 = vmul.f32 %v2286_v29, %v2245_v61  ;;  %v2425_v58 = vsel %vm1248_vm9, 1.0, %v4589_v25 }
 0x623   :  { %2264 = vadd.xlane.f32.xlu1 %v2263_v32  ;;  %1182 = vadd.xlane.f32.xlu0 %v1181_v55  ;;  %v1252_v3 = vsel %vm1194_vm4, %v2425_v58, 0.0 }
 0x624   :  { %v2289_v60 = vsel %vm1176_vm12, %v2288_v15, 0.0  ;;  %v1253_v54 = vrot.slane %v1252_v3, 4 }
 0x625   :  { %v2301_v27 = vpop.permute.xlu1 %2300 }
 0x626   :  { %v2303_v41 = vmul.f32 %v2301_v27, %v2245_v61  ;;  %v1254_v48 = vadd.f32 %v1253_v54, %v1252_v3 }
 0x627   :  { %1209 = vadd.xlane.f32.xlu0 %v1208_v57  ;;  %2345 = vadd.xlane.f32.xlu1 %v2344_v36 }
 0x628   :  { %v2304_v59 = vsel %vm1176_vm12, %v2303_v41, 0.0  ;;  %v1255_v17 = vrot.slane %v1254_v48, 2 }
 0x62a   :  { %v1256_v8 = vadd.f32 %v1255_v17, %v1254_v48 }
 0x62b   :  { %1235 = vadd.xlane.f32.xlu0 %v1234_v45  ;;  %2316 = vadd.xlane.f32.xlu1 %v2315_v22 }
 0x62f   :  { %2290 = vadd.xlane.f32.xlu0 %v2289_v60  ;;  %2305 = vadd.xlane.f32.xlu1 %v2304_v59 }
 0x640   :  { %2326 = vrot.lane.b32.xlu1 %v4338_v43, %s2721_s21 }
 0x6a4   :  { %v1179_v19 = vpop.xlane.xlu1 %1178 }
 0x6a5   :  { %v1184_v28 = vsub.f32 1.0, %v1179_v19 }
 0x6a8   :  { %v2261_v46 = vpop.xlane.xlu0 %2260  ;;  %v1225_v16 = vpop.xlane.xlu1 %1224 }
 0x6a9   :  { %v2266_v7 = vsub.f32 1.0, %v2261_v46  ;;  %v1226_v11 = vrot.slane %v1225_v16, 4 }
 0x6ab   :  { %v1227_v29 = vadd.f32 %v1226_v11, %v1225_v16 }
 0x6ac   :  { %v1183_v38 = vpop.xlane.xlu0 %1182  ;;  %v2265_v10 = vpop.xlane.xlu1 %2264 }
 0x6ad   :  { %v1185_v2 = vadd.f32 %v1184_v28, %v1183_v38  ;;  %v2267_v12 = vadd.f32 %v2266_v7, %v2265_v10  ;;  %v1228_v60 = vrot.slane %v1227_v29, 2 }
 0x6af   :  { %vm1186_vm13 = vcmp.eq.f32.partialorder %v1185_v2, 0.0  ;;  %vm2268_vm15 = vcmp.eq.f32.partialorder %v2267_v12, 0.0 }
 0x6b0   :  { %v1191_v23 = vsel %vm1186_vm13, %v4652_v34, %v4225_v44  ;;  %v2273_v35 = vsel %vm2268_vm15, %v4266_v63, %v2271_v37  ;;  %v1210_v49 = vpop.xlane.xlu0 %1209  ;;  %v4351_v20 = vpop.xlane.xlu1 %2345 }
 0x6b1   :  { %v1192_v30 = vsub.f32 0.0, %v1191_v23  ;;  %v2274_v24 = vsub.f32 0.0, %v2273_v35  ;;  %v1211_v33 = vrot.slane %v1210_v49, 4  ;;  %v2351_v51 = vadd.f32 %v4351_v20, %v4289_v56 }
 0x6b3   :  { %v1195_v13 = vsel %vm1194_vm4, %v1192_v30, 0.0  ;;  %v2276_v50 = vsel %vm1194_vm4, %v2274_v24, 0.0  ;;  %v1212_v61 = vadd.f32 %v1211_v33, %v1210_v49  ;;  %v2354_v31 = vmax.f32 %v2351_v51, 1.0 }
 0x6b4   :  { %v1196_v39 = vrot.slane %v1195_v13, 4  ;;  %v2277_v44 = vrot.slane %v2276_v50, 4  ;;  %v1236_v63 = vpop.xlane.xlu0 %1235  ;;  %v2317_v40 = vpop.xlane.xlu1 %2316  ;;  %v1229_v24 = vadd.f32 %v1228_v60, %v1227_v29  ;;  %v1257_v51 = vrot.slane %v1256_v8, 1 }
 0x6b5   :  { %v1237_v52 = vrot.slane %v1236_v63, 4  ;;  %v2318_v47 = vrot.slane %v2317_v40, 4  ;;  %v1213_v5 = vrot.slane %v1212_v61, 2  ;;  %2557 = vrcp.f32 %v2354_v31 }
 0x6b6   :  { %v1197_v14 = vadd.f32 %v1196_v39, %v1195_v13  ;;  %v2278_v18 = vadd.f32 %v2277_v44, %v2276_v50  ;;  %v1230_v39 = vrot.slane %v1229_v24, 1 }
 0x6b7   :  { %v1238_v26 = vadd.f32 %v1237_v52, %v1236_v63  ;;  %v2319_v53 = vadd.f32 %v2318_v47, %v2317_v40  ;;  %v1214_v15 = vadd.f32 %v1213_v5, %v1212_v61  ;;  %v1258_v63 = vadd.f32 %v1257_v51, %v1256_v8 }
 0x6b8   :  { %v1198_v62 = vrot.slane %v1197_v14, 2  ;;  %v2279_v32 = vrot.slane %v2278_v18, 2  ;;  %v2291_v55 = vpop.xlane.xlu0 %2290  ;;  %v2306_v1 = vpop.xlane.xlu1 %2305 }
 0x6b9   :  { %v1239_v57 = vrot.slane %v1238_v26, 2  ;;  %v2320_v36 = vrot.slane %v2319_v53, 2  ;;  %v2292_v4 = vrot.slane %v2291_v55, 4  ;;  %v2307_v9 = vrot.slane %v2306_v1, 4 }
 0x6ba   :  { %v1199_v21 = vadd.f32 %v1198_v62, %v1197_v14  ;;  %v2280_v27 = vadd.f32 %v2279_v32, %v2278_v18  ;;  %v1215_v10 = vrot.slane %v1214_v15, 1  ;;  %v1268_v17 = vsub.f32 %v1258_v63, %v4289_v56 }
 0x6bb   :  { %v1240_v41 = vadd.f32 %v1239_v57, %v1238_v26  ;;  %v2321_v45 = vadd.f32 %v2320_v36, %v2319_v53  ;;  %v2293_v22 = vadd.f32 %v2292_v4, %v2291_v55  ;;  %v2308_v59 = vadd.f32 %v2307_v9, %v2306_v1 }
 0x6bc   :  { %v2327_v37 = vpop.permute.xlu1 %2326  ;;  %v1200_v19 = vrot.slane %v1199_v21, 1  ;;  %v2281_v42 = vrot.slane %v2280_v27, 1  ;;  %v1216_v13 = vadd.f32 %v1215_v10, %v1214_v15  ;;  %v1231_v14 = vadd.f32 %v1230_v39, %v1229_v24 }
 0x6bd   :  { %v1241_v58 = vrot.slane %v1240_v41, 1  ;;  %v2322_v46 = vrot.slane %v2321_v45, 1  ;;  %v2294_v16 = vrot.slane %v2293_v22, 2  ;;  %vm2329_vm0 = vcmp.ge.f32.partialorder %v4338_v43, %v2327_v37 }
 0x6be   :  { %v2309_v3 = vrot.slane %v2308_v59, 2  ;;  %v2443_v28 = vsel %vm2329_vm0, 1.0, %v4589_v25  ;;  %v1201_v7 = vadd.f32 %v1200_v19, %v1199_v21  ;;  %v2282_v38 = vadd.f32 %v2281_v42, %v2280_v27 }
 0x6bf   :  { %v1242_v2 = vadd.f32 %v1241_v58, %v1240_v41  ;;  %v2295_v12 = vadd.f32 %v2294_v16, %v2293_v22  ;;  %v2333_v54 = vsel %vm1194_vm4, %v2443_v28, 0.0  ;;  %v2323_v34 = vadd.f32 %v2322_v46, %v2321_v45 }
 0x6c0   :  { %v2310_v23 = vadd.f32 %v2309_v3, %v2308_v59  ;;  %v2334_v35 = vrot.slane %v2333_v54, 4  ;;  %v2283_v49 = vadd.f32 %v2282_v38, %v1201_v7  ;;  %v1269_v32 = vand.u32 2147483647, %v1268_v17 }
 0x6c1   :  { %v2296_v30 = vrot.slane %v2295_v12, 1  ;;  %v2324_v50 = vadd.f32 %v2323_v34, %v1242_v2 }
 0x6c2   :  { %v2335_v33 = vadd.f32 %v2334_v35, %v2333_v54  ;;  %v2352_v48 = vmul.f32 0.0625, %v2283_v49  ;;  %v2311_v25 = vrot.slane %v2310_v23, 1  ;;  %v2558_v11 = vpop.eup %2557 }
 0x6c3   :  { %v2297_v43 = vadd.f32 %v2296_v30, %v2295_v12  ;;  %v2358_v40 = vmul.f32 %v2558_v11, %v2324_v50 }
 0x6c4   :  { %v2336_v61 = vrot.slane %v2335_v33, 2  ;;  %2368 = vperm.xlu0 %2539, %v2352_v48   ;;  %v2312_v52 = vadd.f32 %v2311_v25, %v2310_v23  ;;  %v2359_v53 = vmul.f32 3.0, %v2352_v48 }
 0x6c5   :  { %v2298_v44 = vadd.f32 %v2297_v43, %v1216_v13  ;;  %v2360_v29 = vmul.f32 5.0, %v2358_v40  ;;  %v2385_v58 = vsel %vm2384_vm1, %v2358_v40, 0.0 }
 0x6c6   :  { %v2337_v31 = vadd.f32 %v2336_v61, %v2335_v33  ;;  %v2313_v26 = vadd.f32 %v2312_v52, %v1231_v14 }
 0x6c7   :  { %v2356_v18 = vmul.f32 %v2558_v11, %v2298_v44  ;;  %v2361_v36 = vadd.f32 %v2360_v29, %v2359_v53 }
 0x6c8   :  { %v2338_v47 = vrot.slane %v2337_v31, 1  ;;  %v2357_v57 = vmul.f32 %v2558_v11, %v2313_v26 }
 0x6c9   :  { %v2362_v1 = vmul.f32 2.0, %v2356_v18  ;;  %v2380_v60 = vsel %vm1089_vm11, %v2356_v18, 0.0 }
 0x6ca   :  { %v2339_v5 = vadd.f32 %v2338_v47, %v2337_v31  ;;  %v2364_v21 = vmul.f32 2.0, %v2357_v57  ;;  %v2382_v37 = vsel %vm1148_vm14, %v2357_v57, 0.0 }
 0x6cb   :  { %v2363_v9 = vadd.f32 %v2362_v1, %v2361_v36 }
 0x6cc   :  { %v2348_v62 = vsub.f32 %v2339_v5, %v4351_v20 }
 0x6cd   :  { %v2365_v27 = vadd.f32 %v2364_v21, %v2363_v9 }
 0x6ce   :  { %v2349_v55 = vand.u32 2147483647, %v2348_v62 }
 0x6d0   :  { %v2350_v4 = vadd.f32 %v2349_v55, %v1269_v32 }
 0x6d2   :  { %v2353_v8 = vmul.f32 0.5, %v2350_v4 }
 0x6d4   :  { %2375 = vperm.xlu1 %2540, %v2353_v8  }
 0x6d8   :  { %2390 = vperm.xlu1 %2540, %v2365_v27  }
 0x73f   :  { %v2369_v56 = vpop.permute.xlu0 %2368 }
 0x740   :  { %v2371_v15 = vsel %vm971_vm8, %v2369_v56, 0.0 }
 0x741   :  { %v2372_v41 = vadd.f32 %v2371_v15, %v4274_v6 }
 0x74f   :  { %v2376_v45 = vpop.permute.xlu1 %2375 }
 0x750   :  { %v2378_v20 = vsel %vm1030_vm10, %v2376_v45, 0.0 }
 0x751   :  { %v2379_v22 = vadd.f32 %v2378_v20, %v2372_v41 }
 0x753   :  { %v2381_v59 = vadd.f32 %v2380_v60, %v2379_v22  ;;  %v2391_v42 = vpop.permute.xlu1 %2390 }
 0x754   :  { %v2393_v46 = vsel %vm2387_vm2, %v2391_v42, 0.0 }
 0x755   :  { %v2383_v19 = vadd.f32 %v2382_v37, %v2381_v59 }
 0x757   :  { %v2386_v6 = vadd.f32 %v2385_v58, %v2383_v19 }
 0x759   :  { %v2394_v16 = vadd.f32 %v2393_v46, %v2386_v6 }
 0x75b   :  { %2395 = vst [vmem:[%s4381_s5 - $0x3] sm:$0x8] %v2394_v16 }
 0x75c   :  { %2400 = vsyncpa [#allocation3], 1 }
 0x75d   :  { %2401 = vsyncpa [#allocation5], 1 }

</bundles_post_ra>
